<compile_context>
chip_gen: v5e
topology: v5e:2x2
jax: 0.10.0
libtpu: 0.0.40
codegen_flags: <defaults>
</compile_context>

<pallas_src>
import jax
import jax.numpy as jnp
from jax import lax
from jax.experimental import pallas as pl
from jax.experimental.pallas import tpu as pltpu


def _cm_fused_kernel(x_ref, w1_ref, w2_ref, o_ref, xpad_ref, hpad_ref):
    """Fused conv3x3+ReLU -> conv3x3+ReLU for one (image, row-block) grid step.

    x_ref:    (1, H, W, Cin)        whole image for batch element n (VMEM)
    w1_ref:   (9*Cin, Cmid_p)       conv1 weights, (kh,kw,cin) flattened, Cout padded to 128
    w2_ref:   (9*Cmid_p, Cout_p)    conv2 weights, (kh,kw,cin) flattened, both dims padded
    o_ref:    (1, TH, W, Cout_p)    output row block
    xpad_ref: (H+4, W+2, Cin)       zero-padded copy of the image (scratch)
    hpad_ref: (TH+2, W+2, Cmid_p)   column-padded stage-1 slab (scratch)
    """
    _, H, W, Cin = x_ref.shape
    _, TH, _, Cout_p = o_ref.shape
    Cmid_p = w1_ref.shape[1]

    r = pl.program_id(1)
    n_r = pl.num_programs(1)

    # Fill the zero-padded image copy once per batch element (r == 0).
    @pl.when(r == 0)
    def _():
        xpad_ref[...] = jnp.zeros_like(xpad_ref)
        xpad_ref[2:H + 2, 1:W + 1, :] = x_ref[0]
        hpad_ref[...] = jnp.zeros_like(hpad_ref)  # boundary cols stay 0 forever

    r0 = pl.multiple_of(r * TH, TH)

    # ---- stage 1: conv1 + ReLU on TH+2 rows (1-row halo for conv2) --------
    # xwin[t, q, :] = padded_x[r0 + t, q, :]
    xwin = xpad_ref[pl.ds(r0, TH + 4)]                       # (TH+4, W+2, Cin)
    p1 = jnp.concatenate(
        [xwin[kh:kh + TH + 2, kw:kw + W, :]
         for kh in range(3) for kw in range(3)],
        axis=-1)                                             # (TH+2, W, 9*Cin)
    h = jnp.dot(p1.reshape((TH + 2) * W, 9 * Cin), w1_ref[...],
                preferred_element_type=jnp.float32)
    h = jnp.maximum(h, 0.0).reshape(TH + 2, W, Cmid_p)

    # Slab rows that fall outside the image correspond to conv2's zero padding
    # of h, not to conv1 outputs -> force them to zero.
    t = lax.broadcasted_iota(jnp.int32, (TH + 2, 1, 1), 0)
    kill = ((r == 0) & (t == 0)) | ((r == n_r - 1) & (t == TH + 1))
    h = jnp.where(kill, 0.0, h)

    # ---- stage 2: conv2 + ReLU on the TH output rows -----------------------
    hpad_ref[:, 1:W + 1, :] = h                              # interior columns
    hwin = hpad_ref[...]                                     # (TH+2, W+2, Cmid_p)
    p2 = jnp.concatenate(
        [hwin[kh:kh + TH, kw:kw + W, :]
         for kh in range(3) for kw in range(3)],
        axis=-1)                                             # (TH, W, 9*Cmid_p)
    y = jnp.dot(p2.reshape(TH * W, 9 * Cmid_p), w2_ref[...],
                preferred_element_type=jnp.float32)
    y = jnp.maximum(y, 0.0).reshape(1, TH, W, Cout_p)
    o_ref[...] = y.astype(o_ref.dtype)


def cm_forward(x_nchw, w1_hwio, w2_hwio):
    """Forward pass of CM.  Input NCHW (PyTorch convention), output NCHW.

    w1_hwio: (3, 3, Cin,  Cmid)   f32
    w2_hwio: (3, 3, Cmid, Cout)   f32
    """
    N, Cin, H, W = x_nchw.shape
    assert w1_hwio.shape[:3] == (3, 3, Cin)
    Cmid = w1_hwio.shape[-1]
    assert w2_hwio.shape[:3] == (3, 3, Cmid)
    Cout = w2_hwio.shape[-1]

    LANE = 128
    Cmid_p = -(-Cmid // LANE) * LANE
    Cout_p = -(-Cout // LANE) * LANE

    # Flatten weights to (9*Cin, Cout) in (kh, kw, cin) order; zero-pad the
    # channel dims to multiples of 128 so all MXU operands / stores are
    # lane-dense.  (Tiny one-off HBM work, done outside the kernel.)
    w1m = jnp.pad(w1_hwio.astype(jnp.float32),
                  ((0, 0), (0, 0), (0, 0), (0, Cmid_p - Cmid)))
    w1m = w1m.reshape(9 * Cin, Cmid_p)
    w2m = jnp.pad(w2_hwio.astype(jnp.float32),
                  ((0, 0), (0, 0), (0, Cmid_p - Cmid), (0, Cout_p - Cout)))
    w2m = w2m.reshape(9 * Cmid_p, Cout_p)

    x_nhwc = jnp.transpose(x_nchw.astype(jnp.float32), (0, 2, 3, 1))

    # Row-block size (must divide H).
    if H % 16 == 0 and H > 16:
        TH = 16
    elif H % 8 == 0 and H > 8:
        TH = 8
    else:
        TH = H
    n_rb = H // TH

    grid_spec = pltpu.PrefetchScalarGridSpec(
        num_scalar_prefetch=0,
        grid=(N, n_rb),
        in_specs=[
            # whole image per batch element; block index is constant in r so
            # it is only DMA'd when n changes.
            pl.BlockSpec((1, H, W, Cin), lambda n, r: (n, 0, 0, 0)),
            pl.BlockSpec((9 * Cin, Cmid_p), lambda n, r: (0, 0)),
            pl.BlockSpec((9 * Cmid_p, Cout_p), lambda n, r: (0, 0)),
        ],
        out_specs=pl.BlockSpec((1, TH, W, Cout_p), lambda n, r: (n, r, 0, 0)),
        scratch_shapes=[
            pltpu.VMEM((H + 4, W + 2, Cin), jnp.float32),        # padded image
            pltpu.VMEM((TH + 2, W + 2, Cmid_p), jnp.float32),    # padded h slab
        ],
    )

    y_p = pl.pallas_call(
        _cm_fused_kernel,
        out_shape=jax.ShapeDtypeStruct((N, H, W, Cout_p), jnp.float32),
        grid_spec=grid_spec,
        compiler_params=pltpu.CompilerParams(
            dimension_semantics=("parallel", "arbitrary"),
            vmem_limit_bytes=32 * 1024 * 1024),
    )(x_nhwc, w1m, w2m)

    y = y_p[..., :Cout]                       # drop the lane padding
    return jnp.transpose(y, (0, 3, 1, 2))     # back to NCHW


def _conv_relu_ref(x_nhwc, w_hwio):
    y = lax.conv_general_dilated(
        x_nhwc, w_hwio, window_strides=(1, 1), padding="SAME",
        dimension_numbers=("NHWC", "HWIO", "NHWC"))
    return jnp.maximum(y, 0.0)


if __name__ == "__main__":
    # Small shapes consistent with the module (input_dim -> embed_dim).
    N, Cin, Cemb, H, W = 2, 32, 64, 16, 16   # input_dim=32, embed_dim=64

    key = jax.random.PRNGKey(0)
    kx, k1, k2 = jax.random.split(key, 3)

    x = jax.random.normal(kx, (N, Cin, H, W), dtype=jnp.float32)
    # Deterministic weight init, stored as (kh, kw, Cin, Cout).
    w1 = jax.random.normal(k1, (3, 3, Cin, Cemb), dtype=jnp.float32) * 0.05
    w2 = jax.random.normal(k2, (3, 3, Cemb, Cemb), dtype=jnp.float32) * 0.05

    y = jax.block_until_ready(cm_forward(x, w1, w2))
    assert y.shape == (N, Cemb, H, W), y.shape

    # Cross-check against the XLA conv reference.
    x_nhwc = jnp.transpose(x, (0, 2, 3, 1))
    y_ref = _conv_relu_ref(_conv_relu_ref(x_nhwc, w1), w2)
    y_ref = jnp.transpose(y_ref, (0, 3, 1, 2))
    assert jnp.allclose(y, y_ref, atol=1e-3, rtol=1e-3), (
        float(jnp.max(jnp.abs(y - y_ref))))

    print("KERNEL_OK")
</pallas_src>

<mosaic_0001>
module attributes {stable_mosaic.version = 11 : i64} {
  func.func @_cm_fused_kernel(%arg0: i32, %arg1: i32, %arg2: memref<1x16x16x32xf32, #tpu.memory_space<vmem>>, %arg3: memref<288x128xf32, #tpu.memory_space<vmem>>, %arg4: memref<1152x128xf32, #tpu.memory_space<vmem>>, %arg5: memref<1x8x16x128xf32, #tpu.memory_space<vmem>>, %arg6: memref<20x18x32xf32, #tpu.memory_space<vmem>>, %arg7: memref<10x18x128xf32, #tpu.memory_space<vmem>>) attributes {dimension_semantics = [#tpu.dimension_semantics<parallel>, #tpu.dimension_semantics<arbitrary>], iteration_bounds = array<i64: 2, 2>, scalar_prefetch = 0 : i64, scratch_operands = 2 : i64, tpu.core_type = #tpu.core_type<tc>, window_params = [{transform_indices = @transform_0, window_bounds = array<i64: 1, 16, 16, 32>}, {pipeline_mode = #tpu.pipeline_mode<synchronous>, transform_indices = @transform_1, window_bounds = array<i64: 288, 128>}, {pipeline_mode = #tpu.pipeline_mode<synchronous>, transform_indices = @transform_2, window_bounds = array<i64: 1152, 128>}, {transform_indices = @transform_3, window_bounds = array<i64: 1, 8, 16, 128>}]} {
    %c0_i32 = arith.constant 0 : i32
    %0 = arith.cmpi eq, %arg1, %c0_i32 : i32
    %1 = arith.extui %0 : i1 to i32
    %c0_i32_0 = arith.constant 0 : i32
    %2 = arith.cmpi ne, %1, %c0_i32_0 : i32
    scf.if %2 {
      %cst_21 = arith.constant 0.000000e+00 : f32
      %58 = vector.broadcast %cst_21 : f32 to vector<20x18x32xf32>
      %c0_22 = arith.constant 0 : index
      %c0_23 = arith.constant 0 : index
      %c0_24 = arith.constant 0 : index
      %59 = vector.load %arg6[%c0_22, %c0_23, %c0_24] : memref<20x18x32xf32, #tpu.memory_space<vmem>>, vector<20x18x32xf32>
      tpu.vector_store %arg6[%c0_22, %c0_23, %c0_24], %58 {strides = array<i32>} : memref<20x18x32xf32, #tpu.memory_space<vmem>>, vector<20x18x32xf32>,
      %c0_25 = arith.constant 0 : index
      %c0_26 = arith.constant 0 : index
      %c0_27 = arith.constant 0 : index
      %c0_28 = arith.constant 0 : index
      %60 = vector.load %arg2[%c0_25, %c0_26, %c0_27, %c0_28] : memref<1x16x16x32xf32, #tpu.memory_space<vmem>>, vector<1x16x16x32xf32>
      %61 = vector.shape_cast %60 : vector<1x16x16x32xf32> to vector<16x16x32xf32>
      %c2 = arith.constant 2 : index
      %c1_29 = arith.constant 1 : index
      %c0_30 = arith.constant 0 : index
      %62 = vector.load %arg6[%c2, %c1_29, %c0_30] : memref<20x18x32xf32, #tpu.memory_space<vmem>>, vector<16x16x32xf32>
      tpu.vector_store %arg6[%c2, %c1_29, %c0_30], %61 {strides = array<i32>} : memref<20x18x32xf32, #tpu.memory_space<vmem>>, vector<16x16x32xf32>,
      %cst_31 = arith.constant 0.000000e+00 : f32
      %63 = vector.broadcast %cst_31 : f32 to vector<10x18x128xf32>
      %c0_32 = arith.constant 0 : index
      %c0_33 = arith.constant 0 : index
      %c0_34 = arith.constant 0 : index
      %64 = vector.load %arg7[%c0_32, %c0_33, %c0_34] : memref<10x18x128xf32, #tpu.memory_space<vmem>>, vector<10x18x128xf32>
      tpu.vector_store %arg7[%c0_32, %c0_33, %c0_34], %63 {strides = array<i32>} : memref<10x18x128xf32, #tpu.memory_space<vmem>>, vector<10x18x128xf32>,
    } else {
    }
    %c8_i32 = arith.constant 8 : i32
    %3 = arith.muli %arg1, %c8_i32 : i32
    %4 = tpu.assume_multiple %3, 8 : i32
    %5 = arith.index_cast %4 : i32 to index
    %c0 = arith.constant 0 : index
    %c0_1 = arith.constant 0 : index
    %6 = vector.load %arg6[%5, %c0, %c0_1] : memref<20x18x32xf32, #tpu.memory_space<vmem>>, vector<12x18x32xf32>
    %7 = vector.extract_strided_slice %6 {offsets = [0, 0, 0], sizes = [10, 16, 32], strides = [1, 1, 1]} : vector<12x18x32xf32> to vector<10x16x32xf32>
    %8 = vector.extract_strided_slice %6 {offsets = [0, 1, 0], sizes = [10, 16, 32], strides = [1, 1, 1]} : vector<12x18x32xf32> to vector<10x16x32xf32>
    %9 = vector.extract_strided_slice %6 {offsets = [0, 2, 0], sizes = [10, 16, 32], strides = [1, 1, 1]} : vector<12x18x32xf32> to vector<10x16x32xf32>
    %10 = vector.extract_strided_slice %6 {offsets = [1, 0, 0], sizes = [10, 16, 32], strides = [1, 1, 1]} : vector<12x18x32xf32> to vector<10x16x32xf32>
    %11 = vector.extract_strided_slice %6 {offsets = [1, 1, 0], sizes = [10, 16, 32], strides = [1, 1, 1]} : vector<12x18x32xf32> to vector<10x16x32xf32>
    %12 = vector.extract_strided_slice %6 {offsets = [1, 2, 0], sizes = [10, 16, 32], strides = [1, 1, 1]} : vector<12x18x32xf32> to vector<10x16x32xf32>
    %13 = vector.extract_strided_slice %6 {offsets = [2, 0, 0], sizes = [10, 16, 32], strides = [1, 1, 1]} : vector<12x18x32xf32> to vector<10x16x32xf32>
    %14 = vector.extract_strided_slice %6 {offsets = [2, 1, 0], sizes = [10, 16, 32], strides = [1, 1, 1]} : vector<12x18x32xf32> to vector<10x16x32xf32>
    %15 = vector.extract_strided_slice %6 {offsets = [2, 2, 0], sizes = [10, 16, 32], strides = [1, 1, 1]} : vector<12x18x32xf32> to vector<10x16x32xf32>
    %16 = tpu.concatenate %7, %8, %9, %10, %11, %12, %13, %14, %15 in 2 : vector<10x16x32xf32>, vector<10x16x32xf32>, vector<10x16x32xf32>, vector<10x16x32xf32>, vector<10x16x32xf32>, vector<10x16x32xf32>, vector<10x16x32xf32>, vector<10x16x32xf32>, vector<10x16x32xf32> -> vector<10x16x288xf32>
    %17 = vector.shape_cast %16 : vector<10x16x288xf32> to vector<160x288xf32>
    %c0_2 = arith.constant 0 : index
    %c0_3 = arith.constant 0 : index
    %18 = vector.load %arg3[%c0_2, %c0_3] : memref<288x128xf32, #tpu.memory_space<vmem>>, vector<288x128xf32>
    %cst = arith.constant dense<0.000000e+00> : vector<160x128xf32>
    %19 = tpu.matmul %17, %18, %cst {dimension_numbers = #tpu.dot_dimension_numbers<[1], [0], [0], [1], [0, 0, 1, 1], [], []>} : vector<160x288xf32>, vector<288x128xf32>, vector<160x128xf32> -> vector<160x128xf32>
    %cst_4 = arith.constant 0.000000e+00 : f32
    %20 = vector.broadcast %cst_4 : f32 to vector<160x128xf32>
    %21 = arith.maximumf %19, %20 : vector<160x128xf32>
    %22 = vector.shape_cast %21 : vector<160x128xf32> to vector<10x16x128xf32>
    %23 = tpu.iota {dimensions = array<i32: 0>} : vector<10x1x1xi32>
    %c0_i32_5 = arith.constant 0 : i32
    %24 = arith.cmpi eq, %arg1, %c0_i32_5 : i32
    %c0_i32_6 = arith.constant 0 : i32
    %25 = vector.broadcast %c0_i32_6 : i32 to vector<10x1x1xi32>
    %26 = arith.cmpi eq, %23, %25 : vector<10x1x1xi32>
    %27 = vector.broadcast %24 : i1 to vector<10x1x1xi1>
    %28 = arith.andi %27, %26 : vector<10x1x1xi1>
    %c1_i32 = arith.constant 1 : i32
    %29 = arith.cmpi eq, %arg1, %c1_i32 : i32
    %c9_i32 = arith.constant 9 : i32
    %30 = vector.broadcast %c9_i32 : i32 to vector<10x1x1xi32>
    %31 = arith.cmpi eq, %23, %30 : vector<10x1x1xi32>
    %32 = vector.broadcast %29 : i1 to vector<10x1x1xi1>
    %33 = arith.andi %32, %31 : vector<10x1x1xi1>
    %34 = arith.ori %28, %33 : vector<10x1x1xi1>
    %cst_7 = arith.constant 0.000000e+00 : f32
    %35 = vector.shape_cast %34 : vector<10x1x1xi1> to vector<10x1x1xi1>
    %36 = vector.broadcast %35 : vector<10x1x1xi1> to vector<10x16x128xi1>
    %37 = vector.broadcast %cst_7 : f32 to vector<10x16x128xf32>
    %38 = arith.select %36, %37, %22 : vector<10x16x128xi1>, vector<10x16x128xf32>
    %c0_8 = arith.constant 0 : index
    %c1 = arith.constant 1 : index
    %c0_9 = arith.constant 0 : index
    %39 = vector.load %arg7[%c0_8, %c1, %c0_9] : memref<10x18x128xf32, #tpu.memory_space<vmem>>, vector<10x16x128xf32>
    tpu.vector_store %arg7[%c0_8, %c1, %c0_9], %38 {strides = array<i32>} : memref<10x18x128xf32, #tpu.memory_space<vmem>>, vector<10x16x128xf32>,
    %c0_10 = arith.constant 0 : index
    %c0_11 = arith.constant 0 : index
    %c0_12 = arith.constant 0 : index
    %40 = vector.load %arg7[%c0_10, %c0_11, %c0_12] : memref<10x18x128xf32, #tpu.memory_space<vmem>>, vector<10x18x128xf32>
    %41 = vector.extract_strided_slice %40 {offsets = [0, 0, 0], sizes = [8, 16, 128], strides = [1, 1, 1]} : vector<10x18x128xf32> to vector<8x16x128xf32>
    %42 = vector.extract_strided_slice %40 {offsets = [0, 1, 0], sizes = [8, 16, 128], strides = [1, 1, 1]} : vector<10x18x128xf32> to vector<8x16x128xf32>
    %43 = vector.extract_strided_slice %40 {offsets = [0, 2, 0], sizes = [8, 16, 128], strides = [1, 1, 1]} : vector<10x18x128xf32> to vector<8x16x128xf32>
    %44 = vector.extract_strided_slice %40 {offsets = [1, 0, 0], sizes = [8, 16, 128], strides = [1, 1, 1]} : vector<10x18x128xf32> to vector<8x16x128xf32>
    %45 = vector.extract_strided_slice %40 {offsets = [1, 1, 0], sizes = [8, 16, 128], strides = [1, 1, 1]} : vector<10x18x128xf32> to vector<8x16x128xf32>
    %46 = vector.extract_strided_slice %40 {offsets = [1, 2, 0], sizes = [8, 16, 128], strides = [1, 1, 1]} : vector<10x18x128xf32> to vector<8x16x128xf32>
    %47 = vector.extract_strided_slice %40 {offsets = [2, 0, 0], sizes = [8, 16, 128], strides = [1, 1, 1]} : vector<10x18x128xf32> to vector<8x16x128xf32>
    %48 = vector.extract_strided_slice %40 {offsets = [2, 1, 0], sizes = [8, 16, 128], strides = [1, 1, 1]} : vector<10x18x128xf32> to vector<8x16x128xf32>
    %49 = vector.extract_strided_slice %40 {offsets = [2, 2, 0], sizes = [8, 16, 128], strides = [1, 1, 1]} : vector<10x18x128xf32> to vector<8x16x128xf32>
    %50 = tpu.concatenate %41, %42, %43, %44, %45, %46, %47, %48, %49 in 2 : vector<8x16x128xf32>, vector<8x16x128xf32>, vector<8x16x128xf32>, vector<8x16x128xf32>, vector<8x16x128xf32>, vector<8x16x128xf32>, vector<8x16x128xf32>, vector<8x16x128xf32>, vector<8x16x128xf32> -> vector<8x16x1152xf32>
    %51 = vector.shape_cast %50 : vector<8x16x1152xf32> to vector<128x1152xf32>
    %c0_13 = arith.constant 0 : index
    %c0_14 = arith.constant 0 : index
    %52 = vector.load %arg4[%c0_13, %c0_14] : memref<1152x128xf32, #tpu.memory_space<vmem>>, vector<1152x128xf32>
    %cst_15 = arith.constant dense<0.000000e+00> : vector<128x128xf32>
    %53 = tpu.matmul %51, %52, %cst_15 {dimension_numbers = #tpu.dot_dimension_numbers<[1], [0], [0], [1], [0, 0, 1, 1], [], []>} : vector<128x1152xf32>, vector<1152x128xf32>, vector<128x128xf32> -> vector<128x128xf32>
    %cst_16 = arith.constant 0.000000e+00 : f32
    %54 = vector.broadcast %cst_16 : f32 to vector<128x128xf32>
    %55 = arith.maximumf %53, %54 : vector<128x128xf32>
    %56 = vector.shape_cast %55 : vector<128x128xf32> to vector<1x8x16x128xf32>
    %c0_17 = arith.constant 0 : index
    %c0_18 = arith.constant 0 : index
    %c0_19 = arith.constant 0 : index
    %c0_20 = arith.constant 0 : index
    %57 = vector.load %arg5[%c0_17, %c0_18, %c0_19, %c0_20] : memref<1x8x16x128xf32, #tpu.memory_space<vmem>>, vector<1x8x16x128xf32>
    tpu.vector_store %arg5[%c0_17, %c0_18, %c0_19, %c0_20], %56 {strides = array<i32>} : memref<1x8x16x128xf32, #tpu.memory_space<vmem>>, vector<1x8x16x128xf32>,
    return
  }
  func.func @transform_0(%arg0: i32, %arg1: i32) -> (i32, i32, i32, i32) {
    %c0_i32 = arith.constant 0 : i32
    %c0_i32_0 = arith.constant 0 : i32
    %c0_i32_1 = arith.constant 0 : i32
    %c0_i32_2 = arith.constant 0 : i32
    return %arg0, %c0_i32, %c0_i32_0, %c0_i32_1 : i32, i32, i32, i32
  }
  func.func @transform_1(%arg0: i32, %arg1: i32) -> (i32, i32) {
    %c0_i32 = arith.constant 0 : i32
    %c0_i32_0 = arith.constant 0 : i32
    %c0_i32_1 = arith.constant 0 : i32
    return %c0_i32, %c0_i32_0 : i32, i32
  }
  func.func @transform_2(%arg0: i32, %arg1: i32) -> (i32, i32) {
    %c0_i32 = arith.constant 0 : i32
    %c0_i32_0 = arith.constant 0 : i32
    %c0_i32_1 = arith.constant 0 : i32
    return %c0_i32, %c0_i32_0 : i32, i32
  }
  func.func @transform_3(%arg0: i32, %arg1: i32) -> (i32, i32, i32, i32) {
    %c0_i32 = arith.constant 0 : i32
    %c0_i32_0 = arith.constant 0 : i32
    %c0_i32_1 = arith.constant 0 : i32
    return %arg0, %arg1, %c0_i32, %c0_i32_0 : i32, i32, i32, i32
  }
}

</mosaic_0001>

<bundles_post_ra>
// kernel: tpu_custom_call.1
= control target key start
LH: loop header
LB: loop body
LE: loop exit
PB: predicated region body
PF: predicated region fallthrough
CT: control target
= control target key end

     0   :  { %s5179_s0 = inlined_call_operand.hbm [shape: f32[2,16,16,32], index: 0, kind: input, shape index: {}]   ;;  %s5180_s1 = inlined_call_operand.hbm [shape: f32[288,128], index: 1, kind: input, shape index: {}]   ;;  %s5181_s2 = inlined_call_operand.hbm [shape: f32[1152,128], index: 2, kind: input, shape index: {}]   ;;  %s5182_s3 = inlined_call_operand.hbm [shape: f32[2,16,16,128], index: 3, kind: output, shape index: {}]  }
   0x1   :  { %5220 = sst [smem:[#allocation55_spill]] %s5180_s1 }
   0x2   :  { %5221 = sst [smem:[#allocation56_spill]] %s5181_s2 }
   0x3   :  { %8 = vsyncpa [#allocation5], 0 }
   0x4   :  { %10 = vsyncpa [#allocation5 + $0x1], 0 }
   0x5   :  { %11 = vsyncpa [#allocation8], 0 }
   0x6   :  { %12 = vsyncpa [#allocation6], 0 }
   0x7   :  { %14 = vsyncpa [#allocation6 + $0x1], 0  ;;  %s3328_s12 = smov 0   ;;  %s3330_s13 = smov 0  }
   0x8   :  { %s3332_s14 = smov 0   ;;  %s3334_s15 = smov 0  }
   0x9   :  { %s3336_s16 = smov 0   ;;  %s3338_s17 = smov 0  }
   0xa   :  { %s3340_s18 = smov 0   ;;  %s3342_s19 = smov 0  }
   0xb   :  { %s3344_s20 = smov 0   ;;  %s3346_s21 = smov 0  }
   0xc   :  { %s3348_s22 = smov 0  }
   0xd LB: > { %5222 = sst [smem:[#allocation14_spill]] %s3256_s12  ;;  %s2566_s23 = sadd.s32 4294967295, %s3296_s22   ;;  %s3296_s22 = sphi %s3348_s22, %s20_s22   ;;  %s3292_s21 = sphi %s3346_s21, %s5376_s21   ;;  %s3288_s20 = sphi %s3344_s20, %s5367_s20   ;;  %s3284_s19 = sphi %s3342_s19, %s5375_s19   ;;  %s3280_s18 = sphi %s3340_s18, %s5366_s18   ;;  %s3276_s17 = sphi %s3338_s17, %s5374_s17   ;;  %s3272_s16 = sphi %s3336_s16, %s5373_s16   ;;  %s3268_s15 = sphi %s3334_s15, %s5372_s15   ;;  %s3264_s14 = sphi %s3332_s14, %s5371_s14   ;;  %s3260_s13 = sphi %s3330_s13, %s5370_s13   ;;  %s3256_s12 = sphi %s3328_s12, %s5369_s12  }
   0xe   : > { %5223 = sst [smem:[#allocation15_spill]] %s3288_s20  ;;  %s2567_s24 = sadd.s32 4294967294, %s3296_s22  }
   0xf   : > { %p52_p0 = scmp.ne.s32.totalorder %s3272_s16, %s3268_s15  ;;  %p3384_p1 = scmp.eq.s32.totalorder %s2566_s23, 0 }
  0x10   : > { %p119_p2 = scmp.ne.s32.totalorder %s3264_s14, %s3260_s13  ;;  %p120_p3 = scmp.eq.s32.totalorder %s2566_s23, 3 }
  0x11   : > { %p3392_p4 = por %p3384_p1, %p52_p0  ;;  %p125_p5 = scmp.ne.s32.totalorder %s3260_s13, %s3256_s12 }
  0x12   : > { %p3398_p6 = por %p120_p3, %p119_p2  ;;  %p126_p7 = scmp.eq.s32.totalorder %s2567_s24, 3 }
  0x13   : > { %p2568_p8 = scmp.ge.s32.totalorder %s3296_s22, 1  ;;  %p133_p9 = scmp.lt.s32.totalorder %s3296_s22, 5 }
  0x14   : > { %s5226_s27 = scalar_select %p3398_p6, 1, 0 }
  0x15   : > { %p3404_p10 = por %p126_p7, %p125_p5  ;;  %p3408_p11 = pnand %p2568_p8, %p133_p9 }
  0x16   : > { %5227 = sst [smem:[#allocation16_spill]] %s5226_s27  ;;  %s3298_s6 = smov [#allocation7]  }
  0x17   : > { %s5228_s28 = scalar_select %p3404_p10, 1, 0 }
  0x18   : > { %s5231_s1 = sld [smem:[#allocation55_spill]]  ;;  %p2656_p12 = pneg %p3408_p11 }
  0x19   : > { %5229 = sst [smem:[#allocation17_spill]] %s5228_s28  ;;  %s146_s7 = sshll.u32 %s3298_s6, 4  ;;  %s147_s7 = int_to_ptr.vmem [resolvable:$true] %s146_s7 }
  0x1a   : > { %p2657_p13 = pnand %p2656_p12, %p3384_p1  ;;  %s5232_s2 = sld [smem:[#allocation56_spill]] }
  0x1b   : > { %s5183_s11 = smov 128   ;;  %s5184_s15 = smov 8  }
  0x1c   : > { %s3301_s23 = smov [#allocation9]   ;;  %s29_s30 = sadd.s32 1, %s3288_s20 }
  0x1d   : > { %s160_s24 = sshll.u32 %s3301_s23, 4  ;;  %p30_p0 = scmp.ge.s32.totalorder %s29_s30, 2  ;;  %s161_s24 = int_to_ptr.vmem [resolvable:$true] %s160_s24 }
  0x1e   : > { %s144_s5 = sshll.u32 %s5231_s1, 4  ;;  %s32_s4 = sadd.s32 1, %s3292_s21  ;;  %s145_s5 = int_to_ptr.hbm [resolvable:$true] %s144_s5 }
  0x1f   : > { %2659 = dma.hbm_to_vmem [thread:$0]  (!%p2657_p13), %s145_s5, 4608, %s147_s7, [#allocation8], %s5183_s11, %s5183_s11, %s5184_s15  }
  0x20   : > { %s158_s10 = sshll.u32 %s5232_s2, 4  ;;  %p46_p2 = scmp.ne.s32.totalorder %s3276_s17, %s3272_s16  ;;  %s159_s10 = int_to_ptr.hbm [resolvable:$true] %s158_s10 }
  0x21   : > { %2662 = dma.hbm_to_vmem [thread:$0]  (!%p2657_p13), %s159_s10, 18432, %s161_s24, [#allocation8], %s5183_s11, %s5183_s11, %s5184_s15  }
  0x22   : > { %s5378_s30 = smov (%p30_p0, %s29_s30), 0  ;;  %s5380_s4 = smov (!%p30_p0, %s32_s4), %s3292_s21 }
  0x23   : > { %5233 = sst [smem:[#allocation18_spill]] %s5378_s30  ;;  %s39_s5 = sadd.s32 1, %s3276_s17 }
  0x24   : > { %p47_p3 = scmp.eq.s32.totalorder %s3296_s22, 0  ;;  %p34_p5 = scmp.ge.s32.totalorder %s5380_s4, 2 }
  0x25   : > { %s105_s6 = ssub.s32 %s3288_s20, %s5378_s30  ;;  %s109_s8 = sadd.s32 1, %s3264_s14 }
  0x26   : > { %p3439_p7 = por %p47_p3, %p46_p2  ;;  %s5382_s4 = smov (%p34_p5, %s5380_s4), 0 }
  0x27   : > { %5235 = sst [smem:[#allocation19_spill]] %s5382_s4  ;;  %p2673_p8 = scmp.lt.s32.totalorder %s3296_s22, 4 }
  0x28   : > { %s174_s9 = sand.u32 1, %s3276_s17   ;;  %s36_s10 = ssub.s32 %s3292_s21, %s5382_s4 }
  0x29   : > { %s2610_s23 = sshll.u32 %s3292_s21, 8  ;;  %p37_p9 = scmp.eq.s32.totalorder %s36_s10, 0 }
  0x2a   : > { %s106_s24 = sor.u32 %s105_s6, %s36_s10  ;;  %s2572_s11 = sshll.u32 %s174_s9, 8 }
  0x2b   : > { %p107_p12 = scmp.eq.s32.totalorder %s106_s24, 0  ;;  %s183_s20 = scalar_lea.hbm %s5179_s0, %s2610_s23 }
  0x2c   : > { %s3452_s15 = scalar_select %p37_p9, %s3276_s17, %s39_s5  }
  0x2d   : > { %s3455_s1 = scalar_select %p107_p12, %s3264_s14, %s109_s8  }
  0x2e   : > { %s184_s28 = sshll.u32 %s183_s20, 4  ;;  %s178_s12 = scalar_lea.vmem [#allocation4], %s2572_s11  ;;  %s185_s28 = int_to_ptr.hbm [resolvable:$true] %s184_s28 }
  0x2f   : > { %s186_s27 = sshll.u32 %s178_s12, 4  ;;  %p2664_p13 = pnand %p2673_p8, %p3439_p7  ;;  %s187_s27 = int_to_ptr.vmem [resolvable:$true] %s186_s27 }
  0x30   : > { %s175_s4 = scalar_lea.sflag [#allocation5], %s174_s9  ;;  %s5236_s6 = smov 8  }
  0x31   : > { %s5237_s10 = smov 128   ;;  %198 = sbr.rel (%p3408_p11) target bundleno = 998 (0x3e6), region = 32 }
  0x32   : > { %2666 = dma.hbm_to_vmem [thread:$0]  (!%p2664_p13), %s185_s28, 4096, %s187_s27, %s175_s4, %s5237_s10, %s5237_s10, %s5236_s6  }
  0x36   : > { %s200_s2 = sand.u32 1, %s3272_s16  }
  0x37   : > { %s2576_s30 = sshll.u32 %s200_s2, 8  ;;  %s201_s20 = scalar_lea.sflag [#allocation5], %s200_s2 }
  0x38   : > { %s3470_s11 = scalar_lea.vmem [#allocation4], %s2576_s30 }
  0x39   : > { %3243 = dma.done.wait (%p3392_p4), %s201_s20, 4096  }
  0x3a   : > { %3245 = vsyncadd (%p3392_p4), %s201_s20, 4294963200 }
  0x3b   : > { %3247 = dma.done.wait (%p3384_p1), [#allocation8], 23040  }
  0x3c   : > { %3249 = vsyncadd (%p3384_p1), [#allocation8], 4294944256  ;;  %s235_s12 = sand.u32 1, %s3260_s13   ;;  %p239_p11 = scmp.eq.s32.totalorder %s3280_s18, 0 }
  0x3d   : > { %s2579_s27 = sshll.u32 %s235_s12, 7  ;;  %p2580_p0 = scmp.ne.s32.totalorder %s3280_s18, 0 }
  0x3e   : > { %s3484_s28 = scalar_lea.vmem [#allocation10], %s2579_s27 }
  0x3f   : > { %242 = sbr.rel (%p2580_p0) target bundleno = 191 (0xbf), region = 48 }
  0x44   : > { %vm243_vm0 = vcmask 261120   ;;  %v3302_v0 = vmov 0.0   ;;  %vm246_vm1 = vcmask 254976   ;;  %v305_v1 = vld [vmem:[%s3470_s11] sm:$0xff]  ;;  %v306_v2 = vld [vmem:[%s3470_s11 + $0x8] sm:$0xff]  ;;  %v307_v3 = vld [vmem:[%s3470_s11 + $0x10] sm:$0xff] }
  0x45   : > { %251 = vst.msk [vmem:[#allocation2 + $0x30] sm:$0xff] %vm243_vm0, %v3302_v0  ;;  %v308_v4 = vld [vmem:[%s3470_s11 + $0x18] sm:$0xff]  ;;  %v309_v5 = vld [vmem:[%s3470_s11 + $0x20] sm:$0xff]  ;;  %v310_v6 = vld [vmem:[%s3470_s11 + $0x28] sm:$0xff] }
  0x46   : > { %244 = vst.msk [vmem:[#allocation2] sm:$0xff] %vm243_vm0, %v3302_v0  ;;  %v311_v7 = vld [vmem:[%s3470_s11 + $0x30] sm:$0xff]  ;;  %v312_v8 = vld [vmem:[%s3470_s11 + $0x38] sm:$0xff]  ;;  %v313_v9 = vld [vmem:[%s3470_s11 + $0x40] sm:$0xff] }
  0x47   : > { %245 = vst.msk [vmem:[#allocation2 + $0x8] sm:$0xff] %vm243_vm0, %v3302_v0  ;;  %v314_v10 = vld [vmem:[%s3470_s11 + $0x48] sm:$0xff]  ;;  %v315_v11 = vld [vmem:[%s3470_s11 + $0x50] sm:$0xff]  ;;  %v316_v12 = vld [vmem:[%s3470_s11 + $0x58] sm:$0xff] }
  0x48   : > { %248 = vst.msk [vmem:[#allocation2 + $0x18] sm:$0xff] %vm243_vm0, %v3302_v0  ;;  %v317_v13 = vld [vmem:[%s3470_s11 + $0x60] sm:$0xff]  ;;  %v318_v14 = vld [vmem:[%s3470_s11 + $0x68] sm:$0xff]  ;;  %v319_v15 = vld [vmem:[%s3470_s11 + $0x70] sm:$0xff] }
  0x49   : > { %249 = vst.msk [vmem:[#allocation2 + $0x20] sm:$0xff] %vm243_vm0, %v3302_v0  ;;  %v320_v16 = vld [vmem:[%s3470_s11 + $0x78] sm:$0xff]  ;;  %v321_v17 = vld [vmem:[%s3470_s11 + $0x80] sm:$0xff]  ;;  %v322_v18 = vld [vmem:[%s3470_s11 + $0x88] sm:$0xff] }
  0x4a   : > { %252 = vst.msk [vmem:[#allocation2 + $0x38] sm:$0xff] %vm243_vm0, %v3302_v0  ;;  %v323_v19 = vld [vmem:[%s3470_s11 + $0x90] sm:$0xff]  ;;  %v324_v20 = vld [vmem:[%s3470_s11 + $0x98] sm:$0xff]  ;;  %v325_v21 = vld [vmem:[%s3470_s11 + $0xa0] sm:$0xff] }
  0x4b   : > { %254 = vst.msk [vmem:[#allocation2 + $0x48] sm:$0xff] %vm243_vm0, %v3302_v0  ;;  %v326_v22 = vld [vmem:[%s3470_s11 + $0xa8] sm:$0xff]  ;;  %v327_v23 = vld [vmem:[%s3470_s11 + $0xb0] sm:$0xff]  ;;  %v328_v24 = vld [vmem:[%s3470_s11 + $0xb8] sm:$0xff] }
  0x4c   : > { %255 = vst.msk [vmem:[#allocation2 + $0x50] sm:$0xff] %vm243_vm0, %v3302_v0  ;;  %v329_v25 = vld [vmem:[%s3470_s11 + $0xc0] sm:$0xff]  ;;  %v330_v26 = vld [vmem:[%s3470_s11 + $0xc8] sm:$0xff]  ;;  %v331_v27 = vld [vmem:[%s3470_s11 + $0xd0] sm:$0xff] }
  0x4d   : > { %257 = vst.msk [vmem:[#allocation2 + $0x60] sm:$0xff] %vm243_vm0, %v3302_v0  ;;  %v332_v28 = vld [vmem:[%s3470_s11 + $0xd8] sm:$0xff]  ;;  %v333_v29 = vld [vmem:[%s3470_s11 + $0xe0] sm:$0xff]  ;;  %v334_v30 = vld [vmem:[%s3470_s11 + $0xe8] sm:$0xff] }
  0x4e   : > { %258 = vst.msk [vmem:[#allocation2 + $0x68] sm:$0xff] %vm243_vm0, %v3302_v0  ;;  %v335_v31 = vld [vmem:[%s3470_s11 + $0xf0] sm:$0xff]  ;;  %v336_v32 = vld [vmem:[%s3470_s11 + $0xf8] sm:$0xff] }
  0x4f   : > { %260 = vst.msk [vmem:[#allocation2 + $0x78] sm:$0xff] %vm243_vm0, %v3302_v0 }
  0x50   : > { %261 = vst.msk [vmem:[#allocation2 + $0x80] sm:$0xff] %vm243_vm0, %v3302_v0 }
  0x51   : > { %263 = vst.msk [vmem:[#allocation2 + $0x90] sm:$0xff] %vm243_vm0, %v3302_v0 }
  0x52   : > { %264 = vst.msk [vmem:[#allocation2 + $0x98] sm:$0xff] %vm243_vm0, %v3302_v0 }
  0x53   : > { %266 = vst.msk [vmem:[#allocation2 + $0xa8] sm:$0xff] %vm243_vm0, %v3302_v0 }
  0x54   : > { %267 = vst.msk [vmem:[#allocation2 + $0xb0] sm:$0xff] %vm243_vm0, %v3302_v0 }
  0x55   : > { %269 = vst.msk [vmem:[#allocation2 + $0xc0] sm:$0xff] %vm243_vm0, %v3302_v0 }
  0x56   : > { %270 = vst.msk [vmem:[#allocation2 + $0xc8] sm:$0xff] %vm243_vm0, %v3302_v0 }
  0x57   : > { %272 = vst.msk [vmem:[#allocation2 + $0xd8] sm:$0xff] %vm243_vm0, %v3302_v0 }
  0x58   : > { %273 = vst.msk [vmem:[#allocation2 + $0xe0] sm:$0xff] %vm243_vm0, %v3302_v0 }
  0x59   : > { %275 = vst.msk [vmem:[#allocation2 + $0xf0] sm:$0xff] %vm243_vm0, %v3302_v0 }
  0x5a   : > { %276 = vst.msk [vmem:[#allocation2 + $0xf8] sm:$0xff] %vm243_vm0, %v3302_v0 }
  0x5b   : > { %278 = vst.msk [vmem:[#allocation2 + $0x108] sm:$0xff] %vm243_vm0, %v3302_v0 }
  0x5c   : > { %279 = vst.msk [vmem:[#allocation2 + $0x110] sm:$0xff] %vm243_vm0, %v3302_v0 }
  0x5d   : > { %281 = vst.msk [vmem:[#allocation2 + $0x120] sm:$0xff] %vm243_vm0, %v3302_v0 }
  0x5e   : > { %282 = vst.msk [vmem:[#allocation2 + $0x128] sm:$0xff] %vm243_vm0, %v3302_v0 }
  0x5f   : > { %284 = vst.msk [vmem:[#allocation2 + $0x138] sm:$0xff] %vm243_vm0, %v3302_v0 }
  0x60   : > { %285 = vst.msk [vmem:[#allocation2 + $0x140] sm:$0xff] %vm243_vm0, %v3302_v0 }
  0x61   : > { %287 = vst.msk [vmem:[#allocation2 + $0x150] sm:$0xff] %vm243_vm0, %v3302_v0 }
  0x62   : > { %288 = vst.msk [vmem:[#allocation2 + $0x158] sm:$0xff] %vm243_vm0, %v3302_v0 }
  0x63   : > { %290 = vst.msk [vmem:[#allocation2 + $0x168] sm:$0xff] %vm243_vm0, %v3302_v0 }
  0x64   : > { %291 = vst.msk [vmem:[#allocation2 + $0x170] sm:$0xff] %vm243_vm0, %v3302_v0 }
  0x65   : > { %293 = vst.msk [vmem:[#allocation2 + $0x180] sm:$0xff] %vm243_vm0, %v3302_v0 }
  0x66   : > { %294 = vst.msk [vmem:[#allocation2 + $0x188] sm:$0xff] %vm243_vm0, %v3302_v0 }
  0x67   : > { %296 = vst.msk [vmem:[#allocation2 + $0x198] sm:$0xff] %vm243_vm0, %v3302_v0 }
  0x68   : > { %297 = vst.msk [vmem:[#allocation2 + $0x1a0] sm:$0xff] %vm243_vm0, %v3302_v0 }
  0x69   : > { %299 = vst.msk [vmem:[#allocation2 + $0x1b0] sm:$0xff] %vm243_vm0, %v3302_v0 }
  0x6a   : > { %300 = vst.msk [vmem:[#allocation2 + $0x1b8] sm:$0xff] %vm243_vm0, %v3302_v0 }
  0x6b   : > { %302 = vst.msk [vmem:[#allocation2 + $0x1c8] sm:$0xff] %vm243_vm0, %v3302_v0 }
  0x6c   : > { %303 = vst.msk [vmem:[#allocation2 + $0x1d0] sm:$0xff] %vm243_vm0, %v3302_v0 }
  0x6d   : > { %370 = vst [vmem:[#allocation3] sm:$0xff] %v3302_v0 }
  0x6e   : > { %371 = vst [vmem:[#allocation3 + $0x8] sm:$0xff] %v3302_v0 }
  0x6f   : > { %372 = vst [vmem:[#allocation3 + $0x10] sm:$0x3] %v3302_v0 }
  0x70   : > { %373 = vst [vmem:[#allocation3 + $0x18] sm:$0xff] %v3302_v0 }
  0x71   : > { %374 = vst [vmem:[#allocation3 + $0x20] sm:$0xff] %v3302_v0 }
  0x72   : > { %375 = vst [vmem:[#allocation3 + $0x28] sm:$0x3] %v3302_v0 }
  0x73   : > { %376 = vst [vmem:[#allocation3 + $0x30] sm:$0xff] %v3302_v0 }
  0x74   : > { %377 = vst [vmem:[#allocation3 + $0x38] sm:$0xff] %v3302_v0 }
  0x75   : > { %378 = vst [vmem:[#allocation3 + $0x40] sm:$0x3] %v3302_v0 }
  0x76   : > { %379 = vst [vmem:[#allocation3 + $0x48] sm:$0xff] %v3302_v0 }
  0x77   : > { %380 = vst [vmem:[#allocation3 + $0x50] sm:$0xff] %v3302_v0 }
  0x78   : > { %381 = vst [vmem:[#allocation3 + $0x58] sm:$0x3] %v3302_v0 }
  0x79   : > { %382 = vst [vmem:[#allocation3 + $0x60] sm:$0xff] %v3302_v0 }
  0x7a   : > { %383 = vst [vmem:[#allocation3 + $0x68] sm:$0xff] %v3302_v0 }
  0x7b   : > { %384 = vst [vmem:[#allocation3 + $0x70] sm:$0x3] %v3302_v0 }
  0x7c   : > { %385 = vst [vmem:[#allocation3 + $0x78] sm:$0xff] %v3302_v0 }
  0x7d   : > { %386 = vst [vmem:[#allocation3 + $0x80] sm:$0xff] %v3302_v0 }
  0x7e   : > { %387 = vst [vmem:[#allocation3 + $0x88] sm:$0x3] %v3302_v0 }
  0x7f   : > { %388 = vst [vmem:[#allocation3 + $0x90] sm:$0xff] %v3302_v0 }
  0x80   : > { %389 = vst [vmem:[#allocation3 + $0x98] sm:$0xff] %v3302_v0 }
  0x81   : > { %390 = vst [vmem:[#allocation3 + $0xa0] sm:$0x3] %v3302_v0 }
  0x82   : > { %391 = vst [vmem:[#allocation3 + $0xa8] sm:$0xff] %v3302_v0 }
  0x83   : > { %392 = vst [vmem:[#allocation3 + $0xb0] sm:$0xff] %v3302_v0 }
  0x84   : > { %393 = vst [vmem:[#allocation3 + $0xb8] sm:$0x3] %v3302_v0 }
  0x85   : > { %394 = vst [vmem:[#allocation3 + $0xc0] sm:$0xff] %v3302_v0 }
  0x86   : > { %395 = vst [vmem:[#allocation3 + $0xc8] sm:$0xff] %v3302_v0 }
  0x87   : > { %396 = vst [vmem:[#allocation3 + $0xd0] sm:$0x3] %v3302_v0 }
  0x88   : > { %397 = vst [vmem:[#allocation3 + $0xd8] sm:$0xff] %v3302_v0 }
  0x89   : > { %398 = vst [vmem:[#allocation3 + $0xe0] sm:$0xff] %v3302_v0 }
  0x8a   : > { %399 = vst [vmem:[#allocation3 + $0xe8] sm:$0x3] %v3302_v0 }
  0x8b   : > { %253 = vst.msk [vmem:[#allocation2 + $0x40] sm:$0x3] %vm246_vm1, %v3302_v0 }
  0x8c   : > { %247 = vst.msk [vmem:[#allocation2 + $0x10] sm:$0x3] %vm246_vm1, %v3302_v0 }
  0x8d   : > { %250 = vst.msk [vmem:[#allocation2 + $0x28] sm:$0x3] %vm246_vm1, %v3302_v0 }
  0x8e   : > { %256 = vst.msk [vmem:[#allocation2 + $0x58] sm:$0x3] %vm246_vm1, %v3302_v0 }
  0x8f   : > { %259 = vst.msk [vmem:[#allocation2 + $0x70] sm:$0x3] %vm246_vm1, %v3302_v0 }
  0x90   : > { %262 = vst.msk [vmem:[#allocation2 + $0x88] sm:$0x3] %vm246_vm1, %v3302_v0 }
  0x91   : > { %265 = vst.msk [vmem:[#allocation2 + $0xa0] sm:$0x3] %vm246_vm1, %v3302_v0 }
  0x92   : > { %268 = vst.msk [vmem:[#allocation2 + $0xb8] sm:$0x3] %vm246_vm1, %v3302_v0 }
  0x93   : > { %271 = vst.msk [vmem:[#allocation2 + $0xd0] sm:$0x3] %vm246_vm1, %v3302_v0 }
  0x94   : > { %274 = vst.msk [vmem:[#allocation2 + $0xe8] sm:$0x3] %vm246_vm1, %v3302_v0 }
  0x95   : > { %277 = vst.msk [vmem:[#allocation2 + $0x100] sm:$0x3] %vm246_vm1, %v3302_v0 }
  0x96   : > { %280 = vst.msk [vmem:[#allocation2 + $0x118] sm:$0x3] %vm246_vm1, %v3302_v0 }
  0x97   : > { %283 = vst.msk [vmem:[#allocation2 + $0x130] sm:$0x3] %vm246_vm1, %v3302_v0 }
  0x98   : > { %286 = vst.msk [vmem:[#allocation2 + $0x148] sm:$0x3] %vm246_vm1, %v3302_v0 }
  0x99   : > { %289 = vst.msk [vmem:[#allocation2 + $0x160] sm:$0x3] %vm246_vm1, %v3302_v0 }
  0x9a   : > { %292 = vst.msk [vmem:[#allocation2 + $0x178] sm:$0x3] %vm246_vm1, %v3302_v0 }
  0x9b   : > { %295 = vst.msk [vmem:[#allocation2 + $0x190] sm:$0x3] %vm246_vm1, %v3302_v0 }
  0x9c   : > { %298 = vst.msk [vmem:[#allocation2 + $0x1a8] sm:$0x3] %vm246_vm1, %v3302_v0 }
  0x9d   : > { %301 = vst.msk [vmem:[#allocation2 + $0x1c0] sm:$0x3] %vm246_vm1, %v3302_v0 }
  0x9e   : > { %304 = vst.msk [vmem:[#allocation2 + $0x1d8] sm:$0x3] %vm246_vm1, %v3302_v0 }
  0x9f   : > { %338 = vst.msk [vmem:[#allocation2 + $0x31] sm:$0xff] %vm243_vm0, %v305_v1 }
  0xa0   : > { %339 = vst.msk [vmem:[#allocation2 + $0x39] sm:$0xff] %vm243_vm0, %v306_v2 }
  0xa1   : > { %340 = vst.msk [vmem:[#allocation2 + $0x49] sm:$0xff] %vm243_vm0, %v307_v3 }
  0xa2   : > { %341 = vst.msk [vmem:[#allocation2 + $0x51] sm:$0xff] %vm243_vm0, %v308_v4 }
  0xa3   : > { %342 = vst.msk [vmem:[#allocation2 + $0x61] sm:$0xff] %vm243_vm0, %v309_v5 }
  0xa4   : > { %343 = vst.msk [vmem:[#allocation2 + $0x69] sm:$0xff] %vm243_vm0, %v310_v6 }
  0xa5   : > { %344 = vst.msk [vmem:[#allocation2 + $0x79] sm:$0xff] %vm243_vm0, %v311_v7 }
  0xa6   : > { %345 = vst.msk [vmem:[#allocation2 + $0x81] sm:$0xff] %vm243_vm0, %v312_v8 }
  0xa7   : > { %346 = vst.msk [vmem:[#allocation2 + $0x91] sm:$0xff] %vm243_vm0, %v313_v9 }
  0xa8   : > { %347 = vst.msk [vmem:[#allocation2 + $0x99] sm:$0xff] %vm243_vm0, %v314_v10 }
  0xa9   : > { %348 = vst.msk [vmem:[#allocation2 + $0xa9] sm:$0xff] %vm243_vm0, %v315_v11 }
  0xaa   : > { %349 = vst.msk [vmem:[#allocation2 + $0xb1] sm:$0xff] %vm243_vm0, %v316_v12 }
  0xab   : > { %350 = vst.msk [vmem:[#allocation2 + $0xc1] sm:$0xff] %vm243_vm0, %v317_v13 }
  0xac   : > { %351 = vst.msk [vmem:[#allocation2 + $0xc9] sm:$0xff] %vm243_vm0, %v318_v14 }
  0xad   : > { %352 = vst.msk [vmem:[#allocation2 + $0xd9] sm:$0xff] %vm243_vm0, %v319_v15 }
  0xae   : > { %353 = vst.msk [vmem:[#allocation2 + $0xe1] sm:$0xff] %vm243_vm0, %v320_v16 }
  0xaf   : > { %354 = vst.msk [vmem:[#allocation2 + $0xf1] sm:$0xff] %vm243_vm0, %v321_v17 }
  0xb0   : > { %355 = vst.msk [vmem:[#allocation2 + $0xf9] sm:$0xff] %vm243_vm0, %v322_v18 }
  0xb1   : > { %356 = vst.msk [vmem:[#allocation2 + $0x109] sm:$0xff] %vm243_vm0, %v323_v19 }
  0xb2   : > { %357 = vst.msk [vmem:[#allocation2 + $0x111] sm:$0xff] %vm243_vm0, %v324_v20 }
  0xb3   : > { %358 = vst.msk [vmem:[#allocation2 + $0x121] sm:$0xff] %vm243_vm0, %v325_v21 }
  0xb4   : > { %359 = vst.msk [vmem:[#allocation2 + $0x129] sm:$0xff] %vm243_vm0, %v326_v22 }
  0xb5   : > { %360 = vst.msk [vmem:[#allocation2 + $0x139] sm:$0xff] %vm243_vm0, %v327_v23 }
  0xb6   : > { %361 = vst.msk [vmem:[#allocation2 + $0x141] sm:$0xff] %vm243_vm0, %v328_v24 }
  0xb7   : > { %362 = vst.msk [vmem:[#allocation2 + $0x151] sm:$0xff] %vm243_vm0, %v329_v25 }
  0xb8   : > { %363 = vst.msk [vmem:[#allocation2 + $0x159] sm:$0xff] %vm243_vm0, %v330_v26 }
  0xb9   : > { %364 = vst.msk [vmem:[#allocation2 + $0x169] sm:$0xff] %vm243_vm0, %v331_v27 }
  0xba   : > { %365 = vst.msk [vmem:[#allocation2 + $0x171] sm:$0xff] %vm243_vm0, %v332_v28 }
  0xbb   : > { %366 = vst.msk [vmem:[#allocation2 + $0x181] sm:$0xff] %vm243_vm0, %v333_v29 }
  0xbc   : > { %367 = vst.msk [vmem:[#allocation2 + $0x189] sm:$0xff] %vm243_vm0, %v334_v30 }
  0xbd   : > { %368 = vst.msk [vmem:[#allocation2 + $0x199] sm:$0xff] %vm243_vm0, %v335_v31 }
  0xbe   : > { %369 = vst.msk [vmem:[#allocation2 + $0x1a1] sm:$0xff] %vm243_vm0, %v336_v32 }
  0xbf PF: > { %s2582_s25 = smul.u32 192, %s3280_s18  ;;  %vm469_vm2 = vcmask 1046528   ;;  %vm580_vm3 = vcmask 1045504   ;;  %s3303_s29 = smov 96   ;;  %vm977_vm4 = vcmask 261120   ;;  %vm998_vm5 = vcmask 523264  }
  0xc0   : > { %s3304_s4 = smov 32   ;;  %s3305_s5 = smov 64   ;;  %vm1019_vm6 = vcmask 785408  }
  0xc1   : > { %s3702_s26 = scalar_lea.vmem [#allocation2], %s2582_s25  ;;  %p1430_p1 = scmp.eq.s32.totalorder %s3280_s18, 1 }
  0xc2   : > { %s4378_s7 = scalar_select %p239_p11, 1, 0 }
  0xc3   : > { %s1431_s8 = scalar_select %p1430_p1, 1, 0 }
  0xc4   : > { %s2611_s9 = sshll.u32 %s3280_s18, 4  ;;  %s2606_s23 = sshll.u32 %s3284_s19, 5 }
  0xc5   : > { %v3705_v33 = vld [vmem:[%s3702_s26 + $0x18] sm:$0xff]  ;;  %v3708_v34 = vld [vmem:[%s3702_s26 + $0x30] sm:$0xff]  ;;  %v3716_v38 = vld [vmem:[%s3702_s26 + $0x20] sm:$0xff]  ;;  %s2452_s24 = sadd.s32 %s2611_s9, %s2606_s23  ;;  %s2455_s19 = sshll.u32 %s3484_s28, 4  ;;  %s2456_s19 = int_to_ptr.vmem [resolvable:$true] %s2455_s19 }
  0xc6   : > { %v3711_v35 = vld [vmem:[%s3702_s26 + $0x38] sm:$0xff]  ;;  %v480_v36 = vrot.slane %v3708_v34, 1  ;;  %v586_v39 = vrot.slane %v3705_v33, 2  ;;  %v3720_v40 = vld [vmem:[%s3702_s26] sm:$0xff]  ;;  %v587_v41 = vrot.slane %v3716_v38, 2  ;;  %v3724_v42 = vld [vmem:[%s3702_s26 + $0x8] sm:$0xff] }
  0xc7   : > { %v481_v37 = vrot.slane %v3711_v35, 1  ;;  %v470_v43 = vrot.slane %v3720_v40, 1  ;;  %v405_v44 = vld [vmem:[%s3702_s26 + $0x10] sm:$0x3]  ;;  %v471_v46 = vrot.slane %v3724_v42, 1  ;;  %v581_v53 = vrot.slane %v3720_v40, 2 }
  0xc8   : > { %v408_v47 = vld [vmem:[%s3702_s26 + $0x28] sm:$0x3]  ;;  %v473_v48 = vrot.slane %v405_v44, 1  ;;  %v588_v50 = vsel %vm580_vm3, %v586_v39, %v587_v41  ;;  %v582_v54 = vrot.slane %v3724_v42, 2  ;;  %v584_v58 = vrot.slane %v405_v44, 2  ;;  %v3762_v8 = vld [vmem:[%s3702_s26 + $0x50] sm:$0xff] }
  0xc9   : > { %v3729_v45 = vsel %vm469_vm2, %v480_v36, %v481_v37  ;;  %v589_v51 = vrot.slane %v408_v47, 2  ;;  %v472_v52 = vsel %vm469_vm2, %v470_v43, %v471_v46  ;;  %v411_v59 = vld [vmem:[%s3702_s26 + $0x40] sm:$0x3]  ;;  %v475_v2 = vrot.slane %v3705_v33, 1  ;;  %v3758_v7 = vld [vmem:[%s3702_s26 + $0x48] sm:$0xff]  ;;  %s2607_s6 = sshll.u32 %s2452_s24, 3 }
  0xca   : > { %v2785_v49 = vpack.i.bf16 %v3729_v45, %v3705_v33  ;;  %v2775_v55 = vpack.i.bf16 %v588_v50, %v472_v52  ;;  %v474_v56 = vsel %vm469_vm2, %v471_v46, %v473_v48  ;;  %v583_v60 = vsel %vm580_vm3, %v581_v53, %v582_v54  ;;  %v414_v19 = vld [vmem:[%s3702_s26 + $0x58] sm:$0x3]  ;;  %v3803_v29 = vld [vmem:[%s3702_s26 + $0x60] sm:$0xff]  ;;  %v3807_v30 = vld [vmem:[%s3702_s26 + $0x68] sm:$0xff]  ;;  %s2454_s30 = scalar_lea.hbm %s5182_s3, %s2607_s6  ;;  %s2440_s11 = scalar_lea.sflag [#allocation6], %s235_s12 }
  0xcb   : > { %v590_v57 = vsel %vm580_vm3, %v587_v41, %v589_v51  ;;  %v585_v61 = vsel %vm580_vm3, %v582_v54, %v584_v58  ;;  %v483_v62 = vrot.slane %v411_v59, 1  ;;  %v2780_v1 = vpack.i.bf16 %v3708_v34, %v583_v60  ;;  %v417_v46 = vld [vmem:[%s3702_s26 + $0x70] sm:$0x3]  ;;  %s2457_s20 = sshll.u32 %s2454_s30, 4  ;;  %s2458_s20 = int_to_ptr.hbm [resolvable:$true] %s2457_s20 }
  0xcc   : > { %2786 = vrot.lane.b32.xlu1 %v2785_v49, %s3303_s29  ;;  %2776 = vrot.lane.b32.xlu0 %v2775_v55, %s3304_s4  ;;  %v2790_v63 = vpack.i.bf16 %v590_v57, %v474_v56  ;;  %v2795_v0 = vpack.i.bf16 %v3711_v35, %v585_v61  ;;  %v476_v3 = vrot.slane %v3716_v38, 1  ;;  %v591_v4 = vrot.slane %v3708_v34, 2  ;;  %v3844_v55 = vld [vmem:[%s3702_s26 + $0x78] sm:$0xff]  ;;  %v3848_v56 = vld [vmem:[%s3702_s26 + $0x80] sm:$0xff]  ;;  %s3184_s27 = sshra.s32 %s2458_s20, 4  ;;  %s3185_s27 = int_to_ptr.hbm [resolvable:$true] %s3184_s27 }
  0xcd   : > { %v592_v5 = vrot.slane %v3711_v35, 2  ;;  %v3754_v6 = vsel %vm469_vm2, %v481_v37, %v483_v62  ;;  %v485_v12 = vrot.slane %v3758_v7, 1  ;;  %v486_v13 = vrot.slane %v3762_v8, 1  ;;  %5238 = vst [vmem:[#allocation20_spill] sm:$0xff] %v3848_v56  ;;  %s3186_s25 = scalar_lea.hbm %s3185_s27, 128  ;;  %p3191_p5 = scmp.lt.s32.totalorder %s3185_s27, %s5182_s3 }
  0xce   : > { %2796 = vrot.lane.b32.xlu2 %v2795_v0, %s3305_s5  ;;  %v2800_v9 = vpack.i.bf16 %v3754_v6, %v3716_v38  ;;  %v3767_v10 = vsel %vm469_vm2, %v475_v2, %v476_v3  ;;  %v2810_v14 = vpack.i.bf16 %v3758_v7, %v588_v50  ;;  %v478_v16 = vrot.slane %v408_v47, 1  ;;  %p3187_p4 = scmp.ne.s32.totalorder %s3185_s27, %s3186_s25 }
  0xcf   : > { %v3770_v11 = vsel %vm580_vm3, %v591_v4, %v592_v5  ;;  %v594_v17 = vrot.slane %v411_v59, 2  ;;  %v3779_v18 = vsel %vm469_vm2, %v485_v12, %v486_v13  ;;  %v488_v23 = vrot.slane %v414_v19, 1 }
  0xd0   : > { %v2805_v15 = vpack.i.bf16 %v3770_v11, %v3767_v10  ;;  %v2815_v20 = vpack.i.bf16 %v3779_v18, %v3708_v34  ;;  %v3787_v21 = vsel %vm469_vm2, %v476_v3, %v478_v16  ;;  %v2825_v24 = vpack.i.bf16 %v3762_v8, %v590_v57  ;;  %v3889_v16 = vld [vmem:[%s3702_s26 + $0x98] sm:$0xff]  ;;  %p3188_p2 = pnand %p3187_p4, %p3398_p6 }
  0xd1   : > { %v3790_v22 = vsel %vm580_vm3, %v592_v5, %v594_v17  ;;  %v596_v26 = vrot.slane %v3758_v7, 2  ;;  %v597_v27 = vrot.slane %v3762_v8, 2  ;;  %v3799_v28 = vsel %vm469_vm2, %v486_v13, %v488_v23  ;;  %5240 = vst [vmem:[#allocation22_spill] sm:$0xff] %v3889_v16 }
  0xd2   : > { %v2820_v25 = vpack.i.bf16 %v3790_v22, %v3787_v21  ;;  %v2830_v31 = vpack.i.bf16 %v3799_v28, %v3711_v35  ;;  %v490_v36 = vrot.slane %v3803_v29, 1  ;;  %v491_v37 = vrot.slane %v3807_v30, 1  ;;  %p3189_p3 = pneg %p3188_p2 }
  0xd3   : > { %v3812_v32 = vsel %vm580_vm3, %v596_v26, %v597_v27  ;;  %v2840_v39 = vpack.i.bf16 %v3803_v29, %v3770_v11  ;;  %v599_v43 = vrot.slane %v414_v19, 2  ;;  %v493_v49 = vrot.slane %v417_v46, 1  ;;  %v1115_v19 = vld [vmem:[#allocation7 + $0x78] sm:$0xff]  ;;  %v1114_v26 = vld [vmem:[#allocation7 + $0x70] sm:$0xff] }
  0xd4   : > { %2791 = vrot.lane.b32.xlu1 %v2790_v63, %s3304_s4  ;;  %2781 = vrot.lane.b32.xlu0 %v2780_v1, %s3305_s5  ;;  %v2835_v41 = vpack.i.bf16 %v3812_v32, %v3729_v45  ;;  %v3822_v44 = vsel %vm469_vm2, %v490_v36, %v491_v37  ;;  %v2855_v50 = vpack.i.bf16 %v3807_v30, %v3790_v22  ;;  %v601_v52 = vrot.slane %v3803_v29, 2  ;;  %v420_v1 = vld [vmem:[%s3702_s26 + $0x88] sm:$0x3]  ;;  %v1113_v36 = vld [vmem:[#allocation7 + $0x68] sm:$0xff] }
  0xd5   : > { %v2845_v47 = vpack.i.bf16 %v3822_v44, %v3758_v7  ;;  %v3830_v48 = vsel %vm580_vm3, %v597_v27, %v599_v43  ;;  %v602_v53 = vrot.slane %v3807_v30, 2  ;;  %v3840_v54 = vsel %vm469_vm2, %v491_v37, %v493_v49  ;;  %1176 = vmatpush.msra.mxu0 %v1115_v19  ;;  %v1130_v27 = vld [vmem:[#allocation7 + $0xf0] sm:$0xff]  ;;  %v1129_v37 = vld [vmem:[#allocation7 + $0xe8] sm:$0xff]  ;;  %v1128_v43 = vld [vmem:[#allocation7 + $0xe0] sm:$0xff] }
  0xd6   : > { %2801 = vrot.lane.b32.xlu2 %v2800_v9, %s3303_s29  ;;  %v2850_v51 = vpack.i.bf16 %v3830_v48, %v3754_v6  ;;  %v2860_v57 = vpack.i.bf16 %v3840_v54, %v3762_v8  ;;  %v495_v59 = vrot.slane %v3844_v55, 1  ;;  %v496_v60 = vrot.slane %v3848_v56, 1  ;;  %v423_v49 = vld [vmem:[%s3702_s26 + $0xa0] sm:$0x3] }
  0xd7   : > { %v3853_v58 = vsel %vm580_vm3, %v601_v52, %v602_v53  ;;  %v2870_v61 = vpack.i.bf16 %v3844_v55, %v3812_v32  ;;  %v604_v63 = vrot.slane %v417_v46, 2  ;;  %v498_v4 = vrot.slane %v420_v1, 1  ;;  %1177 = vmatpush.msra.mxu0 %v1114_v26  ;;  %v1127_v52 = vld [vmem:[#allocation7 + $0xd8] sm:$0xff] }
  0xd8   : > { %v2865_v62 = vpack.i.bf16 %v3853_v58, %v3779_v18  ;;  %v3863_v0 = vsel %vm469_vm2, %v495_v59, %v496_v60  ;;  %v2885_v5 = vpack.i.bf16 %v3848_v56, %v3830_v48  ;;  %v606_v12 = vrot.slane %v3844_v55, 2  ;;  %v1110_v59 = vld [vmem:[#allocation7 + $0x50] sm:$0xff]  ;;  %v1135_v26 = vld [vmem:[#allocation7 + $0x118] sm:$0xff] }
  0xd9   : > { %v2875_v2 = vpack.i.bf16 %v3863_v0, %v3803_v29  ;;  %v3871_v3 = vsel %vm580_vm3, %v602_v53, %v604_v63  ;;  %v607_v13 = vrot.slane %v3848_v56, 2  ;;  %v609_v46 = vrot.slane %v420_v1, 2  ;;  %1178 = vmatpush.msra.mxu0 %v1113_v36  ;;  %v1125_v63 = vld [vmem:[#allocation7 + $0xc8] sm:$0xff]  ;;  %v1106_v36 = vld [vmem:[#allocation7 + $0x30] sm:$0xff]  ;;  %1342 = vmatpush.msra.mxu2 %v1135_v26 }
  0xda   : > { %v2880_v9 = vpack.i.bf16 %v3871_v3, %v3799_v28  ;;  %v3967_v26 = vld [vmem:[%s3702_s26 + $0xc0] sm:$0xff] }
  0xdb   : > { %v3894_v23 = vsel %vm580_vm3, %v606_v12, %v607_v13  ;;  %v3912_v53 = vsel %vm580_vm3, %v607_v13, %v609_v46  ;;  %v3926_v13 = vld [vmem:[%s3702_s26 + $0xa8] sm:$0xff]  ;;  %v614_v46 = vrot.slane %v423_v49, 2 }
  0xdc   : > { %2811 = vrot.lane.b32.xlu1 %v2810_v14, %s3305_s5  ;;  %2806 = vrot.lane.b32.xlu0 %v2805_v15, %s3304_s4  ;;  %v3881_v14 = vsel %vm469_vm2, %v496_v60, %v498_v4  ;;  %v3885_v15 = vld [vmem:[%s3702_s26 + $0x90] sm:$0xff]  ;;  %v1126_v60 = vld [vmem:[#allocation7 + $0xd0] sm:$0xff]  ;;  %v2910_v1 = vpack.i.bf16 %v3912_v53, %v3840_v54  ;;  %5242 = vst [vmem:[#allocation24_spill] sm:$0xff] %v3926_v13 }
  0xdd   : > { %5239 = vst [vmem:[#allocation21_spill] sm:$0xff] %v3885_v15  ;;  %v2890_v17 = vpack.i.bf16 %v3881_v14, %v3807_v30  ;;  %v1124_v4 = vld [vmem:[#allocation7 + $0xc0] sm:$0xff] }
  0xde   : > { %2816 = vrot.lane.b32.xlu2 %v2815_v20, %s3303_s29  ;;  %v1131_v20 = vld [vmem:[#allocation7 + $0xf8] sm:$0xff] }
  0xdf   : > { %1253 = vmatpush.msra.mxu1 %v1131_v20  ;;  %v1107_v20 = vld [vmem:[#allocation7 + $0x38] sm:$0xff] }
  0xe1   : > { %1254 = vmatpush.msra.mxu1 %v1130_v27  ;;  %v505_v27 = vrot.slane %v3926_v13, 1 }
  0xe3   : > { %1255 = vmatpush.msra.mxu1 %v1129_v37  ;;  %v1122_v37 = vld [vmem:[#allocation7 + $0xb0] sm:$0xff] }
  0xe4   : > { %2826 = vrot.lane.b32.xlu1 %v2825_v24, %s3305_s5  ;;  %2821 = vrot.lane.b32.xlu0 %v2820_v25, %s3304_s4  ;;  %v500_v24 = vrot.slane %v3885_v15, 1  ;;  %v501_v25 = vrot.slane %v3889_v16, 1 }
  0xe5   : > { %1256 = vmatpush.msra.mxu1 %v1128_v43 }
  0xe6   : > { %2831 = vrot.lane.b32.xlu2 %v2830_v31, %s3303_s29  ;;  %v2900_v31 = vpack.i.bf16 %v3885_v15, %v3853_v58 }
  0xe7   : > { %1257 = vmatpush.msra.mxu1 %v1127_v52 }
  0xe9   : > { %1258 = vmatpush.msra.mxu1 %v1126_v60  ;;  %v1105_v60 = vld [vmem:[#allocation7 + $0x28] sm:$0xff] }
  0xeb   : > { %1259 = vmatpush.msra.mxu1 %v1125_v63 }
  0xec   : > { %2841 = vrot.lane.b32.xlu1 %v2840_v39, %s3305_s5  ;;  %2836 = vrot.lane.b32.xlu0 %v2835_v41, %s3304_s4  ;;  %v2895_v39 = vpack.i.bf16 %v3894_v23, %v3822_v44  ;;  %v1112_v41 = vld [vmem:[#allocation7 + $0x60] sm:$0xff] }
  0xed   : > { %1179 = vmatpush.msra.mxu0 %v1112_v41  ;;  %1260 = vmatpush.msra.mxu1 %v1124_v4  ;;  %v1134_v41 = vld [vmem:[#allocation7 + $0x110] sm:$0xff]  ;;  %v1132_v4 = vld [vmem:[#allocation7 + $0x100] sm:$0xff] }
  0xee   : > { %2846 = vrot.lane.b32.xlu2 %v2845_v47, %s3303_s29  ;;  %v3904_v47 = vsel %vm469_vm2, %v500_v24, %v501_v25  ;;  %v1123_v24 = vld [vmem:[#allocation7 + $0xb8] sm:$0xff]  ;;  %1343 = vmatpush.msra.mxu2 %v1134_v41 }
  0xef   : > { %1261 = vmatpush.msra.mxu1 %v1123_v24  ;;  %v1119_v24 = vld [vmem:[#allocation7 + $0x98] sm:$0xff] }
  0xf0   : > { %v3980_v41 = vld [vmem:[%s3702_s26 + $0xc8] sm:$0xff] }
  0xf1   : > { %1262 = vmatpush.msra.mxu1 %v1122_v37 }
  0xf4   : > { %2856 = vrot.lane.b32.xlu1 %v2855_v50, %s3305_s5  ;;  %2851 = vrot.lane.b32.xlu0 %v2850_v51, %s3304_s4  ;;  %v2905_v50 = vpack.i.bf16 %v3904_v47, %v3844_v55  ;;  %v1111_v51 = vld [vmem:[#allocation7 + $0x58] sm:$0xff] }
  0xf5   : > { %1180 = vmatpush.msra.mxu0 %v1111_v51 }
  0xf6   : > { %2861 = vrot.lane.b32.xlu2 %v2860_v57, %s3303_s29  ;;  %v503_v57 = vrot.slane %v423_v49, 1  ;;  %v1133_v49 = vld [vmem:[#allocation7 + $0x108] sm:$0xff] }
  0xf7   : > { %1181 = vmatpush.msra.mxu0 %v1110_v59  ;;  %v426_v59 = vld [vmem:[%s3702_s26 + $0xb8] sm:$0x3]  ;;  %1344 = vmatpush.msra.mxu2 %v1133_v49 }
  0xf8   : > { %v3922_v12 = vsel %vm469_vm2, %v501_v25, %v503_v57  ;;  %v619_v49 = vrot.slane %v426_v59, 2 }
  0xf9   : > { %5241 = vst [vmem:[#allocation23_spill] sm:$0xff] %v3922_v12  ;;  %v2920_v19 = vpack.i.bf16 %v3922_v12, %v3848_v56  ;;  %1345 = vmatpush.msra.mxu2 %v1132_v4  ;;  %v429_v4 = vld [vmem:[%s3702_s26 + $0xd0] sm:$0x3] }
  0xfa   : > { %2583 = vmatmul.msk.f32.vlgmr.msra.gmra.mxu2 %vm977_vm4, %v3770_v11 }
  0xfc   : > { %2871 = vrot.lane.b32.xlu1 %v2870_v61, %s3305_s5  ;;  %2866 = vrot.lane.b32.xlu0 %v2865_v62, %s3304_s4  ;;  %v2915_v61 = vpack.i.bf16 %v3889_v16, %v3871_v3  ;;  %v1109_v62 = vld [vmem:[#allocation7 + $0x48] sm:$0xff] }
  0xfd   : > { %1182 = vmatpush.msra.mxu0 %v1109_v62  ;;  %v508_v62 = vrot.slane %v426_v59, 1 }
  0xfe   : > { %2876 = vrot.lane.b32.xlu2 %v2875_v2, %s3303_s29  ;;  %v1108_v2 = vld [vmem:[#allocation7 + $0x40] sm:$0xff] }
  0xff   : > { %1183 = vmatpush.msra.mxu0 %v1108_v2  ;;  %v1120_v2 = vld [vmem:[#allocation7 + $0xa0] sm:$0xff] }
 0x101   : > { %1184 = vmatpush.msra.mxu0 %v1107_v20  ;;  %v1103_v20 = vld [vmem:[#allocation7 + $0x18] sm:$0xff] }
 0x102   : > { %2584 = vmatmul.msk.f32.gmra.mxu2 %vm977_vm4, %v3790_v22  ;;  %v622_v22 = vrot.slane %v3980_v41, 2 }
 0x103   : > { %1185 = vmatpush.msra.mxu0 %v1106_v36  ;;  %v1118_v36 = vld [vmem:[#allocation7 + $0x90] sm:$0xff] }
 0x104   : > { %2886 = vrot.lane.b32.xlu1 %v2885_v5, %s3305_s5  ;;  %2881 = vrot.lane.b32.xlu0 %v2880_v9, %s3304_s4  ;;  %v611_v5 = vrot.slane %v3885_v15, 2  ;;  %v612_v9 = vrot.slane %v3889_v16, 2 }
 0x105   : > { %1186 = vmatpush.msra.mxu0 %v1105_v60  ;;  %v510_v60 = vrot.slane %v3967_v26, 1 }
 0x106   : > { %2891 = vrot.lane.b32.xlu2 %v2890_v17, %s3303_s29  ;;  %v3929_v17 = vld [vmem:[%s3702_s26 + $0xb0] sm:$0xff]  ;;  %v3935_v25 = vsel %vm580_vm3, %v611_v5, %v612_v9  ;;  %v3952_v52 = vsel %vm580_vm3, %v612_v9, %v614_v46  ;;  %v616_v5 = vrot.slane %v3926_v13, 2  ;;  %v1117_v46 = vld [vmem:[#allocation7 + $0x88] sm:$0xff] }
 0x107   : > { %v2925_v43 = vpack.i.bf16 %v3935_v25, %v3863_v0  ;;  %v2945_v57 = vpack.i.bf16 %v3929_v17, %v3912_v53  ;;  %v2940_v63 = vpack.i.bf16 %v3952_v52, %v3881_v14  ;;  %v617_v9 = vrot.slane %v3929_v17, 2 }
 0x109   : > { %v3975_v37 = vsel %vm580_vm3, %v616_v5, %v617_v9 }
 0x10a   : > { %v2955_v11 = vpack.i.bf16 %v3975_v37, %v3904_v47  ;;  %2585 = vmatmul.msk.f32.gmra.mxu2 %vm977_vm4, %v3812_v32 }
 0x10c   : > { %2901 = vrot.lane.b32.xlu1 %v2900_v31, %s3305_s5  ;;  %2896 = vrot.lane.b32.xlu0 %v2895_v39, %s3304_s4  ;;  %v506_v31 = vrot.slane %v3929_v17, 1  ;;  %v2930_v39 = vpack.i.bf16 %v3926_v13, %v3894_v23 }
 0x10e   : > { %2906 = vrot.lane.b32.xlu2 %v2905_v50, %s3303_s29  ;;  %v3945_v50 = vsel %vm469_vm2, %v505_v27, %v506_v31 }
 0x10f   : > { %5243 = vst [vmem:[#allocation25_spill] sm:$0xff] %v3945_v50  ;;  %v2935_v51 = vpack.i.bf16 %v3945_v50, %v3885_v15 }
 0x112   : > { %2586 = vmatmul.msk.f32.gmra.mxu2 %vm977_vm4, %v3830_v48 }
 0x114   : > { %2916 = vrot.lane.b32.xlu1 %v2915_v61, %s3305_s5  ;;  %2911 = vrot.lane.b32.xlu0 %v2910_v1, %s3304_s4  ;;  %v1121_v61 = vld [vmem:[#allocation7 + $0xa8] sm:$0xff]  ;;  %v1104_v1 = vld [vmem:[#allocation7 + $0x20] sm:$0xff] }
 0x115   : > { %1263 = vmatpush.msra.mxu1 %v1121_v61  ;;  %1187 = vmatpush.msra.mxu0 %v1104_v1  ;;  %v511_v61 = vrot.slane %v3980_v41, 1  ;;  %v3999_v1 = vsel %vm580_vm3, %v617_v9, %v619_v49 }
 0x116   : > { %2921 = vrot.lane.b32.xlu2 %v2920_v19, %s3303_s29  ;;  %v3963_v19 = vsel %vm469_vm2, %v506_v31, %v508_v62  ;;  %v1102_v31 = vld [vmem:[#allocation7 + $0x10] sm:$0xff]  ;;  %v2970_v5 = vpack.i.bf16 %v3999_v1, %v3922_v12 }
 0x117   : > { %5244 = vst [vmem:[#allocation26_spill] sm:$0xff] %v3963_v19  ;;  %1264 = vmatpush.msra.mxu1 %v1120_v2  ;;  %v2950_v27 = vpack.i.bf16 %v3963_v19, %v3889_v16  ;;  %1188 = vmatpush.msra.mxu0 %v1103_v20  ;;  %v2975_v2 = vpack.i.bf16 %v3980_v41, %v3952_v52  ;;  %v513_v20 = vrot.slane %v429_v4, 1 }
 0x119   : > { %1265 = vmatpush.msra.mxu1 %v1119_v24  ;;  %1189 = vmatpush.msra.mxu0 %v1102_v31  ;;  %v621_v24 = vrot.slane %v3967_v26, 2  ;;  %v4013_v9 = vsel %vm469_vm2, %v511_v61, %v513_v20  ;;  %v4016_v31 = vld [vmem:[%s3702_s26 + $0xd8] sm:$0xff] }
 0x11a   : > { %2587 = vmatmul.msk.f32.gmra.mxu2 %vm977_vm4, %v3853_v58 }
 0x11b   : > { %1266 = vmatpush.msra.mxu1 %v1118_v36  ;;  %v2980_v36 = vpack.i.bf16 %v4013_v9, %v3929_v17 }
 0x11c   : > { %2931 = vrot.lane.b32.xlu1 %v2930_v39, %s3305_s5  ;;  %2926 = vrot.lane.b32.xlu0 %v2925_v43, %s3304_s4  ;;  %v2960_v39 = vpack.i.bf16 %v3967_v26, %v3935_v25  ;;  %v1101_v43 = vld [vmem:[#allocation7 + $0x8] sm:$0xff] }
 0x11d   : > { %1190 = vmatpush.msra.mxu0 %v1101_v43  ;;  %1267 = vmatpush.msra.mxu1 %v1117_v46  ;;  %v2990_v43 = vpack.i.bf16 %v4016_v31, %v3975_v37  ;;  %v4029_v46 = vld [vmem:[%s3702_s26 + $0xe0] sm:$0xff] }
 0x11e   : > { %2936 = vrot.lane.b32.xlu2 %v2935_v51, %s3303_s29  ;;  %v1100_v51 = vld [vmem:[#allocation7] sm:$0xff]  ;;  %v516_v32 = vrot.slane %v4029_v46, 1  ;;  %v627_v20 = vrot.slane %v4029_v46, 2 }
 0x11f   : > { %1191 = vmatpush.msra.mxu0 %v1100_v51  ;;  %v515_v51 = vrot.slane %v4016_v31, 1 }
 0x122   : > { %2588 = vmatmul.msk.f32.gmra.mxu2 %vm977_vm4, %v3871_v3 }
 0x124   : > { %2946 = vrot.lane.b32.xlu1 %v2945_v57, %s3305_s5  ;;  %2941 = vrot.lane.b32.xlu0 %v2940_v63, %s3304_s4  ;;  %v1116_v57 = vld [vmem:[#allocation7 + $0x80] sm:$0xff]  ;;  %v3991_v63 = vsel %vm469_vm2, %v510_v60, %v511_v61  ;;  %v4040_v60 = vsel %vm469_vm2, %v515_v51, %v516_v32 }
 0x125   : > { %5245 = vst [vmem:[#allocation27_spill] sm:$0xff] %v3991_v63  ;;  %1268 = vmatpush.msra.mxu1 %v1116_v57  ;;  %v2965_v59 = vpack.i.bf16 %v3991_v63, %v3926_v13  ;;  %v624_v57 = vrot.slane %v429_v4, 2  ;;  %v2995_v49 = vpack.i.bf16 %v4040_v60, %v3967_v26  ;;  %v3005_v4 = vpack.i.bf16 %v4029_v46, %v3999_v1 }
 0x126   : > { %2951 = vrot.lane.b32.xlu2 %v2950_v27, %s3303_s29 }
 0x128   : > { %v3988_v62 = vpop.permute.xlu2 %2796 }
 0x12a   : > { %2589 = vmatmul.msk.f32.gmra.mxu2 %vm977_vm4, %v3894_v23 }
 0x12c   : > { %2961 = vrot.lane.b32.xlu1 %v2960_v39, %s3305_s5  ;;  %2956 = vrot.lane.b32.xlu0 %v2955_v11, %s3304_s4  ;;  %v4024_v39 = vsel %vm580_vm3, %v621_v24, %v622_v22  ;;  %v432_v24 = vld [vmem:[%s3702_s26 + $0xe8] sm:$0x3] }
 0x12d   : > { %v2985_v11 = vpack.i.bf16 %v4024_v39, %v3945_v50  ;;  %v518_v48 = vrot.slane %v432_v24, 1  ;;  %v629_v56 = vrot.slane %v432_v24, 2 }
 0x12e   : > { %2966 = vrot.lane.b32.xlu2 %v2965_v59, %s3303_s29  ;;  %v4048_v59 = vsel %vm580_vm3, %v622_v22, %v624_v57 }
 0x12f   : > { %v4062_v22 = vsel %vm469_vm2, %v516_v32, %v518_v48 }
 0x130   : > { %v4010_v27 = vpop.permute.xlu2 %2801 }
 0x132   : > { %2590 = vmatmul.msk.f32.gmra.mxu2 %vm977_vm4, %v3912_v53 }
 0x134   : > { %2976 = vrot.lane.b32.xlu1 %v2975_v2, %s3305_s5  ;;  %2971 = vrot.lane.b32.xlu0 %v2970_v5, %s3304_s4  ;;  %v626_v5 = vrot.slane %v4016_v31, 2 }
 0x136   : > { %2981 = vrot.lane.b32.xlu2 %v2980_v36, %s3303_s29  ;;  %v3000_v36 = vpack.i.bf16 %v4048_v59, %v3963_v19 }
 0x138   : > { %v4037_v17 = vpop.permute.xlu2 %2816 }
 0x13a   : > { %2591 = vmatmul.msk.f32.gmra.mxu2 %vm977_vm4, %v3935_v25 }
 0x13c   : > { %2991 = vrot.lane.b32.xlu1 %v2990_v43, %s3305_s5  ;;  %2986 = vrot.lane.b32.xlu0 %v2985_v11, %s3304_s4  ;;  %v4065_v43 = vsel %vm580_vm3, %v626_v5, %v627_v20  ;;  %v4068_v11 = vld [vmem:[%s3702_s26 + $0xf0] sm:$0xff] }
 0x13d   : > { %v3015_v5 = vpack.i.bf16 %v4065_v43, %v3991_v63  ;;  %v754_v15 = vrot.slane %v4068_v11, 1 }
 0x13e   : > { %v2787_v61 = vpop.permute.xlu1 %2786  ;;  %v2777_v2 = vpop.permute.xlu0 %2776  ;;  %2996 = vrot.lane.b32.xlu2 %v2995_v49, %s3303_s29  ;;  %v3010_v49 = vpack.i.bf16 %v4062_v22, %v3980_v41 }
 0x13f   : > { %v2779_v51 = vunpack.i.h.bf16 %v2777_v2  ;;  %v2778_v57 = vunpack.i.l.bf16 %v2777_v2  ;;  %v3020_v2 = vpack.i.bf16 %v4068_v11, %v4024_v39  ;;  %v2788_v48 = vunpack.i.l.bf16 %v2787_v61 }
 0x140   : > { %v4059_v26 = vpop.permute.xlu2 %2831 }
 0x141   : > { %v978_v58 = vsel %vm977_vm4, %v3720_v40, %v2778_v57  ;;  %v1040_v41 = vsel %vm977_vm4, %v3767_v10, %v2779_v51  ;;  %v2799_v57 = vunpack.i.h.bf16 %v3988_v62 }
 0x142   : > { %2592 = vmatmul.msk.f32.gmra.mxu2 %vm977_vm4, %v3952_v52 }
 0x144   : > { %3006 = vrot.lane.b32.xlu1 %v3005_v4, %s3305_s5  ;;  %3001 = vrot.lane.b32.xlu0 %v3000_v36, %s3304_s4  ;;  %v2789_v4 = vunpack.i.h.bf16 %v2787_v61  ;;  %v4088_v61 = vld [vmem:[%s3702_s26 + $0xf8] sm:$0xff] }
 0x145   : > { %v755_v51 = vrot.slane %v4088_v61, 1 }
 0x146   : > { %v2792_v13 = vpop.permute.xlu1 %2791  ;;  %v2782_v32 = vpop.permute.xlu0 %2781  ;;  %3011 = vrot.lane.b32.xlu2 %v3010_v49, %s3303_s29  ;;  %v4110_v49 = vsel %vm580_vm3, %v627_v20, %v629_v56  ;;  %v779_v20 = vrot.slane %v4068_v11, 2 }
 0x147   : > { %v2793_v19 = vunpack.i.l.bf16 %v2792_v13  ;;  %v2784_v36 = vunpack.i.h.bf16 %v2782_v32  ;;  %v2783_v16 = vunpack.i.l.bf16 %v2782_v32  ;;  %v2794_v50 = vunpack.i.h.bf16 %v2792_v13 }
 0x148   : > { %v2798_v32 = vunpack.i.l.bf16 %v3988_v62  ;;  %v4094_v10 = vpop.permute.xlu2 %2846  ;;  %v4106_v24 = vsel %vm469_vm2, %v754_v15, %v755_v51  ;;  %v2803_v62 = vunpack.i.l.bf16 %v4010_v27  ;;  %v3030_v56 = vpack.i.bf16 %v4110_v49, %v4013_v9 }
 0x149   : > { %v999_v63 = vsel %vm998_vm5, %v978_v58, %v2783_v16  ;;  %v1060_v12 = vsel %vm998_vm5, %v1040_v41, %v2784_v36  ;;  %v979_v16 = vsel %vm977_vm4, %v3724_v42, %v2793_v19  ;;  %v3025_v42 = vpack.i.bf16 %v4106_v24, %v4016_v31 }
 0x14a   : > { %v1020_v13 = vsel %vm1019_vm6, %v999_v63, %v2788_v48  ;;  %v1080_v40 = vsel %vm1019_vm6, %v1060_v12, %v2789_v4  ;;  %v1041_v63 = vsel %vm977_vm4, %v3787_v21, %v2794_v50  ;;  %v2804_v19 = vunpack.i.h.bf16 %v4010_v27  ;;  %2593 = vmatmul.msk.f32.gmra.mxu2 %vm977_vm4, %v3975_v37 }
 0x14b   : > { %1192 = vmatmul.f32.vlgmr.msra.gmra.mxu0 %v1020_v13  ;;  %1269 = vmatmul.f32.vlgmr.msra.gmra.mxu1 %v1080_v40  ;;  %v1000_v4 = vsel %vm998_vm5, %v979_v16, %v2798_v32  ;;  %v3035_v50 = vpack.i.bf16 %v4088_v61, %v4048_v59  ;;  %v1061_v3 = vsel %vm998_vm5, %v1041_v63, %v2799_v57  ;;  %v780_v58 = vrot.slane %v4088_v61, 2  ;;  %v4138_v16 = vld [vmem:[%s3702_s26 + $0x108] sm:$0xff] }
 0x14c   : > { %3021 = vrot.lane.b32.xlu1 %v3020_v2, %s3305_s5  ;;  %3016 = vrot.lane.b32.xlu0 %v3015_v5, %s3304_s4  ;;  %v435_v2 = vld [vmem:[%s3702_s26 + $0x100] sm:$0x3]  ;;  %v1021_v31 = vsel %vm1019_vm6, %v1000_v4, %v2803_v62  ;;  %v1081_v41 = vsel %vm1019_vm6, %v1061_v3, %v2804_v19  ;;  %v2819_v63 = vunpack.i.h.bf16 %v4037_v17  ;;  %v4153_v19 = vld [vmem:[%s3702_s26 + $0x110] sm:$0xff] }
 0x14d   : > { %v757_v27 = vrot.slane %v435_v2, 1  ;;  %v908_v23 = vrot.slane %v4153_v19, 1 }
 0x14e   : > { %v2812_v12 = vpop.permute.xlu1 %2811  ;;  %v2807_v21 = vpop.permute.xlu0 %2806  ;;  %3026 = vrot.lane.b32.xlu2 %v3025_v42, %s3303_s29  ;;  %v4150_v42 = vsel %vm580_vm3, %v779_v20, %v780_v58 }
 0x14f   : > { %v2809_v15 = vunpack.i.h.bf16 %v2807_v21  ;;  %v2808_v5 = vunpack.i.l.bf16 %v2807_v21  ;;  %v2814_v48 = vunpack.i.h.bf16 %v2812_v12  ;;  %v2813_v36 = vunpack.i.l.bf16 %v2812_v12 }
 0x150   : > { %v4132_v40 = vpop.permute.xlu2 %2861  ;;  %v4135_v57 = vsel %vm469_vm2, %v755_v51, %v757_v27  ;;  %v2818_v12 = vunpack.i.l.bf16 %v4037_v17  ;;  %v907_v17 = vrot.slane %v4138_v16, 1  ;;  %v3050_v21 = vpack.i.bf16 %v4138_v16, %v4065_v43 }
 0x151   : > { %v980_v32 = vsel %vm977_vm4, %v3705_v33, %v2808_v5  ;;  %v1042_v13 = vsel %vm977_vm4, %v3729_v45, %v2809_v15  ;;  %v3040_v45 = vpack.i.bf16 %v4135_v57, %v4029_v46  ;;  %v3045_v5 = vpack.i.bf16 %v4150_v42, %v4040_v60 }
 0x152   : > { %v1001_v51 = vsel %vm998_vm5, %v980_v32, %v2813_v36  ;;  %v1062_v62 = vsel %vm998_vm5, %v1042_v13, %v2814_v48  ;;  %v782_v27 = vrot.slane %v435_v2, 2  ;;  %v2834_v32 = vunpack.i.h.bf16 %v4059_v26  ;;  %2594 = vmatmul.msk.f32.gmra.mxu2 %vm977_vm4, %v3999_v1 }
 0x153   : > { %1195 = vmatmul.f32.gmra.mxu0 %v1021_v31  ;;  %1272 = vmatmul.f32.gmra.mxu1 %v1081_v41  ;;  %v1022_v46 = vsel %vm1019_vm6, %v1001_v51, %v2818_v12  ;;  %v1082_v15 = vsel %vm1019_vm6, %v1062_v62, %v2819_v63  ;;  %v909_v41 = vsel %vm469_vm2, %v907_v17, %v908_v23  ;;  %v2833_v13 = vunpack.i.l.bf16 %v4059_v26  ;;  %v4186_v62 = vld [vmem:[%s3702_s26 + $0x118] sm:$0x3] }
 0x154   : > { %3036 = vrot.lane.b32.xlu1 %v3035_v50, %s3305_s5  ;;  %3031 = vrot.lane.b32.xlu0 %v3030_v56, %s3304_s4  ;;  %v4181_v12 = vsel %vm580_vm3, %v780_v58, %v782_v27  ;;  %v910_v58 = vrot.slane %v4186_v62, 1 }
 0x156   : > { %v2827_v33 = vpop.permute.xlu1 %2826  ;;  %v2822_v4 = vpop.permute.xlu0 %2821  ;;  %3041 = vrot.lane.b32.xlu2 %v3040_v45, %s3303_s29  ;;  %v3065_v45 = vpack.i.bf16 %v4153_v19, %v4110_v49 }
 0x157   : > { %v2824_v50 = vunpack.i.h.bf16 %v2822_v4  ;;  %v2823_v3 = vunpack.i.l.bf16 %v2822_v4  ;;  %v2829_v56 = vunpack.i.h.bf16 %v2827_v33  ;;  %v2828_v20 = vunpack.i.l.bf16 %v2827_v33 }
 0x158   : > { %v4169_v36 = vpop.permute.xlu2 %2876 }
 0x159   : > { %v981_v31 = vsel %vm977_vm4, %v3716_v38, %v2823_v3  ;;  %v1043_v48 = vsel %vm977_vm4, %v3754_v6, %v2824_v50  ;;  %v3055_v38 = vpack.i.bf16 %v909_v41, %v4068_v11  ;;  %v3060_v11 = vpack.i.bf16 %v4181_v12, %v4062_v22 }
 0x15a   : > { %v1002_v6 = vsel %vm998_vm5, %v981_v31, %v2828_v20  ;;  %v1063_v63 = vsel %vm998_vm5, %v1043_v48, %v2829_v56  ;;  %v2848_v56 = vunpack.i.l.bf16 %v4094_v10  ;;  %v2879_v52 = vunpack.i.h.bf16 %v4169_v36  ;;  %2595 = vmatmul.msk.f32.gmra.mxu2 %vm977_vm4, %v4024_v39 }
 0x15b   : > { %1198 = vmatmul.f32.gmra.mxu0 %v1022_v46  ;;  %1275 = vmatmul.f32.gmra.mxu1 %v1082_v15  ;;  %v1023_v4 = vsel %vm1019_vm6, %v1002_v6, %v2833_v13  ;;  %v1083_v53 = vsel %vm1019_vm6, %v1063_v63, %v2834_v32  ;;  %v911_v15 = vsel %vm469_vm2, %v908_v23, %v910_v58  ;;  %v2863_v6 = vunpack.i.l.bf16 %v4132_v40 }
 0x15c   : > { %3051 = vrot.lane.b32.xlu1 %v3050_v21, %s3305_s5  ;;  %3046 = vrot.lane.b32.xlu0 %v3045_v5, %s3304_s4  ;;  %v2849_v5 = vunpack.i.h.bf16 %v4094_v10 }
 0x15e   : > { %v2842_v2 = vpop.permute.xlu1 %2841  ;;  %v2837_v33 = vpop.permute.xlu0 %2836  ;;  %3056 = vrot.lane.b32.xlu2 %v3055_v38, %s3303_s29  ;;  %v2864_v38 = vunpack.i.h.bf16 %v4132_v40 }
 0x15f   : > { %v2839_v26 = vunpack.i.h.bf16 %v2837_v33  ;;  %v2838_v51 = vunpack.i.l.bf16 %v2837_v33  ;;  %v2844_v17 = vunpack.i.h.bf16 %v2842_v2  ;;  %v2843_v21 = vunpack.i.l.bf16 %v2842_v2 }
 0x160   : > { %v4199_v46 = vpop.permute.xlu2 %2891 }
 0x161   : > { %v982_v50 = vsel %vm977_vm4, %v3708_v34, %v2838_v51  ;;  %v1044_v3 = vsel %vm977_vm4, %v3779_v18, %v2839_v26  ;;  %v3070_v34 = vpack.i.bf16 %v911_v15, %v4088_v61 }
 0x162   : > { %v1003_v18 = vsel %vm998_vm5, %v982_v50, %v2843_v21  ;;  %v1064_v27 = vsel %vm998_vm5, %v1044_v3, %v2844_v17  ;;  %v2878_v17 = vunpack.i.l.bf16 %v4169_v36  ;;  %2596 = vmatmul.msk.f32.gmra.mxu2 %vm977_vm4, %v4048_v59 }
 0x163   : > { %1201 = vmatmul.f32.gmra.mxu0 %v1023_v4  ;;  %1278 = vmatmul.f32.gmra.mxu1 %v1083_v53  ;;  %v1024_v41 = vsel %vm1019_vm6, %v1003_v18, %v2848_v56  ;;  %v1084_v32 = vsel %vm1019_vm6, %v1064_v27, %v2849_v5  ;;  %v2894_v27 = vunpack.i.h.bf16 %v4199_v46 }
 0x164   : > { %3066 = vrot.lane.b32.xlu1 %v3065_v45, %s3305_s5  ;;  %3061 = vrot.lane.b32.xlu0 %v3060_v11, %s3304_s4  ;;  %s3190_s4 = scalar_lea.hbm %s5182_s3, 512 }
 0x165   : > { %p3192_p7 = scmp.lt.s32.totalorder %s3190_s4, %s3186_s25 }
 0x166   : > { %v2857_v20 = vpop.permute.xlu1 %2856  ;;  %v2852_v31 = vpop.permute.xlu0 %2851  ;;  %3071 = vrot.lane.b32.xlu2 %v3070_v34, %s3303_s29 }
 0x167   : > { %v2854_v23 = vunpack.i.h.bf16 %v2852_v31  ;;  %v2853_v48 = vunpack.i.l.bf16 %v2852_v31  ;;  %v2859_v10 = vunpack.i.h.bf16 %v2857_v20  ;;  %v2858_v13 = vunpack.i.l.bf16 %v2857_v20  ;;  %p3193_p8 = por %p3192_p7, %p3191_p5 }
 0x168   : > { %v4217_v2 = vpop.permute.xlu2 %2906  ;;  %v2893_v31 = vunpack.i.l.bf16 %v4199_v46 }
 0x169   : > { %v983_v25 = vsel %vm977_vm4, %v3711_v35, %v2853_v48  ;;  %v1045_v61 = vsel %vm977_vm4, %v3799_v28, %v2854_v23  ;;  %p3194_p9 = pnand %p3193_p8, %p3189_p3 }
 0x16a   : > { %v1004_v33 = vsel %vm998_vm5, %v983_v25, %v2858_v13  ;;  %v1065_v45 = vsel %vm998_vm5, %v1045_v61, %v2859_v10  ;;  %2597 = vmatmul.msk.f32.gmra.mxu2 %vm977_vm4, %v4065_v43 }
 0x16b   : > { %1204 = vmatmul.f32.gmra.mxu0 %v1024_v41  ;;  %1281 = vmatmul.f32.gmra.mxu1 %v1084_v32  ;;  %v1025_v28 = vsel %vm1019_vm6, %v1004_v33, %v2863_v6  ;;  %v1085_v4 = vsel %vm1019_vm6, %v1065_v45, %v2864_v38  ;;  %v2909_v6 = vunpack.i.h.bf16 %v4217_v2 }
 0x16e   : > { %v2872_v63 = vpop.permute.xlu1 %2871  ;;  %v2867_v35 = vpop.permute.xlu0 %2866 }
 0x16f   : > { %v2869_v26 = vunpack.i.h.bf16 %v2867_v35  ;;  %v2868_v51 = vunpack.i.l.bf16 %v2867_v35  ;;  %v2874_v53 = vunpack.i.h.bf16 %v2872_v63  ;;  %v2873_v11 = vunpack.i.l.bf16 %v2872_v63 }
 0x170   : > { %v2922_v15 = vpop.permute.xlu2 %2921  ;;  %v2908_v63 = vunpack.i.l.bf16 %v4217_v2 }
 0x171   : > { %v984_v40 = vsel %vm977_vm4, %v3758_v7, %v2868_v51  ;;  %v1046_v58 = vsel %vm977_vm4, %v3822_v44, %v2869_v26 }
 0x172   : > { %v1005_v50 = vsel %vm998_vm5, %v984_v40, %v2873_v11  ;;  %v1066_v3 = vsel %vm998_vm5, %v1046_v58, %v2874_v53  ;;  %v2924_v40 = vunpack.i.h.bf16 %v2922_v15  ;;  %v2923_v58 = vunpack.i.l.bf16 %v2922_v15  ;;  %2598 = vmatmul.msk.f32.gmra.mxu2 %vm977_vm4, %v4110_v49 }
 0x173   : > { %1207 = vmatmul.f32.gmra.mxu0 %v1025_v28  ;;  %1284 = vmatmul.f32.gmra.mxu1 %v1085_v4  ;;  %v1026_v44 = vsel %vm1019_vm6, %v1005_v50, %v2878_v17  ;;  %v1086_v20 = vsel %vm1019_vm6, %v1066_v3, %v2879_v52 }
 0x176   : > { %v2887_v21 = vpop.permute.xlu1 %2886  ;;  %v2882_v5 = vpop.permute.xlu0 %2881 }
 0x177   : > { %v2884_v7 = vunpack.i.h.bf16 %v2882_v5  ;;  %v2883_v56 = vunpack.i.l.bf16 %v2882_v5  ;;  %v2889_v34 = vunpack.i.h.bf16 %v2887_v21  ;;  %v2888_v18 = vunpack.i.l.bf16 %v2887_v21 }
 0x178   : > { %v2937_v13 = vpop.permute.xlu2 %2936 }
 0x179   : > { %v985_v36 = vsel %vm977_vm4, %v3762_v8, %v2883_v56  ;;  %v1047_v37 = vsel %vm977_vm4, %v3840_v54, %v2884_v7 }
 0x17a   : > { %v1006_v48 = vsel %vm998_vm5, %v985_v36, %v2888_v18  ;;  %v1067_v41 = vsel %vm998_vm5, %v1047_v37, %v2889_v34  ;;  %v1725_v34 = vld [vmem:[#allocation9 + $0x178] sm:$0xff]  ;;  %v2939_v18 = vunpack.i.h.bf16 %v2937_v13  ;;  %v2938_v36 = vunpack.i.l.bf16 %v2937_v13  ;;  %2599 = vmatmul.msk.f32.gmra.mxu2 %vm977_vm4, %v4150_v42 }
 0x17b   : > { %1210 = vmatmul.f32.gmra.mxu0 %v1026_v44  ;;  %1287 = vmatmul.f32.gmra.mxu1 %v1086_v20  ;;  %v1027_v54 = vsel %vm1019_vm6, %v1006_v48, %v2893_v31  ;;  %v1087_v25 = vsel %vm1019_vm6, %v1067_v41, %v2894_v27  ;;  %v1693_v20 = vld [vmem:[#allocation9 + $0x78] sm:$0xff] }
 0x17c   : > { %1822 = vmatpush.msra.mxu3 %v1693_v20  ;;  %1952 = vmatpush.msrb.mxu2 %v1725_v34  ;;  %v1685_v34 = vld [vmem:[#allocation9 + $0x38] sm:$0xff] }
 0x17e   : > { %v2902_v23 = vpop.permute.xlu1 %2901  ;;  %v2897_v32 = vpop.permute.xlu0 %2896 }
 0x17f   : > { %v2899_v10 = vunpack.i.h.bf16 %v2897_v32  ;;  %v2898_v8 = vunpack.i.l.bf16 %v2897_v32  ;;  %v2904_v61 = vunpack.i.h.bf16 %v2902_v23  ;;  %v2903_v38 = vunpack.i.l.bf16 %v2902_v23 }
 0x180   : > { %v4263_v11 = vpop.permute.xlu2 %2951 }
 0x181   : > { %v986_v46 = vsel %vm977_vm4, %v3803_v29, %v2898_v8  ;;  %v1048_v1 = vsel %vm977_vm4, %v3863_v0, %v2899_v10  ;;  %v5246_v8 = vld [vmem:[#allocation20_spill] sm:$0xff] }
 0x182   : > { %v1007_v45 = vsel %vm998_vm5, %v986_v46, %v2903_v38  ;;  %v1068_v35 = vsel %vm998_vm5, %v1048_v1, %v2904_v61  ;;  %v1691_v61 = vld [vmem:[#allocation9 + $0x68] sm:$0xff]  ;;  %v2954_v38 = vunpack.i.h.bf16 %v4263_v11  ;;  %v2953_v46 = vunpack.i.l.bf16 %v4263_v11  ;;  %2600 = vmatmul.msk.f32.gmra.mxu2 %vm977_vm4, %v4181_v12 }
 0x183   : > { %1213 = vmatmul.f32.gmra.mxu0 %v1027_v54  ;;  %1290 = vmatmul.f32.gmra.mxu1 %v1087_v25  ;;  %v1028_v28 = vsel %vm1019_vm6, %v1007_v45, %v2908_v63  ;;  %v1088_v0 = vsel %vm1019_vm6, %v1068_v35, %v2909_v6  ;;  %v5247_v54 = vld [vmem:[#allocation23_spill] sm:$0xff]  ;;  %v1692_v25 = vld [vmem:[#allocation9 + $0x70] sm:$0xff]  ;;  %v1690_v45 = vld [vmem:[#allocation9 + $0x60] sm:$0xff] }
 0x184   : > { %1823 = vmatpush.msra.mxu3 %v1692_v25  ;;  %v1720_v25 = vld [vmem:[#allocation9 + $0x150] sm:$0xff]  ;;  %v1719_v12 = vld [vmem:[#allocation9 + $0x148] sm:$0xff] }
 0x186   : > { %v2917_v33 = vpop.permute.xlu1 %2916  ;;  %v2912_v26 = vpop.permute.xlu0 %2911  ;;  %1824 = vmatpush.msra.mxu3 %v1691_v61  ;;  %v1740_v61 = vld [vmem:[#allocation9 + $0x1f0] sm:$0xff] }
 0x187   : > { %v2914_v51 = vunpack.i.h.bf16 %v2912_v26  ;;  %v2913_v29 = vunpack.i.l.bf16 %v2912_v26  ;;  %v2919_v4 = vunpack.i.h.bf16 %v2917_v33  ;;  %v2918_v53 = vunpack.i.l.bf16 %v2917_v33 }
 0x188   : > { %v4279_v59 = vpop.permute.xlu2 %2966  ;;  %1825 = vmatpush.msra.mxu3 %v1690_v45 }
 0x189   : > { %v987_v2 = vsel %vm977_vm4, %v3807_v30, %v2913_v29  ;;  %v1049_v39 = vsel %vm977_vm4, %v3881_v14, %v2914_v51  ;;  %v1689_v29 = vld [vmem:[#allocation9 + $0x58] sm:$0xff] }
 0x18a   : > { %v1008_v17 = vsel %vm998_vm5, %v987_v2, %v2918_v53  ;;  %v1069_v21 = vsel %vm998_vm5, %v1049_v39, %v2919_v4  ;;  %v5248_v53 = vld [vmem:[#allocation21_spill] sm:$0xff]  ;;  %1826 = vmatpush.msra.mxu3 %v1689_v29  ;;  %v973_v29 = vrot.slane %v4153_v19, 2  ;;  %v1752_v19 = vld [vmem:[#allocation9 + $0x250] sm:$0xff] }
 0x18b   : > { %1216 = vmatmul.f32.gmra.mxu0 %v1028_v28  ;;  %1293 = vmatmul.f32.gmra.mxu1 %v1088_v0  ;;  %v1029_v30 = vsel %vm1019_vm6, %v1008_v17, %v2923_v58  ;;  %v1089_v7 = vsel %vm1019_vm6, %v1069_v21, %v2924_v40  ;;  %v5249_v2 = vld [vmem:[#allocation25_spill] sm:$0xff]  ;;  %v1688_v40 = vld [vmem:[#allocation9 + $0x50] sm:$0xff]  ;;  %v2969_v17 = vunpack.i.h.bf16 %v4279_v59  ;;  %v2968_v21 = vunpack.i.l.bf16 %v4279_v59 }
 0x18c   : > { %v1724_v58 = vld [vmem:[#allocation9 + $0x170] sm:$0xff]  ;;  %1827 = vmatpush.msra.mxu3 %v1688_v40  ;;  %v1723_v59 = vld [vmem:[#allocation9 + $0x168] sm:$0xff]  ;;  %v1757_v40 = vld [vmem:[#allocation9 + $0x278] sm:$0xff] }
 0x18d   : > { %1953 = vmatpush.msrb.mxu2 %v1724_v58  ;;  %v1738_v58 = vld [vmem:[#allocation9 + $0x1e0] sm:$0xff]  ;;  %2082 = vmatpush.msrb.mxu1 %v1757_v40 }
 0x18e   : > { %v2932_v52 = vpop.permute.xlu1 %2931  ;;  %v2927_v50 = vpop.permute.xlu0 %2926 }
 0x18f   : > { %v2929_v3 = vunpack.i.h.bf16 %v2927_v50  ;;  %v2928_v5 = vunpack.i.l.bf16 %v2927_v50  ;;  %v2934_v14 = vunpack.i.h.bf16 %v2932_v52  ;;  %v2933_v56 = vunpack.i.l.bf16 %v2932_v52  ;;  %v1687_v52 = vld [vmem:[#allocation9 + $0x48] sm:$0xff]  ;;  %1954 = vmatpush.msrb.mxu2 %v1723_v59  ;;  %v1716_v59 = vld [vmem:[#allocation9 + $0x130] sm:$0xff] }
 0x190   : > { %v4297_v33 = vpop.permute.xlu2 %2981  ;;  %1828 = vmatpush.msra.mxu3 %v1687_v52  ;;  %v1680_v52 = vld [vmem:[#allocation9 + $0x10] sm:$0xff] }
 0x191   : > { %v988_v15 = vsel %vm977_vm4, %v3844_v55, %v2928_v5  ;;  %v1050_v44 = vsel %vm977_vm4, %v3904_v47, %v2929_v3 }
 0x192   : > { %v1009_v27 = vsel %vm998_vm5, %v988_v15, %v2933_v56  ;;  %v1070_v55 = vsel %vm998_vm5, %v1050_v44, %v2934_v14  ;;  %v4313_v44 = vpop.f32.mrf.mxu2 }
 0x193   : > { %1219 = vmatmul.f32.gmra.mxu0 %v1029_v30  ;;  %1296 = vmatmul.f32.gmra.mxu1 %v1089_v7  ;;  %v1030_v48 = vsel %vm1019_vm6, %v1009_v27, %v2938_v36  ;;  %v1090_v41 = vsel %vm1019_vm6, %v1070_v55, %v2939_v18  ;;  %v1686_v30 = vld [vmem:[#allocation9 + $0x40] sm:$0xff]  ;;  %v5250_v27 = vld [vmem:[#allocation22_spill] sm:$0xff] }
 0x194   : > { %1829 = vmatpush.msra.mxu3 %v1686_v30  ;;  %v1756_v30 = vld [vmem:[#allocation9 + $0x270] sm:$0xff] }
 0x195   : > { %2083 = vmatpush.msrb.mxu1 %v1756_v30  ;;  %v1730_v30 = vld [vmem:[#allocation9 + $0x1a0] sm:$0xff] }
 0x196   : > { %v2947_v37 = vpop.permute.xlu1 %2946  ;;  %v2942_v31 = vpop.permute.xlu0 %2941  ;;  %1830 = vmatpush.msra.mxu3 %v1685_v34  ;;  %v1755_v34 = vld [vmem:[#allocation9 + $0x268] sm:$0xff] }
 0x197   : > { %v2944_v47 = vunpack.i.h.bf16 %v2942_v31  ;;  %v2943_v23 = vunpack.i.l.bf16 %v2942_v31  ;;  %v2949_v32 = vunpack.i.h.bf16 %v2947_v37  ;;  %v2948_v10 = vunpack.i.l.bf16 %v2947_v37  ;;  %v1722_v37 = vld [vmem:[#allocation9 + $0x160] sm:$0xff]  ;;  %v5251_v31 = vld [vmem:[#allocation26_spill] sm:$0xff]  ;;  %2084 = vmatpush.msrb.mxu1 %v1755_v34 }
 0x198   : > { %v4311_v15 = vpop.permute.xlu2 %2996  ;;  %1955 = vmatpush.msrb.mxu2 %v1722_v37  ;;  %v1715_v37 = vld [vmem:[#allocation9 + $0x128] sm:$0xff] }
 0x199   : > { %v989_v13 = vsel %vm977_vm4, %v5246_v8, %v2943_v23  ;;  %v1051_v43 = vsel %vm977_vm4, %v5247_v54, %v2944_v47  ;;  %v1684_v23 = vld [vmem:[#allocation9 + $0x30] sm:$0xff] }
 0x19a   : > { %v1010_v6 = vsel %vm998_vm5, %v989_v13, %v2948_v10  ;;  %v1071_v63 = vsel %vm998_vm5, %v1051_v43, %v2949_v32  ;;  %v2984_v32 = vunpack.i.h.bf16 %v4297_v33  ;;  %v2983_v10 = vunpack.i.l.bf16 %v4297_v33  ;;  %1831 = vmatpush.msra.mxu3 %v1684_v23  ;;  %v1683_v13 = vld [vmem:[#allocation9 + $0x28] sm:$0xff] }
 0x19b   : > { %1222 = vmatmul.f32.gmra.mxu0 %v1030_v48  ;;  %1299 = vmatmul.f32.gmra.mxu1 %v1090_v41  ;;  %v1031_v28 = vsel %vm1019_vm6, %v1010_v6, %v2953_v46  ;;  %v1091_v0 = vsel %vm1019_vm6, %v1071_v63, %v2954_v38  ;;  %v1721_v48 = vld [vmem:[#allocation9 + $0x158] sm:$0xff]  ;;  %v1682_v46 = vld [vmem:[#allocation9 + $0x20] sm:$0xff]  ;;  %v4327_v63 = vpop.f32.mrf.mxu2  ;;  %v1739_v33 = vld [vmem:[#allocation9 + $0x1e8] sm:$0xff] }
 0x19c   : > { %v1741_v41 = vld [vmem:[#allocation9 + $0x1f8] sm:$0xff]  ;;  %1956 = vmatpush.msrb.mxu2 %v1721_v48  ;;  %1832 = vmatpush.msra.mxu3 %v1683_v13 }
 0x19d   : > { %2017 = vmatpush.msrb.mxu0 %v1741_v41  ;;  %v1735_v41 = vld [vmem:[#allocation9 + $0x1c8] sm:$0xff] }
 0x19e   : > { %v2962_v1 = vpop.permute.xlu1 %2961  ;;  %v2957_v35 = vpop.permute.xlu0 %2956  ;;  %1957 = vmatpush.msrb.mxu2 %v1720_v25  ;;  %1833 = vmatpush.msra.mxu3 %v1682_v46 }
 0x19f   : > { %v2959_v26 = vunpack.i.h.bf16 %v2957_v35  ;;  %v2958_v51 = vunpack.i.l.bf16 %v2957_v35  ;;  %v2964_v4 = vunpack.i.h.bf16 %v2962_v1  ;;  %v2963_v49 = vunpack.i.l.bf16 %v2962_v1  ;;  %2018 = vmatpush.msrb.mxu0 %v1740_v61 }
 0x1a0   : > { %1958 = vmatpush.msrb.mxu2 %v1719_v12 }
 0x1a1   : > { %v990_v11 = vsel %vm977_vm4, %v5248_v53, %v2958_v51  ;;  %v1052_v39 = vsel %vm977_vm4, %v5249_v2, %v2959_v26  ;;  %v1681_v26 = vld [vmem:[#allocation9 + $0x18] sm:$0xff]  ;;  %v972_v51 = vrot.slane %v4138_v16, 2  ;;  %2019 = vmatpush.msrb.mxu0 %v1739_v33  ;;  %v5252_v53 = vld [vmem:[#allocation24_spill] sm:$0xff] }
 0x1a2   : > { %v1011_v3 = vsel %vm998_vm5, %v990_v11, %v2963_v49  ;;  %v1072_v5 = vsel %vm998_vm5, %v1052_v39, %v2964_v4  ;;  %v4333_v4 = vpop.permute.xlu2 %3011  ;;  %v1718_v49 = vld [vmem:[#allocation9 + $0x140] sm:$0xff]  ;;  %v5253_v2 = vld [vmem:[#allocation27_spill] sm:$0xff]  ;;  %1834 = vmatpush.msra.mxu3 %v1681_v26 }
 0x1a3   : > { %1225 = vmatmul.f32.gmra.mxu0 %v1031_v28  ;;  %1302 = vmatmul.f32.gmra.mxu1 %v1091_v0  ;;  %v1032_v20 = vsel %vm1019_vm6, %v1011_v3, %v2968_v21  ;;  %v1092_v42 = vsel %vm1019_vm6, %v1072_v5, %v2969_v17  ;;  %v974_v16 = vsel %vm580_vm3, %v972_v51, %v973_v29  ;;  %v1717_v17 = vld [vmem:[#allocation9 + $0x138] sm:$0xff]  ;;  %v2999_v21 = vunpack.i.h.bf16 %v4311_v15  ;;  %v4350_v48 = vpop.f32.mrf.mxu2 }
 0x1a4   : > { %1959 = vmatpush.msrb.mxu2 %v1718_v49  ;;  %v1737_v5 = vld [vmem:[#allocation9 + $0x1d8] sm:$0xff]  ;;  %2020 = vmatpush.msrb.mxu0 %v1738_v58  ;;  %v3014_v61 = vunpack.i.h.bf16 %v4333_v4 }
 0x1a5   : > { %2601 = vmatmul.msk.f32.gmra.mxu2 %vm977_vm4, %v974_v16  ;;  %1835 = vmatpush.msra.mxu3 %v1680_v52  ;;  %v1733_v33 = vld [vmem:[#allocation9 + $0x1b8] sm:$0xff]  ;;  %v1731_v16 = vld [vmem:[#allocation9 + $0x1a8] sm:$0xff] }
 0x1a6   : > { %v2977_v50 = vpop.permute.xlu1 %2976  ;;  %v2972_v7 = vpop.permute.xlu0 %2971  ;;  %1960 = vmatpush.msrb.mxu2 %v1717_v17  ;;  %2021 = vmatpush.msrb.mxu0 %v1737_v5  ;;  %v1750_v17 = vld [vmem:[#allocation9 + $0x240] sm:$0xff] }
 0x1a7   : > { %v2974_v14 = vunpack.i.h.bf16 %v2972_v7  ;;  %v2973_v56 = vunpack.i.l.bf16 %v2972_v7  ;;  %v2979_v18 = vunpack.i.h.bf16 %v2977_v50  ;;  %v2978_v36 = vunpack.i.l.bf16 %v2977_v50 }
 0x1a8   : > { %v2998_v50 = vunpack.i.l.bf16 %v4311_v15  ;;  %1961 = vmatpush.msrb.mxu2 %v1716_v59 }
 0x1a9   : > { %v991_v55 = vsel %vm977_vm4, %v5250_v27, %v2973_v56  ;;  %v1053_v47 = vsel %vm977_vm4, %v5251_v31, %v2974_v14  ;;  %v1679_v56 = vld [vmem:[#allocation9 + $0x8] sm:$0xff]  ;;  %v975_v31 = vrot.slane %v4186_v62, 2 }
 0x1aa   : > { %v1012_v54 = vsel %vm998_vm5, %v991_v55, %v2978_v36  ;;  %v1073_v43 = vsel %vm998_vm5, %v1053_v47, %v2979_v18  ;;  %v1678_v36 = vld [vmem:[#allocation9] sm:$0xff]  ;;  %1836 = vmatpush.msra.mxu3 %v1679_v56  ;;  %1962 = vmatpush.msrb.mxu2 %v1715_v37  ;;  %v4356_v62 = vpop.permute.xlu2 %3026  ;;  %v1749_v56 = vld [vmem:[#allocation9 + $0x238] sm:$0xff] }
 0x1ab   : > { %1228 = vmatmul.f32.gmra.mxu0 %v1032_v20  ;;  %1305 = vmatmul.f32.gmra.mxu1 %v1092_v42  ;;  %v1033_v45 = vsel %vm1019_vm6, %v1012_v54, %v2983_v10  ;;  %v1093_v35 = vsel %vm1019_vm6, %v1073_v43, %v2984_v32  ;;  %v1736_v42 = vld [vmem:[#allocation9 + $0x1d0] sm:$0xff]  ;;  %v1754_v32 = vld [vmem:[#allocation9 + $0x260] sm:$0xff]  ;;  %v976_v25 = vsel %vm580_vm3, %v973_v29, %v975_v31  ;;  %v1709_v29 = vld [vmem:[#allocation9 + $0xf8] sm:$0xff]  ;;  %v4372_v52 = vpop.f32.mrf.mxu2 }
 0x1ac   : > { %2022 = vmatpush.msrb.mxu0 %v1736_v42  ;;  %v3075_v10 = vld [vmem:[%s3702_s26 + $0xb0] sm:$0xff]  ;;  %1837 = vmatpush.msra.mxu3 %v1678_v36 }
 0x1ad   : > { %v1714_v54 = vld [vmem:[#allocation9 + $0x120] sm:$0xff]  ;;  %2085 = vmatpush.msrb.mxu1 %v1754_v32  ;;  %2602 = vmatmul.msk.f32.gmra.mxu2 %vm977_vm4, %v976_v25  ;;  %v1728_v32 = vld [vmem:[#allocation9 + $0x190] sm:$0xff] }
 0x1ae   : > { %v2992_v8 = vpop.permute.xlu1 %2991  ;;  %v2987_v38 = vpop.permute.xlu0 %2986  ;;  %v1734_v43 = vld [vmem:[#allocation9 + $0x1c0] sm:$0xff]  ;;  %2023 = vmatpush.msrb.mxu0 %v1735_v41  ;;  %1963 = vmatpush.msrb.mxu2 %v1714_v54 }
 0x1af   : > { %v2989_v1 = vunpack.i.h.bf16 %v2987_v38  ;;  %v2988_v6 = vunpack.i.l.bf16 %v2987_v38  ;;  %v2994_v28 = vunpack.i.h.bf16 %v2992_v8  ;;  %v2993_v0 = vunpack.i.l.bf16 %v2992_v8  ;;  %1887 = vmatpush.msrb.mxu3 %v1709_v29  ;;  %v1746_v25 = vld [vmem:[#allocation9 + $0x220] sm:$0xff]  ;;  %v1707_v29 = vld [vmem:[#allocation9 + $0xe8] sm:$0xff] }
 0x1b0   : > { %v3013_v38 = vunpack.i.l.bf16 %v4333_v4  ;;  %2024 = vmatpush.msrb.mxu0 %v1734_v43  ;;  %v1727_v43 = vld [vmem:[#allocation9 + $0x188] sm:$0xff] }
 0x1b1   : > { %v992_v11 = vsel %vm977_vm4, %v5252_v53, %v2988_v6  ;;  %v1054_v39 = vsel %vm977_vm4, %v5253_v2, %v2989_v1  ;;  %v1713_v1 = vld [vmem:[#allocation9 + $0x118] sm:$0xff]  ;;  %v1711_v2 = vld [vmem:[#allocation9 + $0x108] sm:$0xff] }
 0x1b2   : > { %v1013_v7 = vsel %vm998_vm5, %v992_v11, %v2993_v0  ;;  %v1074_v14 = vsel %vm998_vm5, %v1054_v39, %v2994_v28  ;;  %1964 = vmatpush.msrb.mxu2 %v1713_v1  ;;  %v1732_v28 = vld [vmem:[#allocation9 + $0x1b0] sm:$0xff]  ;;  %2025 = vmatpush.msrb.mxu0 %v1733_v33  ;;  %v1751_v11 = vld [vmem:[#allocation9 + $0x248] sm:$0xff] }
 0x1b3   : > { %1231 = vmatmul.f32.gmra.mxu0 %v1033_v45  ;;  %1308 = vmatmul.f32.gmra.mxu1 %v1093_v35  ;;  %v1034_v27 = vsel %vm1019_vm6, %v1013_v7, %v2998_v50  ;;  %v1094_v55 = vsel %vm1019_vm6, %v1074_v14, %v2999_v21  ;;  %v1712_v35 = vld [vmem:[#allocation9 + $0x110] sm:$0xff]  ;;  %v1710_v21 = vld [vmem:[#allocation9 + $0x100] sm:$0xff]  ;;  %v3029_v50 = vunpack.i.h.bf16 %v4356_v62  ;;  %v3042_v14 = vpop.permute.xlu2 %3041 }
 0x1b4   : > { %1965 = vmatpush.msrb.mxu2 %v1712_v35  ;;  %v3076_v39 = vld [vmem:[%s3702_s26 + $0xc0] sm:$0xff]  ;;  %2026 = vmatpush.msrb.mxu0 %v1732_v28 }
 0x1b6   : > { %v3007_v3 = vpop.permute.xlu1 %3006  ;;  %v3002_v20 = vpop.permute.xlu0 %3001  ;;  %1966 = vmatpush.msrb.mxu2 %v1711_v2  ;;  %2027 = vmatpush.msrb.mxu0 %v1731_v16 }
 0x1b7   : > { %v3004_v15 = vunpack.i.h.bf16 %v3002_v20  ;;  %v3003_v18 = vunpack.i.l.bf16 %v3002_v20  ;;  %v3009_v47 = vunpack.i.h.bf16 %v3007_v3  ;;  %v3008_v23 = vunpack.i.l.bf16 %v3007_v3  ;;  %v1729_v20 = vld [vmem:[#allocation9 + $0x198] sm:$0xff] }
 0x1b8   : > { %v3028_v3 = vunpack.i.l.bf16 %v4356_v62  ;;  %1967 = vmatpush.msrb.mxu2 %v1710_v21  ;;  %2028 = vmatpush.msrb.mxu0 %v1730_v30  ;;  %v1743_v21 = vld [vmem:[#allocation9 + $0x208] sm:$0xff] }
 0x1b9   : > { %v993_v8 = vsel %vm977_vm4, %v3075_v10, %v3003_v18  ;;  %v1055_v13 = vsel %vm977_vm4, %v4013_v9, %v3004_v15  ;;  %v1753_v9 = vld [vmem:[#allocation9 + $0x258] sm:$0xff]  ;;  %v1708_v15 = vld [vmem:[#allocation9 + $0xf0] sm:$0xff]  ;;  %v1747_v10 = vld [vmem:[#allocation9 + $0x228] sm:$0xff] }
 0x1ba   : > { %v1014_v6 = vsel %vm998_vm5, %v993_v8, %v3008_v23  ;;  %v1075_v12 = vsel %vm998_vm5, %v1055_v13, %v3009_v47  ;;  %2086 = vmatpush.msrb.mxu1 %v1753_v9  ;;  %v1748_v18 = vld [vmem:[#allocation9 + $0x230] sm:$0xff]  ;;  %1888 = vmatpush.msrb.mxu3 %v1708_v15  ;;  %v1428_v47 = vstv %s4378_s7  ;;  %v3077_v8 = vld [vmem:[%s3702_s26 + $0xc8] sm:$0xff] }
 0x1bb   : > { %1234 = vmatmul.f32.gmra.mxu0 %v1034_v27  ;;  %1311 = vmatmul.f32.gmra.mxu1 %v1094_v55  ;;  %v1035_v0 = vsel %vm1019_vm6, %v1014_v6, %v3013_v38  ;;  %v1095_v4 = vsel %vm1019_vm6, %v1075_v12, %v3014_v61  ;;  %vm4390_vm7 = vcmp.eq.s32.totalorder %v1428_v47, 1  ;;  %v3044_v38 = vunpack.i.h.bf16 %v3042_v14  ;;  %v4396_v12 = vpop.f32.mrf.mxu2 }
 0x1bc   : > { %2087 = vmatpush.msrb.mxu1 %v1752_v19  ;;  %2029 = vmatpush.msrb.mxu0 %v1729_v20 }
 0x1bd   : > { %1889 = vmatpush.msrb.mxu3 %v1707_v29 }
 0x1be   : > { %v3022_v46 = vpop.permute.xlu1 %3021  ;;  %v3017_v45 = vpop.permute.xlu0 %3016  ;;  %2088 = vmatpush.msrb.mxu1 %v1751_v11  ;;  %2030 = vmatpush.msrb.mxu0 %v1728_v32 }
 0x1bf   : > { %v3019_v26 = vunpack.i.h.bf16 %v3017_v45  ;;  %v3018_v51 = vunpack.i.l.bf16 %v3017_v45  ;;  %v3024_v49 = vunpack.i.h.bf16 %v3022_v46  ;;  %v3023_v53 = vunpack.i.l.bf16 %v3022_v46  ;;  %v1745_v45 = vld [vmem:[#allocation9 + $0x218] sm:$0xff] }
 0x1c0   : > { %2089 = vmatpush.msrb.mxu1 %v1750_v17  ;;  %v3043_v46 = vunpack.i.l.bf16 %v3042_v14  ;;  %2031 = vmatpush.msrb.mxu0 %v1727_v43 }
 0x1c1   : > { %v994_v40 = vsel %vm977_vm4, %v3076_v39, %v3018_v51  ;;  %v1056_v58 = vsel %vm977_vm4, %v4040_v60, %v3019_v26  ;;  %v3057_v51 = vpop.permute.xlu2 %3056  ;;  %v1744_v39 = vld [vmem:[#allocation9 + $0x210] sm:$0xff] }
 0x1c2   : > { %v1015_v60 = vsel %vm998_vm5, %v994_v40, %v3023_v53  ;;  %v1076_v7 = vsel %vm998_vm5, %v1056_v58, %v3024_v49  ;;  %2090 = vmatpush.msrb.mxu1 %v1749_v56  ;;  %v3078_v40 = vld [vmem:[%s3702_s26 + $0xd8] sm:$0xff] }
 0x1c3   : > { %1237 = vmatmul.f32.gmra.mxu0 %v1035_v0  ;;  %1314 = vmatmul.f32.gmra.mxu1 %v1095_v4  ;;  %v1036_v27 = vsel %vm1019_vm6, %v1015_v60, %v3028_v3  ;;  %v1096_v55 = vsel %vm1019_vm6, %v1076_v7, %v3029_v50  ;;  %v3059_v50 = vunpack.i.h.bf16 %v3057_v51  ;;  %v3058_v3 = vunpack.i.l.bf16 %v3057_v51  ;;  %v1742_v7 = vld [vmem:[#allocation9 + $0x200] sm:$0xff] }
 0x1c4   : > { %2091 = vmatpush.msrb.mxu1 %v1748_v18 }
 0x1c6   : > { %v3037_v5 = vpop.permute.xlu1 %3036  ;;  %v3032_v59 = vpop.permute.xlu0 %3031  ;;  %2092 = vmatpush.msrb.mxu1 %v1747_v10 }
 0x1c7   : > { %v3034_v42 = vunpack.i.h.bf16 %v3032_v59  ;;  %v3033_v34 = vunpack.i.l.bf16 %v3032_v59  ;;  %v3039_v23 = vunpack.i.h.bf16 %v3037_v5  ;;  %v3038_v41 = vunpack.i.l.bf16 %v3037_v5 }
 0x1c8   : > { %v1193_v36 = vpop.f32.mrf.mxu0  ;;  %v1270_v37 = vpop.f32.mrf.mxu1  ;;  %2093 = vmatpush.msrb.mxu1 %v1746_v25 }
 0x1c9   : > { %v1271_v31 = vadd.f32 %v1270_v37, %v1193_v36  ;;  %v995_v13 = vsel %vm977_vm4, %v3077_v8, %v3033_v34  ;;  %v1057_v54 = vsel %vm977_vm4, %v4062_v22, %v3034_v42  ;;  %v4411_v42 = vpop.f32.mrf.mxu2  ;;  %v1706_v34 = vld [vmem:[#allocation9 + $0xe0] sm:$0xff] }
 0x1ca   : > { %v1016_v6 = vsel %vm998_vm5, %v995_v13, %v3038_v41  ;;  %v1077_v22 = vsel %vm998_vm5, %v1057_v54, %v3039_v23  ;;  %2094 = vmatpush.msrb.mxu1 %v1745_v45  ;;  %1890 = vmatpush.msrb.mxu3 %v1706_v34  ;;  %v3079_v23 = vld [vmem:[%s3702_s26 + $0xe0] sm:$0xff] }
 0x1cb   : > { %v1348_v62 = vadd.f32 %v4313_v44, %v1271_v31  ;;  %1240 = vmatmul.f32.gmra.mxu0 %v1036_v27  ;;  %1317 = vmatmul.f32.gmra.mxu1 %v1096_v55  ;;  %v1726_v44 = vld [vmem:[#allocation9 + $0x180] sm:$0xff]  ;;  %v1037_v4 = vsel %vm1019_vm6, %v1016_v6, %v3043_v46  ;;  %v1097_v49 = vsel %vm1019_vm6, %v1077_v22, %v3044_v38  ;;  %v3072_v31 = vpop.permute.xlu2 %3071 }
 0x1cc   : > { %2032 = vmatpush.msrb.mxu0 %v1726_v44  ;;  %2095 = vmatpush.msrb.mxu1 %v1744_v39  ;;  %v3073_v8 = vunpack.i.l.bf16 %v3072_v31  ;;  %v3074_v54 = vunpack.i.h.bf16 %v3072_v31 }
 0x1cd   : > { %v1407_v1 = vmax.f32 %v1348_v62, 0.0 }
 0x1ce   : > { %v3052_v9 = vpop.permute.xlu1 %3051  ;;  %v3047_v33 = vpop.permute.xlu0 %3046  ;;  %2096 = vmatpush.msrb.mxu1 %v1743_v21 }
 0x1cf   : > { %v1438_v19 = vsel %vm4390_vm7, 0.0, %v1407_v1  ;;  %v3049_v35 = vunpack.i.h.bf16 %v3047_v33  ;;  %v3048_v26 = vunpack.i.l.bf16 %v3047_v33  ;;  %v3054_v11 = vunpack.i.h.bf16 %v3052_v9 }
 0x1d0   : > { %1458 = vst [vmem:[#allocation3 + $0x1] sm:$0xff] %v1438_v19  ;;  %v1196_v28 = vpop.f32.mrf.mxu0  ;;  %v1273_v0 = vpop.f32.mrf.mxu1  ;;  %v3053_v2 = vunpack.i.l.bf16 %v3052_v9  ;;  %2097 = vmatpush.msrb.mxu1 %v1742_v7  ;;  %v1705_v9 = vld [vmem:[#allocation9 + $0xd8] sm:$0xff] }
 0x1d1   : > { %v1274_v53 = vadd.f32 %v1273_v0, %v1196_v28  ;;  %v996_v58 = vsel %vm977_vm4, %v3078_v40, %v3048_v26  ;;  %v1058_v16 = vsel %vm977_vm4, %v4106_v24, %v3049_v35  ;;  %v1365_v19 = vpop.f32.mrf.mxu2  ;;  %1891 = vmatpush.msrb.mxu3 %v1705_v9 }
 0x1d2   : > { %v1017_v30 = vsel %vm998_vm5, %v996_v58, %v3053_v2  ;;  %v1078_v60 = vsel %vm998_vm5, %v1058_v16, %v3054_v11 }
 0x1d3   : > { %v1351_v17 = vadd.f32 %v4327_v63, %v1274_v53  ;;  %1243 = vmatmul.f32.gmra.mxu0 %v1037_v4  ;;  %1320 = vmatmul.f32.gmra.mxu1 %v1097_v49  ;;  %v1038_v36 = vsel %vm1019_vm6, %v1017_v30, %v3058_v3  ;;  %v1098_v37 = vsel %vm1019_vm6, %v1078_v60, %v3059_v50  ;;  %v1704_v49 = vld [vmem:[#allocation9 + $0xd0] sm:$0xff] }
 0x1d4   : > { %1892 = vmatpush.msrb.mxu3 %v1704_v49 }
 0x1d5   : > { %v1408_v5 = vmax.f32 %v1351_v17, 0.0 }
 0x1d6   : > { %v3062_v14 = vpop.permute.xlu0 %3061  ;;  %v3067_v56 = vpop.permute.xlu1 %3066 }
 0x1d7   : > { %v1439_v24 = vsel %vm4390_vm7, 0.0, %v1408_v5  ;;  %v1478_v59 = vld [vmem:[#allocation3] sm:$0xff]  ;;  %v3064_v63 = vunpack.i.h.bf16 %v3062_v14  ;;  %v3063_v20 = vunpack.i.l.bf16 %v3062_v14  ;;  %v3068_v55 = vunpack.i.l.bf16 %v3067_v56  ;;  %v1703_v5 = vld [vmem:[#allocation9 + $0xc8] sm:$0xff] }
 0x1d8   : > { %1459 = vst [vmem:[#allocation3 + $0x9] sm:$0xff] %v1439_v24  ;;  %v1199_v15 = vpop.f32.mrf.mxu0  ;;  %v1276_v18 = vpop.f32.mrf.mxu1  ;;  %1838 = vmatmul.f32.vlgmr.msra.gmra.mxu3 %v1478_v59  ;;  %v3069_v47 = vunpack.i.h.bf16 %v3067_v56  ;;  %v1532_v43 = vrot.slane %v1478_v59, 1  ;;  %v1588_v61 = vrot.slane %v1478_v59, 2 }
 0x1d9   : > { %v1277_v27 = vadd.f32 %v1276_v18, %v1199_v15  ;;  %v997_v41 = vsel %vm977_vm4, %v3079_v23, %v3063_v20  ;;  %v1059_v10 = vsel %vm977_vm4, %v4135_v57, %v3064_v63  ;;  %1893 = vmatpush.msrb.mxu3 %v1703_v5  ;;  %v1702_v18 = vld [vmem:[#allocation9 + $0xc0] sm:$0xff] }
 0x1da   : > { %v1018_v62 = vsel %vm998_vm5, %v997_v41, %v3068_v55  ;;  %v1079_v25 = vsel %vm998_vm5, %v1059_v10, %v3069_v47 }
 0x1db   : > { %v1354_v32 = vadd.f32 %v4350_v48, %v1277_v27  ;;  %1246 = vmatmul.f32.gmra.mxu0 %v1038_v36  ;;  %1323 = vmatmul.f32.gmra.mxu1 %v1098_v37  ;;  %v1039_v57 = vsel %vm1019_vm6, %v1018_v62, %v3073_v8  ;;  %v1099_v45 = vsel %vm1019_vm6, %v1079_v25, %v3074_v54  ;;  %v1701_v54 = vld [vmem:[#allocation9 + $0xb8] sm:$0xff] }
 0x1dc   : > { %1894 = vmatpush.msrb.mxu3 %v1702_v18 }
 0x1dd   : > { %v1409_v13 = vmax.f32 %v1354_v32, 0.0 }
 0x1de   : > { %1895 = vmatpush.msrb.mxu3 %v1701_v54 }
 0x1df   : > { %1460 = vst [vmem:[#allocation3 + $0x19] sm:$0xff] %v1409_v13  ;;  %v1479_v38 = vld [vmem:[#allocation3 + $0x8] sm:$0xff]  ;;  %v1480_v46 = vld [vmem:[#allocation3 + $0x10] sm:$0x3] }
 0x1e0   : > { %v1202_v1 = vpop.f32.mrf.mxu0  ;;  %v1279_v48 = vpop.f32.mrf.mxu1  ;;  %v1533_v6 = vrot.slane %v1479_v38, 1  ;;  %v1589_v22 = vrot.slane %v1479_v38, 2  ;;  %1841 = vmatmul.f32.gmra.mxu3 %v1479_v38  ;;  %v1535_v44 = vrot.slane %v1480_v46, 1  ;;  %v1591_v4 = vrot.slane %v1480_v46, 2 }
 0x1e1   : > { %v1280_v33 = vadd.f32 %v1279_v48, %v1202_v1 }
 0x1e2   : > { %v1590_v35 = vsel %vm580_vm3, %v1588_v61, %v1589_v22  ;;  %v4426_v26 = vsel %vm469_vm2, %v1532_v43, %v1533_v6  ;;  %v4429_v51 = vsel %vm469_vm2, %v1533_v6, %v1535_v44  ;;  %v1592_v39 = vsel %vm580_vm3, %v1589_v22, %v1591_v4 }
 0x1e3   : > { %v1357_v29 = vadd.f32 %v4372_v52, %v1280_v33  ;;  %1249 = vmatmul.f32.gmra.mxu0 %v1039_v57  ;;  %1968 = vmatmul.f32.vlgmr.msrb.gmra.mxu2 %v1590_v35  ;;  %v1368_v52 = vpop.f32.mrf.mxu2  ;;  %v1700_v57 = vld [vmem:[#allocation9 + $0xb0] sm:$0xff] }
 0x1e4   : > { %1326 = vmatmul.f32.gmra.mxu1 %v1099_v45  ;;  %1896 = vmatpush.msrb.mxu3 %v1700_v57 }
 0x1e5   : > { %v1410_v28 = vmax.f32 %v1357_v29, 0.0 }
 0x1e6   : > { %v1481_v0 = vld [vmem:[#allocation3 + $0x18] sm:$0xff] }
 0x1e7   : > { %1461 = vst [vmem:[#allocation3 + $0x21] sm:$0xff] %v1410_v28  ;;  %v1537_v17 = vrot.slane %v1481_v0, 1  ;;  %v1593_v50 = vrot.slane %v1481_v0, 2 }
 0x1e8   : > { %v1205_v53 = vpop.f32.mrf.mxu0  ;;  %v1282_v11 = vpop.f32.mrf.mxu1  ;;  %1844 = vmatmul.f32.gmra.mxu3 %v1481_v0 }
 0x1e9   : > { %v1283_v2 = vadd.f32 %v1282_v11, %v1205_v53 }
 0x1eb   : > { %v1360_v40 = vadd.f32 %v4396_v12, %v1283_v2  ;;  %1971 = vmatmul.f32.gmra.mxu2 %v1592_v39  ;;  %2033 = vmatmul.f32.vlgmr.msrb.gmra.mxu0 %v1481_v0  ;;  %v1371_v20 = vpop.f32.mrf.mxu2  ;;  %v1699_v39 = vld [vmem:[#allocation9 + $0xa8] sm:$0xff] }
 0x1ec   : > { %1897 = vmatpush.msrb.mxu3 %v1699_v39 }
 0x1ed   : > { %v1411_v58 = vmax.f32 %v1360_v40, 0.0 }
 0x1ee   : > { %v1482_v16 = vld [vmem:[#allocation3 + $0x20] sm:$0xff]  ;;  %v1483_v56 = vld [vmem:[#allocation3 + $0x28] sm:$0x3] }
 0x1ef   : > { %1462 = vst [vmem:[#allocation3 + $0x31] sm:$0xff] %v1411_v58  ;;  %v1538_v21 = vrot.slane %v1482_v16, 1  ;;  %v1594_v3 = vrot.slane %v1482_v16, 2  ;;  %v1540_v63 = vrot.slane %v1483_v56, 1  ;;  %v1596_v15 = vrot.slane %v1483_v56, 2  ;;  %v1698_v56 = vld [vmem:[#allocation9 + $0xa0] sm:$0xff] }
 0x1f0   : > { %v1208_v30 = vpop.f32.mrf.mxu0  ;;  %v1285_v60 = vpop.f32.mrf.mxu1  ;;  %1847 = vmatmul.f32.gmra.mxu3 %v1482_v16 }
 0x1f1   : > { %v1286_v7 = vadd.f32 %v1285_v60, %v1208_v30  ;;  %v4435_v14 = vsel %vm469_vm2, %v1537_v17, %v1538_v21  ;;  %v4438_v12 = vsel %vm580_vm3, %v1593_v50, %v1594_v3  ;;  %v4447_v55 = vsel %vm469_vm2, %v1538_v21, %v1540_v63  ;;  %1898 = vmatpush.msrb.mxu3 %v1698_v56  ;;  %v1695_v56 = vld [vmem:[#allocation9 + $0x88] sm:$0xff] }
 0x1f2   : > { %5256 = vst [vmem:[#allocation20_spill] sm:$0xff] %v4438_v12  ;;  %2098 = vmatmul.f32.vlgmr.msrb.gmra.mxu1 %v4435_v14 }
 0x1f3   : > { %v1363_v24 = vadd.f32 %v4411_v42, %v1286_v7  ;;  %1974 = vmatmul.f32.gmra.mxu2 %v4438_v12  ;;  %2036 = vmatmul.f32.gmra.mxu0 %v1482_v16  ;;  %v4451_v42 = vsel %vm580_vm3, %v1594_v3, %v1596_v15  ;;  %v1374_v13 = vpop.f32.mrf.mxu2  ;;  %v1774_v12 = vld [vmem:[#allocation9 + $0x300] sm:$0xff] }
 0x1f4   : > { %5257 = vst [vmem:[#allocation23_spill] sm:$0xff] %v4451_v42 }
 0x1f5   : > { %v1412_v59 = vmax.f32 %v1363_v24, 0.0 }
 0x1f6   : > { %v4443_v34 = vld [vmem:[#allocation3 + $0x30] sm:$0xff] }
 0x1f7   : > { %1463 = vst [vmem:[#allocation3 + $0x39] sm:$0xff] %v1412_v59  ;;  %v1542_v41 = vrot.slane %v4443_v34, 1  ;;  %v1598_v10 = vrot.slane %v4443_v34, 2 }
 0x1f8   : > { %v1211_v36 = vpop.f32.mrf.mxu0  ;;  %v1288_v37 = vpop.f32.mrf.mxu1  ;;  %1850 = vmatmul.f32.gmra.mxu3 %v4443_v34 }
 0x1f9   : > { %v1289_v27 = vadd.f32 %v1288_v37, %v1211_v36 }
 0x1fa   : > { %2101 = vmatmul.f32.gmra.mxu1 %v4447_v55 }
 0x1fb   : > { %v1366_v31 = vadd.f32 %v1365_v19, %v1289_v27  ;;  %1977 = vmatmul.f32.gmra.mxu2 %v4451_v42  ;;  %2039 = vmatmul.f32.gmra.mxu0 %v4443_v34  ;;  %v1377_v35 = vpop.f32.mrf.mxu2  ;;  %v4638_v42 = vld [vmem:[#allocation9 + $0x440] sm:$0xff] }
 0x1fd   : > { %v1413_v47 = vmax.f32 %v1366_v31, 0.0 }
 0x1fe   : > { %v4455_v23 = vld [vmem:[#allocation3 + $0x38] sm:$0xff]  ;;  %v1486_v46 = vld [vmem:[#allocation3 + $0x40] sm:$0x3] }
 0x1ff   : > { %1464 = vst [vmem:[#allocation3 + $0x49] sm:$0xff] %v1413_v47  ;;  %v1543_v32 = vrot.slane %v4455_v23, 1  ;;  %v1599_v8 = vrot.slane %v4455_v23, 2  ;;  %v1545_v48 = vrot.slane %v1486_v46, 1  ;;  %v1601_v22 = vrot.slane %v1486_v46, 2 }
 0x200   : > { %v1214_v62 = vpop.f32.mrf.mxu0  ;;  %v1291_v43 = vpop.f32.mrf.mxu1  ;;  %1853 = vmatmul.f32.gmra.mxu3 %v4455_v23 }
 0x201   : > { %v1292_v25 = vadd.f32 %v1291_v43, %v1214_v62  ;;  %v4463_v61 = vsel %vm469_vm2, %v1542_v41, %v1543_v32  ;;  %v4466_v38 = vsel %vm580_vm3, %v1598_v10, %v1599_v8  ;;  %v4475_v19 = vsel %vm469_vm2, %v1543_v32, %v1545_v48  ;;  %v1697_v10 = vld [vmem:[#allocation9 + $0x98] sm:$0xff] }
 0x202   : > { %2104 = vmatmul.f32.gmra.mxu1 %v4463_v61  ;;  %v4479_v29 = vsel %vm580_vm3, %v1599_v8, %v1601_v22  ;;  %1899 = vmatpush.msrb.mxu3 %v1697_v10 }
 0x203   : > { %v1369_v9 = vadd.f32 %v1368_v52, %v1292_v25  ;;  %1980 = vmatmul.f32.gmra.mxu2 %v4466_v38  ;;  %2042 = vmatmul.f32.gmra.mxu0 %v4455_v23  ;;  %v1380_v3 = vpop.f32.mrf.mxu2 }
 0x205   : > { %v1414_v1 = vmax.f32 %v1369_v9, 0.0  ;;  %v1789_v9 = vld [vmem:[#allocation9 + $0x378] sm:$0xff] }
 0x206   : > { %v4471_v6 = vld [vmem:[#allocation3 + $0x48] sm:$0xff]  ;;  %2212 = vmatpush.msra.mxu2 %v1789_v9 }
 0x207   : > { %1465 = vst [vmem:[#allocation3 + $0x51] sm:$0xff] %v1414_v1  ;;  %v1547_v49 = vrot.slane %v4471_v6, 1  ;;  %v1603_v11 = vrot.slane %v4471_v6, 2  ;;  %v1781_v9 = vld [vmem:[#allocation9 + $0x338] sm:$0xff] }
 0x208   : > { %v1217_v44 = vpop.f32.mrf.mxu0  ;;  %v1294_v33 = vpop.f32.mrf.mxu1  ;;  %1856 = vmatmul.f32.gmra.mxu3 %v4471_v6 }
 0x209   : > { %v1295_v45 = vadd.f32 %v1294_v33, %v1217_v44  ;;  %v1788_v44 = vld [vmem:[#allocation9 + $0x370] sm:$0xff] }
 0x20a   : > { %2107 = vmatmul.f32.gmra.mxu1 %v4475_v19  ;;  %2213 = vmatpush.msra.mxu2 %v1788_v44  ;;  %v4574_v44 = vld [vmem:[#allocation9 + $0x3d8] sm:$0xff] }
 0x20b   : > { %v1372_v28 = vadd.f32 %v1371_v20, %v1295_v45  ;;  %1983 = vmatmul.f32.gmra.mxu2 %v4479_v29  ;;  %2045 = vmatmul.f32.gmra.mxu0 %v4471_v6  ;;  %v1383_v37 = vpop.f32.mrf.mxu2  ;;  %v1696_v45 = vld [vmem:[#allocation9 + $0x90] sm:$0xff]  ;;  %5258 = vst [vmem:[#allocation21_spill] sm:$0xff] %v4574_v44 }
 0x20c   : > { %1900 = vmatpush.msrb.mxu3 %v1696_v45  ;;  %v1780_v45 = vld [vmem:[#allocation9 + $0x330] sm:$0xff] }
 0x20d   : > { %v1415_v0 = vmax.f32 %v1372_v28, 0.0 }
 0x20e   : > { %v4483_v4 = vld [vmem:[#allocation3 + $0x50] sm:$0xff]  ;;  %v1489_v21 = vld [vmem:[#allocation3 + $0x58] sm:$0x3]  ;;  %1901 = vmatpush.msrb.mxu3 %v1695_v56 }
 0x20f   : > { %1466 = vst [vmem:[#allocation3 + $0x61] sm:$0xff] %v1415_v0  ;;  %v1548_v53 = vrot.slane %v4483_v4, 1  ;;  %v1604_v2 = vrot.slane %v4483_v4, 2  ;;  %v1550_v30 = vrot.slane %v1489_v21, 1  ;;  %v1606_v7 = vrot.slane %v1489_v21, 2  ;;  %v1787_v0 = vld [vmem:[#allocation9 + $0x368] sm:$0xff] }
 0x210   : > { %v1220_v40 = vpop.f32.mrf.mxu0  ;;  %v1297_v52 = vpop.f32.mrf.mxu1  ;;  %1859 = vmatmul.f32.gmra.mxu3 %v4483_v4  ;;  %2214 = vmatpush.msra.mxu2 %v1787_v0  ;;  %v4594_v56 = vld [vmem:[#allocation9 + $0x460] sm:$0xff] }
 0x211   : > { %v1298_v58 = vadd.f32 %v1297_v52, %v1220_v40  ;;  %v4491_v16 = vsel %vm469_vm2, %v1547_v49, %v1548_v53  ;;  %v4494_v17 = vsel %vm580_vm3, %v1603_v11, %v1604_v2  ;;  %v4503_v20 = vsel %vm469_vm2, %v1548_v53, %v1550_v30  ;;  %v1785_v40 = vld [vmem:[#allocation9 + $0x358] sm:$0xff] }
 0x212   : > { %2110 = vmatmul.f32.gmra.mxu1 %v4491_v16  ;;  %v4507_v15 = vsel %vm580_vm3, %v1604_v2, %v1606_v7  ;;  %v1786_v2 = vld [vmem:[#allocation9 + $0x360] sm:$0xff]  ;;  %v4539_v52 = vld [vmem:[#allocation9 + $0x3f8] sm:$0xff] }
 0x213   : > { %v1375_v50 = vadd.f32 %v1374_v13, %v1298_v58  ;;  %1986 = vmatmul.f32.gmra.mxu2 %v4494_v17  ;;  %2048 = vmatmul.f32.gmra.mxu0 %v4483_v4  ;;  %v1386_v33 = vpop.f32.mrf.mxu2 }
 0x214   : > { %2215 = vmatpush.msra.mxu2 %v1786_v2  ;;  %2277 = vmatpush.msra.mxu0 %v4539_v52  ;;  %v4582_v2 = vld [vmem:[#allocation9 + $0x3d0] sm:$0xff] }
 0x215   : > { %v1416_v5 = vmax.f32 %v1375_v50, 0.0  ;;  %v1784_v50 = vld [vmem:[#allocation9 + $0x350] sm:$0xff]  ;;  %5259 = vst [vmem:[#allocation25_spill] sm:$0xff] %v4582_v2 }
 0x216   : > { %v4499_v60 = vld [vmem:[#allocation3 + $0x60] sm:$0xff]  ;;  %2216 = vmatpush.msra.mxu2 %v1785_v40 }
 0x217   : > { %1467 = vst [vmem:[#allocation3 + $0x69] sm:$0xff] %v1416_v5  ;;  %v1552_v31 = vrot.slane %v4499_v60, 1  ;;  %v1608_v41 = vrot.slane %v4499_v60, 2 }
 0x218   : > { %v1223_v24 = vpop.f32.mrf.mxu0  ;;  %v1300_v59 = vpop.f32.mrf.mxu1  ;;  %1862 = vmatmul.f32.gmra.mxu3 %v4499_v60  ;;  %2217 = vmatpush.msra.mxu2 %v1784_v50  ;;  %v1779_v50 = vld [vmem:[#allocation9 + $0x328] sm:$0xff] }
 0x219   : > { %v1301_v63 = vadd.f32 %v1300_v59, %v1223_v24 }
 0x21a   : > { %2113 = vmatmul.f32.gmra.mxu1 %v4503_v20 }
 0x21b   : > { %v1378_v18 = vadd.f32 %v1377_v35, %v1301_v63  ;;  %1989 = vmatmul.f32.gmra.mxu2 %v4507_v15  ;;  %2051 = vmatmul.f32.gmra.mxu0 %v4499_v60  ;;  %v4549_v63 = vld [vmem:[#allocation9 + $0x3f0] sm:$0xff] }
 0x21c   : > { %2278 = vmatpush.msra.mxu0 %v4549_v63 }
 0x21d   : > { %v1417_v36 = vmax.f32 %v1378_v18, 0.0 }
 0x21e   : > { %v4511_v27 = vld [vmem:[#allocation3 + $0x68] sm:$0xff]  ;;  %v1492_v25 = vld [vmem:[#allocation3 + $0x70] sm:$0x3] }
 0x21f   : > { %1468 = vst [vmem:[#allocation3 + $0x79] sm:$0xff] %v1417_v36  ;;  %v1553_v47 = vrot.slane %v4511_v27, 1  ;;  %v1609_v32 = vrot.slane %v4511_v27, 2  ;;  %v1555_v48 = vrot.slane %v1492_v25, 1  ;;  %v1611_v57 = vrot.slane %v1492_v25, 2 }
 0x220   : > { %v1226_v8 = vpop.f32.mrf.mxu0  ;;  %v1303_v13 = vpop.f32.mrf.mxu1  ;;  %1865 = vmatmul.f32.gmra.mxu3 %v4511_v27 }
 0x221   : > { %v1304_v54 = vadd.f32 %v1303_v13, %v1226_v8  ;;  %v4519_v62 = vsel %vm469_vm2, %v1552_v31, %v1553_v47  ;;  %v4522_v43 = vsel %vm580_vm3, %v1608_v41, %v1609_v32  ;;  %v4531_v53 = vsel %vm469_vm2, %v1553_v47, %v1555_v48  ;;  %v1389_v31 = vpop.f32.mrf.mxu2  ;;  %v1783_v47 = vld [vmem:[#allocation9 + $0x348] sm:$0xff]  ;;  %v1782_v8 = vld [vmem:[#allocation9 + $0x340] sm:$0xff] }
 0x222   : > { %2116 = vmatmul.f32.gmra.mxu1 %v4519_v62  ;;  %v4535_v11 = vsel %vm580_vm3, %v1609_v32, %v1611_v57  ;;  %v4557_v41 = vld [vmem:[#allocation9 + $0x3e8] sm:$0xff]  ;;  %v4563_v13 = vld [vmem:[#allocation9 + $0x3e0] sm:$0xff]  ;;  %2218 = vmatpush.msra.mxu2 %v1783_v47 }
 0x223   : > { %v1381_v46 = vadd.f32 %v1380_v3, %v1304_v54  ;;  %1992 = vmatmul.f32.gmra.mxu2 %v4522_v43  ;;  %2054 = vmatmul.f32.gmra.mxu0 %v4511_v27  ;;  %v4565_v54 = vld [vmem:[#allocation9 + $0x478] sm:$0xff] }
 0x224   : > { %2279 = vmatpush.msra.mxu0 %v4557_v41  ;;  %2342 = vmatpush.msra.mxu1 %v4565_v54 }
 0x225   : > { %v1418_v1 = vmax.f32 %v1381_v46, 0.0  ;;  %2219 = vmatpush.msra.mxu2 %v1782_v8 }
 0x226   : > { %v4527_v22 = vld [vmem:[#allocation3 + $0x78] sm:$0xff]  ;;  %2280 = vmatpush.msra.mxu0 %v4563_v13 }
 0x227   : > { %1469 = vst [vmem:[#allocation3 + $0x81] sm:$0xff] %v1418_v1  ;;  %v1557_v3 = vrot.slane %v4527_v22, 1  ;;  %v1613_v30 = vrot.slane %v4527_v22, 2  ;;  %v4569_v1 = vld [vmem:[#allocation9 + $0x470] sm:$0xff]  ;;  %2220 = vmatpush.msra.mxu2 %v1781_v9 }
 0x228   : > { %v1229_v35 = vpop.f32.mrf.mxu0  ;;  %v1306_v28 = vpop.f32.mrf.mxu1  ;;  %1868 = vmatmul.f32.gmra.mxu3 %v4527_v22  ;;  %2343 = vmatpush.msra.mxu1 %v4569_v1 }
 0x229   : > { %v1307_v49 = vadd.f32 %v1306_v28, %v1229_v35  ;;  %2281 = vmatpush.msra.mxu0 %v4574_v44  ;;  %2221 = vmatpush.msra.mxu2 %v1780_v45 }
 0x22a   : > { %2119 = vmatmul.f32.gmra.mxu1 %v4531_v53 }
 0x22b   : > { %v1384_v39 = vadd.f32 %v1383_v37, %v1307_v49  ;;  %1995 = vmatmul.f32.gmra.mxu2 %v4535_v11  ;;  %2057 = vmatmul.f32.gmra.mxu0 %v4527_v22 }
 0x22c   : > { %2282 = vmatpush.msra.mxu0 %v4582_v2  ;;  %2222 = vmatpush.msra.mxu2 %v1779_v50  ;;  %v1772_v50 = vld [vmem:[#allocation9 + $0x2f0] sm:$0xff]  ;;  %v4689_v2 = vld [vmem:[#allocation9 + $0x420] sm:$0xff] }
 0x22d   : > { %v1419_v58 = vmax.f32 %v1384_v39, 0.0  ;;  %v4584_v39 = vld [vmem:[#allocation9 + $0x468] sm:$0xff] }
 0x22e   : > { %v4542_v21 = vld [vmem:[#allocation3 + $0x80] sm:$0xff]  ;;  %v1495_v32 = vld [vmem:[#allocation3 + $0x88] sm:$0x3]  ;;  %2344 = vmatpush.msra.mxu1 %v4584_v39 }
 0x22f   : > { %1470 = vst [vmem:[#allocation3 + $0x91] sm:$0xff] %v1419_v58  ;;  %v1558_v5 = vrot.slane %v4542_v21, 1  ;;  %v1614_v7 = vrot.slane %v4542_v21, 2  ;;  %v1560_v46 = vrot.slane %v1495_v32, 1  ;;  %v1616_v57 = vrot.slane %v1495_v32, 2  ;;  %v1773_v58 = vld [vmem:[#allocation9 + $0x2f8] sm:$0xff] }
 0x230   : > { %v1232_v24 = vpop.f32.mrf.mxu0  ;;  %v1309_v59 = vpop.f32.mrf.mxu1  ;;  %1871 = vmatmul.f32.gmra.mxu3 %v4542_v21  ;;  %2345 = vmatpush.msra.mxu1 %v4594_v56 }
 0x231   : > { %v1310_v18 = vadd.f32 %v1309_v59, %v1232_v24  ;;  %v4552_v36 = vsel %vm469_vm2, %v1557_v3, %v1558_v5  ;;  %v4555_v37 = vsel %vm580_vm3, %v1613_v30, %v1614_v7  ;;  %v4579_v49 = vsel %vm469_vm2, %v1558_v5, %v1560_v46  ;;  %v1392_v5 = vpop.f32.mrf.mxu2  ;;  %v4592_v30 = vld [vmem:[#allocation9 + $0x3c8] sm:$0xff]  ;;  %v1778_v24 = vld [vmem:[#allocation9 + $0x320] sm:$0xff] }
 0x232   : > { %2122 = vmatmul.f32.gmra.mxu1 %v4552_v36  ;;  %v4588_v40 = vsel %vm580_vm3, %v1614_v7, %v1616_v57  ;;  %5260 = vst [vmem:[#allocation22_spill] sm:$0xff] %v4592_v30  ;;  %v4598_v59 = vld [vmem:[#allocation9 + $0x3c0] sm:$0xff]  ;;  %2283 = vmatpush.msra.mxu0 %v4592_v30 }
 0x233   : > { %v1387_v10 = vadd.f32 %v1386_v33, %v1310_v18  ;;  %1998 = vmatmul.f32.gmra.mxu2 %v4555_v37  ;;  %2060 = vmatmul.f32.gmra.mxu0 %v4542_v21  ;;  %v1694_v33 = vld [vmem:[#allocation9 + $0x80] sm:$0xff]  ;;  %5261 = vst [vmem:[#allocation26_spill] sm:$0xff] %v4598_v59 }
 0x234   : > { %1902 = vmatpush.msrb.mxu3 %v1694_v33  ;;  %2223 = vmatpush.msra.mxu2 %v1778_v24  ;;  %v4626_v24 = vld [vmem:[#allocation9 + $0x3b0] sm:$0xff] }
 0x235   : > { %v1420_v25 = vmax.f32 %v1387_v10, 0.0  ;;  %2284 = vmatpush.msra.mxu0 %v4598_v59  ;;  %5263 = vst [vmem:[#allocation27_spill] sm:$0xff] %v4626_v24 }
 0x236   : > { %v4571_v48 = vld [vmem:[#allocation3 + $0x90] sm:$0xff]  ;;  %2147 = vmatpush.msra.mxu3 %v1773_v58  ;;  %v1776_v58 = vld [vmem:[#allocation9 + $0x310] sm:$0xff] }
 0x237   : > { %1471 = vst [vmem:[#allocation3 + $0x99] sm:$0xff] %v1420_v25  ;;  %v1562_v47 = vrot.slane %v4571_v48, 1  ;;  %v1618_v10 = vrot.slane %v4571_v48, 2  ;;  %v1777_v25 = vld [vmem:[#allocation9 + $0x318] sm:$0xff] }
 0x238   : > { %v1235_v35 = vpop.f32.mrf.mxu0  ;;  %v1312_v28 = vpop.f32.mrf.mxu1  ;;  %1874 = vmatmul.f32.gmra.mxu3 %v4571_v48  ;;  %2224 = vmatpush.msra.mxu2 %v1777_v25  ;;  %v4632_v25 = vld [vmem:[#allocation9 + $0x3a8] sm:$0xff] }
 0x239   : > { %v1313_v0 = vadd.f32 %v1312_v28, %v1235_v35  ;;  %v4619_v35 = vld [vmem:[#allocation9 + $0x3b8] sm:$0xff]  ;;  %v4621_v28 = vld [vmem:[#allocation9 + $0x450] sm:$0xff]  ;;  %2148 = vmatpush.msra.mxu3 %v1772_v50  ;;  %5264 = vst [vmem:[#allocation28_spill] sm:$0xff] %v4632_v25 }
 0x23a   : > { %2125 = vmatmul.f32.gmra.mxu1 %v4579_v49  ;;  %5262 = vst [vmem:[#allocation24_spill] sm:$0xff] %v4619_v35  ;;  %2285 = vmatpush.msra.mxu0 %v4619_v35  ;;  %v4640_v35 = vld [vmem:[#allocation9 + $0x3a0] sm:$0xff]  ;;  %v4648_v50 = vld [vmem:[#allocation9 + $0x438] sm:$0xff] }
 0x23b   : > { %v1390_v3 = vadd.f32 %v1389_v31, %v1313_v0  ;;  %2001 = vmatmul.f32.gmra.mxu2 %v4588_v40  ;;  %2063 = vmatmul.f32.gmra.mxu0 %v4571_v48  ;;  %v4604_v31 = vld [vmem:[#allocation9 + $0x458] sm:$0xff]  ;;  %5265 = vst [vmem:[#allocation29_spill] sm:$0xff] %v4640_v35 }
 0x23c   : > { %2346 = vmatpush.msra.mxu1 %v4604_v31  ;;  %2225 = vmatpush.msra.mxu2 %v1776_v58 }
 0x23d   : > { %v1421_v7 = vmax.f32 %v1390_v3, 0.0  ;;  %2286 = vmatpush.msra.mxu0 %v4626_v24  ;;  %v4650_v24 = vld [vmem:[#allocation9 + $0x398] sm:$0xff] }
 0x23e   : > { %v4600_v18 = vld [vmem:[#allocation3 + $0x98] sm:$0xff]  ;;  %v1498_v0 = vld [vmem:[#allocation3 + $0xa0] sm:$0x3]  ;;  %2347 = vmatpush.msra.mxu1 %v4621_v28  ;;  %5266 = vst [vmem:[#allocation30_spill] sm:$0xff] %v4650_v24 }
 0x23f   : > { %1472 = vst [vmem:[#allocation3 + $0xa9] sm:$0xff] %v1421_v7  ;;  %v1563_v32 = vrot.slane %v4600_v18, 1  ;;  %v1619_v8 = vrot.slane %v4600_v18, 2  ;;  %v4628_v7 = vld [vmem:[#allocation9 + $0x448] sm:$0xff]  ;;  %2287 = vmatpush.msra.mxu0 %v4632_v25 }
 0x240   : > { %v1238_v46 = vpop.f32.mrf.mxu0  ;;  %v1315_v9 = vpop.f32.mrf.mxu1  ;;  %1877 = vmatmul.f32.gmra.mxu3 %v4600_v18  ;;  %2348 = vmatpush.msra.mxu1 %v4628_v7 }
 0x241   : > { %v1316_v57 = vadd.f32 %v1315_v9, %v1238_v46  ;;  %v4613_v33 = vsel %vm469_vm2, %v1562_v47, %v1563_v32  ;;  %v4616_v45 = vsel %vm580_vm3, %v1618_v10, %v1619_v8  ;;  %v1775_v47 = vld [vmem:[#allocation9 + $0x308] sm:$0xff]  ;;  %v1395_v46 = vpop.f32.mrf.mxu2  ;;  %v1565_v9 = vrot.slane %v1498_v0, 1  ;;  %2288 = vmatpush.msra.mxu0 %v4640_v35 }
 0x242   : > { %2128 = vmatmul.f32.gmra.mxu1 %v4613_v33  ;;  %2226 = vmatpush.msra.mxu2 %v1775_v47 }
 0x243   : > { %v1393_v3 = vadd.f32 %v1392_v5, %v1316_v57  ;;  %2004 = vmatmul.f32.gmra.mxu2 %v4616_v45  ;;  %2066 = vmatmul.f32.gmra.mxu0 %v4600_v18  ;;  %v1621_v57 = vrot.slane %v1498_v0, 2  ;;  %v4645_v0 = vsel %vm469_vm2, %v1563_v32, %v1565_v9  ;;  %v4665_v9 = vld [vmem:[#allocation9 + $0x428] sm:$0xff] }
 0x244   : > { %2349 = vmatpush.msra.mxu1 %v4638_v42  ;;  %2227 = vmatpush.msra.mxu2 %v1774_v12  ;;  %v4661_v12 = vld [vmem:[#allocation9 + $0x390] sm:$0xff] }
 0x245   : > { %v1422_v10 = vmax.f32 %v1393_v3, 0.0  ;;  %v4654_v47 = vsel %vm580_vm3, %v1619_v8, %v1621_v57  ;;  %5268 = vst [vmem:[#allocation32_spill] sm:$0xff] %v4661_v12  ;;  %2289 = vmatpush.msra.mxu0 %v4650_v24 }
 0x246   : > { %v4634_v5 = vld [vmem:[#allocation3 + $0xa8] sm:$0xff]  ;;  %5267 = vst [vmem:[#allocation31_spill] sm:$0xff] %v4654_v47  ;;  %2350 = vmatpush.msra.mxu1 %v4648_v50  ;;  %2628 = vmatpush.msrb.mxu2 %v4565_v54 }
 0x247   : > { %1473 = vst [vmem:[#allocation3 + $0xb1] sm:$0xff] %v1422_v10  ;;  %v1771_v10 = vld [vmem:[#allocation9 + $0x2e8] sm:$0xff]  ;;  %2290 = vmatpush.msra.mxu0 %v4661_v12  ;;  %v1770_v12 = vld [vmem:[#allocation9 + $0x2e0] sm:$0xff] }
 0x248   : > { %v1241_v3 = vpop.f32.mrf.mxu0  ;;  %v1318_v59 = vpop.f32.mrf.mxu1  ;;  %1880 = vmatmul.f32.gmra.mxu3 %v4634_v5  ;;  %2629 = vmatpush.msrb.mxu2 %v4569_v1  ;;  %v4691_v1 = vld [vmem:[#allocation9 + $0x380] sm:$0xff] }
 0x249   : > { %v1319_v58 = vadd.f32 %v1318_v59, %v1241_v3  ;;  %v4659_v59 = vld [vmem:[#allocation9 + $0x430] sm:$0xff]  ;;  %2149 = vmatpush.msra.mxu3 %v1771_v10  ;;  %v1398_v57 = vpop.f32.mrf.mxu2  ;;  %v1567_v3 = vrot.slane %v4634_v5, 1  ;;  %5272 = vst [vmem:[#allocation36_spill] sm:$0xff] %v4691_v1 }
 0x24a   : > { %2131 = vmatmul.f32.gmra.mxu1 %v4645_v0  ;;  %2630 = vmatpush.msrb.mxu2 %v4584_v39 }
 0x24b   : > { %v1396_v25 = vadd.f32 %v1395_v46, %v1319_v58  ;;  %2007 = vmatmul.f32.gmra.mxu2 %v4654_v47  ;;  %2069 = vmatmul.f32.gmra.mxu0 %v4634_v5  ;;  %v4672_v46 = vld [vmem:[#allocation9 + $0x388] sm:$0xff]  ;;  %v1623_v58 = vrot.slane %v4634_v5, 2 }
 0x24c   : > { %2351 = vmatpush.msra.mxu1 %v4659_v59  ;;  %5269 = vst [vmem:[#allocation33_spill] sm:$0xff] %v4672_v46  ;;  %2291 = vmatpush.msra.mxu0 %v4672_v46 }
 0x24d   : > { %v1423_v32 = vmax.f32 %v1396_v25, 0.0  ;;  %2150 = vmatpush.msra.mxu3 %v1770_v12  ;;  %2631 = vmatpush.msrb.mxu2 %v4594_v56 }
 0x24e   : > { %v4668_v8 = vld [vmem:[#allocation3 + $0xb0] sm:$0xff]  ;;  %2352 = vmatpush.msra.mxu1 %v4665_v9  ;;  %v1501_v44 = vld [vmem:[#allocation3 + $0xb8] sm:$0x3]  ;;  %2292 = vmatpush.msra.mxu0 %v4691_v1 }
 0x24f   : > { %1474 = vst [vmem:[#allocation3 + $0xc1] sm:$0xff] %v1423_v32  ;;  %v1568_v25 = vrot.slane %v4668_v8, 1  ;;  %v1624_v10 = vrot.slane %v4668_v8, 2  ;;  %v1626_v12 = vrot.slane %v1501_v44, 2  ;;  %2632 = vmatpush.msrb.mxu2 %v4604_v31 }
 0x250   : > { %v1244_v54 = vpop.f32.mrf.mxu0  ;;  %v1321_v24 = vpop.f32.mrf.mxu1  ;;  %1883 = vmatmul.f32.gmra.mxu3 %v4668_v8  ;;  %2353 = vmatpush.msra.mxu1 %v4689_v2 }
 0x251   : > { %v1322_v35 = vadd.f32 %v1321_v24, %v1244_v54  ;;  %v4682_v32 = vsel %vm469_vm2, %v1567_v3, %v1568_v25  ;;  %v4685_v30 = vsel %vm580_vm3, %v1623_v58, %v1624_v10  ;;  %v4696_v24 = vld [vmem:[#allocation9 + $0x418] sm:$0xff]  ;;  %v1570_v58 = vrot.slane %v1501_v44, 1  ;;  %v4702_v54 = vld [vmem:[#allocation9 + $0x410] sm:$0xff]  ;;  %v1401_v46 = vpop.f32.mrf.mxu2  ;;  %2633 = vmatpush.msrb.mxu2 %v4621_v28 }
 0x252   : > { %5270 = vst [vmem:[#allocation34_spill] sm:$0xff] %v4682_v32  ;;  %2134 = vmatmul.f32.gmra.mxu1 %v4682_v32  ;;  %v1432_v44 = vstv %s1431_s8  ;;  %v1807_v32 = vld [vmem:[#allocation9 + $0x408] sm:$0xff] }
 0x253   : > { %5271 = vst [vmem:[#allocation35_spill] sm:$0xff] %v4685_v30  ;;  %v1399_v47 = vadd.f32 %v1398_v57, %v1322_v35  ;;  %2010 = vmatmul.f32.gmra.mxu2 %v4685_v30  ;;  %2072 = vmatmul.f32.gmra.mxu0 %v4668_v8  ;;  %v4712_v30 = vsel %vm469_vm2, %v1568_v25, %v1570_v58  ;;  %v1806_v25 = vld [vmem:[#allocation9 + $0x400] sm:$0xff]  ;;  %vm4723_vm8 = vcmp.eq.s32.totalorder %v1432_v44, 1 }
 0x254   : > { %2354 = vmatpush.msra.mxu1 %v4696_v24  ;;  %2634 = vmatpush.msrb.mxu2 %v4628_v7 }
 0x255   : > { %v1424_v3 = vmax.f32 %v1399_v47, 0.0  ;;  %v1769_v47 = vld [vmem:[#allocation9 + $0x2d8] sm:$0xff] }
 0x256   : > { %v4708_v57 = vld [vmem:[#allocation3 + $0xc0] sm:$0xff]  ;;  %2355 = vmatpush.msra.mxu1 %v4702_v54  ;;  %2151 = vmatpush.msra.mxu3 %v1769_v47 }
 0x257   : > { %1475 = vst [vmem:[#allocation3 + $0xc9] sm:$0xff] %v1424_v3  ;;  %v1647_v58 = vrot.slane %v4708_v57, 1  ;;  %v1768_v47 = vld [vmem:[#allocation9 + $0x2d0] sm:$0xff]  ;;  %2635 = vmatpush.msrb.mxu2 %v4638_v42 }
 0x258   : > { %v1247_v35 = vpop.f32.mrf.mxu0  ;;  %1903 = vmatmul.f32.vlgmr.msrb.gmra.mxu3 %v4426_v26  ;;  %v1324_v1 = vpop.f32.mrf.mxu1  ;;  %v4717_v26 = vsel %vm580_vm3, %v1624_v10, %v1626_v12  ;;  %2356 = vmatpush.msra.mxu1 %v1807_v32 }
 0x259   : > { %v1325_v39 = vadd.f32 %v1324_v1, %v1247_v35  ;;  %2152 = vmatpush.msra.mxu3 %v1768_v47  ;;  %2636 = vmatpush.msrb.mxu2 %v4648_v50  ;;  %v1767_v47 = vld [vmem:[#allocation9 + $0x2c8] sm:$0xff]  ;;  %v1758_v1 = vld [vmem:[#allocation9 + $0x280] sm:$0xff] }
 0x25a   : > { %2137 = vmatmul.f32.gmra.mxu1 %v4712_v30 }
 0x25b   : > { %v4719_v56 = vpop.f32.mrf.mxu3  ;;  %2013 = vmatmul.f32.gmra.mxu2 %v4717_v26  ;;  %2075 = vmatmul.f32.gmra.mxu0 %v4708_v57  ;;  %v1402_v3 = vadd.f32 %v1401_v46, %v1325_v39 }
 0x25c   : > { %2357 = vmatpush.msra.mxu1 %v1806_v25  ;;  %2637 = vmatpush.msrb.mxu2 %v4659_v59 }
 0x25d   : > { %v1425_v31 = vmax.f32 %v1402_v3, 0.0  ;;  %v1404_v3 = vpop.f32.mrf.mxu2  ;;  %2153 = vmatpush.msra.mxu3 %v1767_v47 }
 0x25e   : > { %v4729_v10 = vld [vmem:[#allocation3 + $0xc8] sm:$0xff]  ;;  %v4736_v35 = vld [vmem:[#allocation3 + $0xd0] sm:$0x3]  ;;  %2638 = vmatpush.msrb.mxu2 %v4665_v9 }
 0x25f   : > { %v1456_v12 = vsel %vm4723_vm8, 0.0, %v1425_v31  ;;  %v1648_v46 = vrot.slane %v4729_v10, 1 }
 0x260   : > { %1476 = vst [vmem:[#allocation3 + $0xd9] sm:$0xff] %v1456_v12  ;;  %1906 = vmatmul.f32.gmra.mxu3 %v4429_v51  ;;  %v1250_v28 = vpop.f32.mrf.mxu0  ;;  %v1650_v51 = vrot.slane %v4736_v35, 1  ;;  %2639 = vmatpush.msrb.mxu2 %v4689_v2 }
 0x261   : > { %v4740_v39 = vsel %vm469_vm2, %v1647_v58, %v1648_v46  ;;  %v1327_v44 = vpop.f32.mrf.mxu1 }
 0x262   : > { %2140 = vmatmul.f32.gmra.mxu1 %v4740_v39  ;;  %v1328_v7 = vadd.f32 %v1327_v44, %v1250_v28  ;;  %v4752_v12 = vsel %vm469_vm2, %v1648_v46, %v1650_v51  ;;  %2640 = vmatpush.msrb.mxu2 %v4696_v24  ;;  %v5281_v51 = vld [vmem:[#allocation25_spill] sm:$0xff] }
 0x263   : > { %v4744_v31 = vpop.f32.mrf.mxu3  ;;  %2078 = vmatmul.f32.gmra.mxu0 %v4729_v10  ;;  %2228 = vmatmul.f32.vlgmr.msra.gmra.mxu2 %v4443_v34 }
 0x264   : > { %v1405_v42 = vadd.f32 %v1404_v3, %v1328_v7  ;;  %2641 = vmatpush.msrb.mxu2 %v4702_v54  ;;  %v1759_v54 = vld [vmem:[#allocation9 + $0x288] sm:$0xff] }
 0x266   : > { %v1426_v58 = vmax.f32 %v1405_v42, 0.0  ;;  %2642 = vmatpush.msrb.mxu2 %v1807_v32 }
 0x268   : > { %v1457_v50 = vsel %vm4723_vm8, 0.0, %v1426_v58  ;;  %1909 = vmatmul.f32.gmra.mxu3 %v4435_v14  ;;  %v1766_v14 = vld [vmem:[#allocation9 + $0x2c0] sm:$0xff]  ;;  %2643 = vmatpush.msrb.mxu2 %v1806_v25  ;;  %v4805_v32 = vpop.f32.mrf.mxu0  ;;  %v5283_v58 = vld [vmem:[#allocation35_spill] sm:$0xff] }
 0x269   : > { %1477 = vst [vmem:[#allocation3 + $0xe1] sm:$0xff] %v1457_v50  ;;  %2154 = vmatpush.msra.mxu3 %v1766_v14  ;;  %v5285_v14 = vld [vmem:[#allocation26_spill] sm:$0xff] }
 0x26a   : > { %2143 = vmatmul.f32.gmra.mxu1 %v4752_v12 }
 0x26b   : > { %v4760_v34 = vpop.f32.mrf.mxu3  ;;  %2231 = vmatmul.f32.gmra.mxu2 %v4455_v23  ;;  %2293 = vmatmul.f32.vlgmr.msra.gmra.mxu0 %v4463_v61  ;;  %v1765_v23 = vld [vmem:[#allocation9 + $0x2b8] sm:$0xff] }
 0x26c   : > { %2155 = vmatpush.msra.mxu3 %v1765_v23 }
 0x26f   : > { %v4813_v24 = vpop.f32.mrf.mxu1 }
 0x270   : > { %1912 = vmatmul.f32.gmra.mxu3 %v4447_v55  ;;  %v1764_v55 = vld [vmem:[#allocation9 + $0x2b0] sm:$0xff]  ;;  %v4818_v25 = vpop.f32.mrf.mxu0 }
 0x271   : > { %2156 = vmatpush.msra.mxu3 %v1764_v55  ;;  %v4851_v7 = vld [vmem:[#allocation3 + $0xe0] sm:$0xff]  ;;  %v5286_v55 = vld [vmem:[#allocation24_spill] sm:$0xff] }
 0x272   : > { %2358 = vmatmul.f32.vlgmr.msra.gmra.mxu1 %v4466_v38 }
 0x273   : > { %v4767_v2 = vpop.f32.mrf.mxu3  ;;  %2234 = vmatmul.f32.gmra.mxu2 %v4471_v6  ;;  %2296 = vmatmul.f32.gmra.mxu0 %v4475_v19 }
 0x278   : > { %1915 = vmatmul.f32.gmra.mxu3 %v4463_v61  ;;  %v1763_v61 = vld [vmem:[#allocation9 + $0x2a8] sm:$0xff] }
 0x279   : > { %2157 = vmatpush.msra.mxu3 %v1763_v61 }
 0x27a   : > { %2361 = vmatmul.f32.gmra.mxu1 %v4479_v29 }
 0x27b   : > { %v4773_v59 = vpop.f32.mrf.mxu3  ;;  %2237 = vmatmul.f32.gmra.mxu2 %v4483_v4  ;;  %2299 = vmatmul.f32.gmra.mxu0 %v4491_v16 }
 0x280   : > { %1918 = vmatmul.f32.gmra.mxu3 %v4475_v19  ;;  %v1762_v19 = vld [vmem:[#allocation9 + $0x2a0] sm:$0xff] }
 0x281   : > { %2158 = vmatpush.msra.mxu3 %v1762_v19 }
 0x282   : > { %2364 = vmatmul.f32.gmra.mxu1 %v4494_v17 }
 0x283   : > { %v4779_v6 = vpop.f32.mrf.mxu3  ;;  %2240 = vmatmul.f32.gmra.mxu2 %v4499_v60  ;;  %2302 = vmatmul.f32.gmra.mxu0 %v4503_v20  ;;  %v4791_v60 = vpop.f32.mrf.mxu2 }
 0x288   : > { %1921 = vmatmul.f32.gmra.mxu3 %v4491_v16  ;;  %v1761_v16 = vld [vmem:[#allocation9 + $0x298] sm:$0xff] }
 0x289   : > { %2159 = vmatpush.msra.mxu3 %v1761_v16  ;;  %v5289_v16 = vld [vmem:[#allocation28_spill] sm:$0xff] }
 0x28a   : > { %2367 = vmatmul.f32.gmra.mxu1 %v4507_v15 }
 0x28b   : > { %v4785_v4 = vpop.f32.mrf.mxu3  ;;  %2243 = vmatmul.f32.gmra.mxu2 %v4511_v27  ;;  %2305 = vmatmul.f32.gmra.mxu0 %v4519_v62 }
 0x290   : > { %1924 = vmatmul.f32.gmra.mxu3 %v4503_v20  ;;  %v4803_v20 = vpop.f32.mrf.mxu2 }
 0x292   : > { %2370 = vmatmul.f32.gmra.mxu1 %v4522_v43 }
 0x293   : > { %v4793_v9 = vpop.f32.mrf.mxu3  ;;  %2246 = vmatmul.f32.gmra.mxu2 %v4527_v22  ;;  %2308 = vmatmul.f32.gmra.mxu0 %v4531_v53  ;;  %v1760_v22 = vld [vmem:[#allocation9 + $0x290] sm:$0xff] }
 0x294   : > { %2160 = vmatpush.msra.mxu3 %v1760_v22 }
 0x296   : > { %2161 = vmatpush.msra.mxu3 %v1759_v54  ;;  %v1654_v54 = vrot.slane %v4708_v57, 2 }
 0x298   : > { %1927 = vmatmul.f32.gmra.mxu3 %v4519_v62 }
 0x299   : > { %2162 = vmatpush.msra.mxu3 %v1758_v1  ;;  %v1655_v1 = vrot.slane %v4729_v10, 2 }
 0x29a   : > { %2373 = vmatmul.f32.gmra.mxu1 %v4535_v11 }
 0x29b   : > { %v4799_v27 = vpop.f32.mrf.mxu3  ;;  %2249 = vmatmul.f32.gmra.mxu2 %v4542_v21  ;;  %2311 = vmatmul.f32.gmra.mxu0 %v4552_v36  ;;  %v4815_v21 = vpop.f32.mrf.mxu2 }
 0x29c   : > { %2612 = vmatpush.msrb.mxu3 %v4539_v52 }
 0x29e   : > { %2613 = vmatpush.msrb.mxu3 %v4549_v63  ;;  %v4853_v63 = vld [vmem:[#allocation3 + $0xe8] sm:$0x3] }
 0x2a0   : > { %1930 = vmatmul.f32.gmra.mxu3 %v4531_v53 }
 0x2a1   : > { %2614 = vmatpush.msrb.mxu3 %v4557_v41  ;;  %v1665_v41 = vrot.slane %v4851_v7, 1 }
 0x2a2   : > { %2376 = vmatmul.f32.gmra.mxu1 %v4555_v37 }
 0x2a3   : > { %v4809_v62 = vpop.f32.mrf.mxu3  ;;  %2252 = vmatmul.f32.gmra.mxu2 %v4571_v48  ;;  %2314 = vmatmul.f32.gmra.mxu0 %v4579_v49  ;;  %v4825_v48 = vpop.f32.mrf.mxu1 }
 0x2a4   : > { %v4828_v46 = vpop.f32.mrf.mxu2  ;;  %2615 = vmatpush.msrb.mxu3 %v4563_v13  ;;  %v1667_v13 = vrot.slane %v4853_v63, 1 }
 0x2a6   : > { %v4862_v42 = vsel %vm469_vm2, %v1665_v41, %v1667_v13  ;;  %v1505_v13 = vld [vmem:[#allocation3 + $0xd8] sm:$0xff] }
 0x2a8   : > { %1933 = vmatmul.f32.gmra.mxu3 %v4552_v36  ;;  %v4832_v36 = vpop.f32.mrf.mxu0 }
 0x2aa   : > { %2379 = vmatmul.f32.gmra.mxu1 %v4588_v40 }
 0x2ab   : > { %v4821_v53 = vpop.f32.mrf.mxu3  ;;  %2255 = vmatmul.f32.gmra.mxu2 %v4600_v18  ;;  %2317 = vmatmul.f32.gmra.mxu0 %v4613_v33  ;;  %v5277_v18 = vld [vmem:[#allocation31_spill] sm:$0xff] }
 0x2ac   : > { %5275 = vst [vmem:[#allocation37_spill] sm:$0xff] %v4821_v53  ;;  %v4845_v52 = vpop.f32.mrf.mxu2 }
 0x2b0   : > { %1936 = vmatmul.f32.gmra.mxu3 %v4579_v49  ;;  %v4841_v49 = vpop.f32.mrf.mxu1  ;;  %v4858_v3 = vpop.f32.mrf.mxu0 }
 0x2b2   : > { %2382 = vmatmul.f32.gmra.mxu1 %v4616_v45 }
 0x2b3   : > { %v4834_v28 = vpop.f32.mrf.mxu3  ;;  %2258 = vmatmul.f32.gmra.mxu2 %v4634_v5  ;;  %2320 = vmatmul.f32.gmra.mxu0 %v4645_v0  ;;  %v5279_v5 = vld [vmem:[#allocation34_spill] sm:$0xff] }
 0x2b4   : > { %5276 = vst [vmem:[#allocation38_spill] sm:$0xff] %v4834_v28  ;;  %v4874_v23 = vpop.f32.mrf.mxu2 }
 0x2b8   : > { %1939 = vmatmul.f32.gmra.mxu3 %v4613_v33  ;;  %v5280_v33 = vld [vmem:[#allocation21_spill] sm:$0xff]  ;;  %v4867_v50 = vpop.f32.mrf.mxu1  ;;  %v4877_v61 = vpop.f32.mrf.mxu0 }
 0x2b9   : > { %2616 = vmatpush.msrb.mxu3 %v5280_v33  ;;  %v5290_v33 = vld [vmem:[#allocation29_spill] sm:$0xff] }
 0x2ba   : > { %2385 = vmatmul.f32.gmra.mxu1 %v5277_v18 }
 0x2bb   : > { %v4847_v44 = vpop.f32.mrf.mxu3  ;;  %2261 = vmatmul.f32.gmra.mxu2 %v4668_v8  ;;  %2323 = vmatmul.f32.gmra.mxu0 %v5279_v5  ;;  %v5282_v8 = vld [vmem:[#allocation22_spill] sm:$0xff] }
 0x2bc   : > { %5278 = vst [vmem:[#allocation31_spill] sm:$0xff] %v4847_v44  ;;  %2617 = vmatpush.msrb.mxu3 %v5281_v51 }
 0x2be   : > { %2618 = vmatpush.msrb.mxu3 %v5282_v8  ;;  %v4898_v8 = vsel %vm580_vm3, %v1654_v54, %v1655_v1 }
 0x2c0   : > { %1942 = vmatmul.f32.gmra.mxu3 %v4645_v0  ;;  %v5287_v0 = vld [vmem:[#allocation27_spill] sm:$0xff]  ;;  %v4887_v22 = vpop.f32.mrf.mxu1  ;;  %v4895_v51 = vpop.f32.mrf.mxu0 }
 0x2c1   : > { %2619 = vmatpush.msrb.mxu3 %v5285_v14 }
 0x2c2   : > { %2388 = vmatmul.f32.gmra.mxu1 %v5283_v58 }
 0x2c3   : > { %v4869_v47 = vpop.f32.mrf.mxu3  ;;  %2264 = vmatmul.f32.gmra.mxu2 %v4708_v57  ;;  %2326 = vmatmul.f32.gmra.mxu0 %v4712_v30  ;;  %v1664_v57 = vrot.slane %v1505_v13, 1 }
 0x2c4   : > { %5284 = vst [vmem:[#allocation34_spill] sm:$0xff] %v4869_v47  ;;  %2620 = vmatpush.msrb.mxu3 %v5286_v55  ;;  %v5294_v55 = vld [vmem:[#allocation33_spill] sm:$0xff] }
 0x2c5   : > { %v1666_v54 = vsel %vm469_vm2, %v1664_v57, %v1665_v41  ;;  %v1674_v41 = vrot.slane %v4853_v63, 2  ;;  %v5297_v57 = vld [vmem:[#allocation23_spill] sm:$0xff] }
 0x2c6   : > { %2621 = vmatpush.msrb.mxu3 %v5287_v0 }
 0x2c8   : > { %1945 = vmatmul.f32.gmra.mxu3 %v5279_v5  ;;  %v4892_v5 = vpop.f32.mrf.mxu2  ;;  %v4908_v0 = vpop.f32.mrf.mxu1 }
 0x2c9   : > { %2622 = vmatpush.msrb.mxu3 %v5289_v16  ;;  %v5295_v16 = vld [vmem:[#allocation20_spill] sm:$0xff] }
 0x2ca   : > { %2391 = vmatmul.f32.gmra.mxu1 %v4717_v26 }
 0x2cb   : > { %v4882_v19 = vpop.f32.mrf.mxu3  ;;  %2267 = vmatmul.f32.gmra.mxu2 %v4729_v10  ;;  %2329 = vmatmul.f32.gmra.mxu0 %v4740_v39  ;;  %v5291_v39 = vld [vmem:[#allocation30_spill] sm:$0xff]  ;;  %v5293_v10 = vld [vmem:[#allocation32_spill] sm:$0xff] }
 0x2cc   : > { %5288 = vst [vmem:[#allocation21_spill] sm:$0xff] %v4882_v19  ;;  %2623 = vmatpush.msrb.mxu3 %v5290_v33 }
 0x2ce   : > { %2624 = vmatpush.msrb.mxu3 %v5291_v39 }
 0x2d0   : > { %1948 = vmatmul.f32.gmra.mxu3 %v4712_v30  ;;  %v1657_v30 = vrot.slane %v4736_v35, 2  ;;  %v4912_v33 = vpop.f32.mrf.mxu2 }
 0x2d1   : > { %2625 = vmatpush.msrb.mxu3 %v5293_v10  ;;  %v1671_v10 = vrot.slane %v1505_v13, 2 }
 0x2d2   : > { %2394 = vmatmul.f32.gmra.mxu1 %v4898_v8  ;;  %v4915_v39 = vsel %vm580_vm3, %v1655_v1, %v1657_v30  ;;  %v4927_v1 = vpop.f32.mrf.mxu1 }
 0x2d3   : > { %v4902_v14 = vpop.f32.mrf.mxu3  ;;  %2270 = vmatmul.f32.gmra.mxu2 %v1505_v13  ;;  %2332 = vmatmul.f32.gmra.mxu0 %v4752_v12  ;;  %v4919_v12 = vpop.f32.mrf.mxu0 }
 0x2d4   : > { %5292 = vst [vmem:[#allocation25_spill] sm:$0xff] %v4902_v14  ;;  %2626 = vmatpush.msrb.mxu3 %v5294_v55  ;;  %v5296_v14 = vld [vmem:[#allocation36_spill] sm:$0xff]  ;;  %v1672_v55 = vrot.slane %v4851_v7, 2 }
 0x2d6   : > { %2627 = vmatpush.msrb.mxu3 %v5296_v14  ;;  %v1673_v14 = vsel %vm580_vm3, %v1671_v10, %v1672_v55  ;;  %v1675_v30 = vsel %vm580_vm3, %v1672_v55, %v1674_v41 }
 0x2d8   : > { %2163 = vmatmul.f32.vlgmr.msra.gmra.mxu3 %v5295_v16  ;;  %v4931_v16 = vpop.f32.mrf.mxu2 }
 0x2da   : > { %2397 = vmatmul.f32.gmra.mxu1 %v4915_v39 }
 0x2db   : > { %v4921_v35 = vpop.f32.mrf.mxu3  ;;  %2273 = vmatmul.f32.gmra.mxu2 %v4851_v7  ;;  %2335 = vmatmul.f32.gmra.mxu0 %v1666_v54  ;;  %v4936_v13 = vpop.f32.mrf.mxu0 }
 0x2dc   : > { %v4938_v7 = vpop.f32.mrf.mxu1 }
 0x2e0   : > { %2166 = vmatmul.f32.gmra.mxu3 %v5297_v57  ;;  %v4949_v41 = vpop.f32.mrf.mxu2 }
 0x2e1   : > { %5300 = vst [vmem:[#allocation26_spill] sm:$0xff] %v4949_v41 }
 0x2e2   : > { %2400 = vmatmul.f32.gmra.mxu1 %v1673_v14 }
 0x2e3   : > { %v4933_v19 = vpop.f32.mrf.mxu3  ;;  %2403 = vmatmul.f32.vlgmr.msrb.gmra.mxu2 %v1675_v30  ;;  %v4945_v10 = vpop.f32.mrf.mxu0 }
 0x2e4   : > { %5298 = vst [vmem:[#allocation22_spill] sm:$0xff] %v4945_v10  ;;  %v4947_v55 = vpop.f32.mrf.mxu1 }
 0x2e5   : > { %5299 = vst [vmem:[#allocation35_spill] sm:$0xff] %v4947_v55 }
 0x2e8   : > { %2169 = vmatmul.f32.gmra.mxu3 %v4466_v38  ;;  %v4959_v30 = vpop.f32.mrf.mxu2 }
 0x2e9   : > { %5303 = vst [vmem:[#allocation28_spill] sm:$0xff] %v4959_v30 }
 0x2eb   : > { %v4940_v63 = vpop.f32.mrf.mxu3  ;;  %v4954_v38 = vpop.f32.mrf.mxu0 }
 0x2ec   : > { %5301 = vst [vmem:[#allocation24_spill] sm:$0xff] %v4954_v38  ;;  %v4956_v14 = vpop.f32.mrf.mxu1 }
 0x2ed   : > { %5302 = vst [vmem:[#allocation27_spill] sm:$0xff] %v4956_v14 }
 0x2f0   : > { %2172 = vmatmul.f32.gmra.mxu3 %v4479_v29  ;;  %v4968_v28 = vpop.f32.mrf.mxu2 }
 0x2f1   : > { %5306 = vst [vmem:[#allocation32_spill] sm:$0xff] %v4968_v28 }
 0x2f3   : > { %v4943_v54 = vpop.f32.mrf.mxu3  ;;  %v4963_v47 = vpop.f32.mrf.mxu0 }
 0x2f4   : > { %5304 = vst [vmem:[#allocation29_spill] sm:$0xff] %v4963_v47  ;;  %v4966_v44 = vpop.f32.mrf.mxu1 }
 0x2f5   : > { %5305 = vst [vmem:[#allocation30_spill] sm:$0xff] %v4966_v44 }
 0x2f8   : > { %2175 = vmatmul.f32.gmra.mxu3 %v4494_v17  ;;  %v4979_v30 = vpop.f32.mrf.mxu2 }
 0x2f9   : > { %5309 = vst [vmem:[#allocation36_spill] sm:$0xff] %v4979_v30 }
 0x2fb   : > { %v4952_v57 = vpop.f32.mrf.mxu3  ;;  %v4973_v38 = vpop.f32.mrf.mxu0 }
 0x2fc   : > { %5307 = vst [vmem:[#allocation33_spill] sm:$0xff] %v4973_v38  ;;  %v4975_v14 = vpop.f32.mrf.mxu1 }
 0x2fd   : > { %5308 = vst [vmem:[#allocation20_spill] sm:$0xff] %v4975_v14 }
 0x300   : > { %2178 = vmatmul.f32.gmra.mxu3 %v4507_v15  ;;  %v4988_v28 = vpop.f32.mrf.mxu2 }
 0x301   : > { %5312 = vst [vmem:[#allocation40_spill] sm:$0xff] %v4988_v28 }
 0x303   : > { %v4961_v29 = vpop.f32.mrf.mxu3 }
 0x304   : > { %v4986_v44 = vpop.f32.mrf.mxu1 }
 0x305   : > { %5311 = vst [vmem:[#allocation39_spill] sm:$0xff] %v4986_v44 }
 0x308   : > { %2181 = vmatmul.f32.gmra.mxu3 %v4522_v43  ;;  %v4984_v43 = vpop.f32.mrf.mxu0  ;;  %v4998_v30 = vpop.f32.mrf.mxu2 }
 0x309   : > { %5310 = vst [vmem:[#allocation23_spill] sm:$0xff] %v4984_v43 }
 0x30a   : > { %5315 = vst [vmem:[#allocation43_spill] sm:$0xff] %v4998_v30 }
 0x30b   : > { %v4970_v17 = vpop.f32.mrf.mxu3 }
 0x30c   : > { %v4995_v14 = vpop.f32.mrf.mxu1 }
 0x30d   : > { %5314 = vst [vmem:[#allocation42_spill] sm:$0xff] %v4995_v14 }
 0x310   : > { %2184 = vmatmul.f32.gmra.mxu3 %v4535_v11  ;;  %v4993_v38 = vpop.f32.mrf.mxu0  ;;  %v5007_v28 = vpop.f32.mrf.mxu2 }
 0x311   : > { %5313 = vst [vmem:[#allocation41_spill] sm:$0xff] %v4993_v38 }
 0x312   : > { %5319 = vst [vmem:[#allocation47_spill] sm:$0xff] %v5007_v28 }
 0x313   : > { %v4977_v15 = vpop.f32.mrf.mxu3 }
 0x314   : > { %v5005_v44 = vpop.f32.mrf.mxu1 }
 0x315   : > { %5318 = vst [vmem:[#allocation46_spill] sm:$0xff] %v5005_v44 }
 0x318   : > { %2187 = vmatmul.f32.gmra.mxu3 %v4555_v37  ;;  %v5002_v53 = vpop.f32.mrf.mxu0  ;;  %v2229_v30 = vpop.f32.mrf.mxu2 }
 0x319   : > { %5317 = vst [vmem:[#allocation45_spill] sm:$0xff] %v5002_v53 }
 0x31b   : > { %v4982_v47 = vpop.f32.mrf.mxu3 }
 0x31c   : > { %v5014_v14 = vpop.f32.mrf.mxu1 }
 0x31d   : > { %5322 = vst [vmem:[#allocation50_spill] sm:$0xff] %v5014_v14 }
 0x320   : > { %2190 = vmatmul.f32.gmra.mxu3 %v4588_v40  ;;  %v5012_v38 = vpop.f32.mrf.mxu0  ;;  %v2232_v44 = vpop.f32.mrf.mxu2 }
 0x321   : > { %5321 = vst [vmem:[#allocation49_spill] sm:$0xff] %v5012_v38 }
 0x323   : > { %v4991_v11 = vpop.f32.mrf.mxu3 }
 0x324   : > { %v2359_v43 = vpop.f32.mrf.mxu1 }
 0x328   : > { %2193 = vmatmul.f32.gmra.mxu3 %v4616_v45  ;;  %v2235_v14 = vpop.f32.mrf.mxu2 }
 0x32b   : > { %v5000_v37 = vpop.f32.mrf.mxu3 }
 0x32c   : > { %5316 = vst [vmem:[#allocation44_spill] sm:$0xff] %v5000_v37 }
 0x330   : > { %2196 = vmatmul.f32.gmra.mxu3 %v5277_v18  ;;  %v2294_v18 = vpop.f32.mrf.mxu0  ;;  %v2238_v55 = vpop.f32.mrf.mxu2 }
 0x333   : > { %v5009_v40 = vpop.f32.mrf.mxu3 }
 0x334   : > { %5320 = vst [vmem:[#allocation48_spill] sm:$0xff] %v5009_v40  ;;  %v2362_v40 = vpop.f32.mrf.mxu1 }
 0x338   : > { %2199 = vmatmul.f32.gmra.mxu3 %v5283_v58  ;;  %v1905_v58 = vadd.f32 %v4921_v35, %v4719_v56  ;;  %v2297_v38 = vpop.f32.mrf.mxu0  ;;  %v2241_v10 = vpop.f32.mrf.mxu2 }
 0x33b   : > { %v5016_v45 = vpop.f32.mrf.mxu3 }
 0x33c   : > { %5323 = vst [vmem:[#allocation51_spill] sm:$0xff] %v5016_v45  ;;  %v1970_v45 = vadd.f32 %v4791_v60, %v1905_v58  ;;  %v1911_v60 = vadd.f32 %v4940_v63, %v4760_v34 }
 0x33e   : > { %v2035_v37 = vadd.f32 %v4805_v32, %v1970_v45  ;;  %v1976_v32 = vadd.f32 %v4815_v21, %v1911_v60 }
 0x340   : > { %2202 = vmatmul.f32.gmra.mxu3 %v4717_v26  ;;  %v2100_v35 = vadd.f32 %v4813_v24, %v2035_v37 }
 0x343   : > { %v5019_v53 = vpop.f32.mrf.mxu3 }
 0x344   : > { %5324 = vst [vmem:[#allocation52_spill] sm:$0xff] %v5019_v53  ;;  %v1908_v53 = vadd.f32 %v4933_v19, %v4744_v31 }
 0x346   : > { %v1973_v56 = vadd.f32 %v4803_v20, %v1908_v53 }
 0x348   : > { %2205 = vmatmul.f32.gmra.mxu3 %v4898_v8  ;;  %v2300_v8 = vpop.f32.mrf.mxu0  ;;  %v2038_v31 = vadd.f32 %v4818_v25, %v1973_v56  ;;  %v2041_v25 = vadd.f32 %v4832_v36, %v1976_v32  ;;  %v2244_v36 = vpop.f32.mrf.mxu2 }
 0x34b   : > { %v5022_v28 = vpop.f32.mrf.mxu3 }
 0x34c   : > { %5325 = vst [vmem:[#allocation53_spill] sm:$0xff] %v5022_v28  ;;  %v2365_v28 = vpop.f32.mrf.mxu1 }
 0x350   : > { %2208 = vmatmul.f32.gmra.mxu3 %v4915_v39  ;;  %v2303_v45 = vpop.f32.mrf.mxu0 }
 0x353   : > { %v5028_v26 = vpop.f32.mrf.mxu3 }
 0x354   : > { %5326 = vst [vmem:[#allocation54_spill] sm:$0xff] %v5028_v26  ;;  %v2103_v26 = vadd.f32 %v4825_v48, %v2038_v31  ;;  %v2368_v20 = vpop.f32.mrf.mxu1  ;;  %v1920_v31 = vadd.f32 %v4961_v29, %v4779_v6  ;;  %v1923_v6 = vadd.f32 %v4970_v17, %v4785_v4  ;;  %v1926_v4 = vadd.f32 %v4977_v15, %v4793_v9 }
 0x355   : > { %v1929_v9 = vadd.f32 %v4982_v47, %v4799_v27  ;;  %v5327_v47 = vld [vmem:[#allocation22_spill] sm:$0xff] }
 0x358   : > { %2338 = vmatmul.f32.vlgmr.msrb.gmra.mxu3 %v4862_v42 }
 0x35b   : > { %v2164_v39 = vpop.f32.mrf.mxu3 }
 0x35c   : > { %v2165_v41 = vadd.f32 %v2164_v39, %v2100_v35  ;;  %v1914_v35 = vadd.f32 %v4943_v54, %v4767_v2  ;;  %v1917_v39 = vadd.f32 %v4952_v57, %v4773_v59 }
 0x35e   : > { %v2230_v58 = vadd.f32 %v2229_v30, %v2165_v41  ;;  %v1979_v21 = vadd.f32 %v4828_v46, %v1914_v35  ;;  %v2106_v30 = vadd.f32 %v4841_v49, %v2041_v25  ;;  %v1982_v46 = vadd.f32 %v4845_v52, %v1917_v39 }
 0x35f   : > { %v1985_v52 = vadd.f32 %v4874_v23, %v1920_v31 }
 0x360   : > { %v2295_v19 = vadd.f32 %v2294_v18, %v2230_v58  ;;  %v2047_v57 = vadd.f32 %v4877_v61, %v1982_v46  ;;  %v1932_v46 = vadd.f32 %v4991_v11, %v4809_v62  ;;  %v5332_v11 = vld [vmem:[#allocation24_spill] sm:$0xff] }
 0x362   : > { %v2360_v42 = vadd.f32 %v2359_v43, %v2295_v19  ;;  %v2306_v43 = vpop.f32.mrf.mxu0 }
 0x363   : > { %v2167_v53 = vpop.f32.mrf.mxu3 }
 0x364   : > { %v2407_v24 = vmax.f32 %v2360_v42, 0.0  ;;  %v2168_v37 = vadd.f32 %v2167_v53, %v2103_v26  ;;  %v2371_v26 = vpop.f32.mrf.mxu1 }
 0x366   : > { %2423 = vst [vmem:[%s3484_s28] sm:$0xff] %v2407_v24  ;;  %v2233_v34 = vadd.f32 %v2232_v44, %v2168_v37  ;;  %v2044_v44 = vadd.f32 %v4858_v3, %v1979_v21  ;;  %v1988_v37 = vadd.f32 %v4892_v5, %v1923_v6 }
 0x368   : > { %v2298_v63 = vadd.f32 %v2297_v38, %v2233_v34  ;;  %v2109_v49 = vadd.f32 %v4867_v50, %v2044_v44  ;;  %v2112_v50 = vadd.f32 %v4887_v22, %v2047_v57  ;;  %v5330_v57 = vld [vmem:[#allocation37_spill] sm:$0xff] }
 0x36a   : > { %v2363_v41 = vadd.f32 %v2362_v40, %v2298_v63  ;;  %v2309_v19 = vpop.f32.mrf.mxu0  ;;  %v1991_v63 = vadd.f32 %v4912_v33, %v1926_v4  ;;  %v1994_v33 = vadd.f32 %v4931_v16, %v1929_v9 }
 0x36b   : > { %v2170_v48 = vpop.f32.mrf.mxu3 }
 0x36c   : > { %v2408_v18 = vmax.f32 %v2363_v41, 0.0  ;;  %v2171_v56 = vadd.f32 %v2170_v48, %v2106_v30  ;;  %v2374_v3 = vpop.f32.mrf.mxu1 }
 0x36e   : > { %2424 = vst [vmem:[%s3484_s28 + $0x8] sm:$0xff] %v2408_v18  ;;  %v2236_v2 = vadd.f32 %v2235_v14, %v2171_v56 }
 0x370   : > { %v2301_v54 = vadd.f32 %v2300_v8, %v2236_v2  ;;  %v2247_v8 = vpop.f32.mrf.mxu2 }
 0x372   : > { %v2366_v38 = vadd.f32 %v2365_v28, %v2301_v54  ;;  %v2312_v61 = vpop.f32.mrf.mxu0 }
 0x373   : > { %v2173_v40 = vpop.f32.mrf.mxu3 }
 0x374   : > { %v2409_v60 = vmax.f32 %v2366_v38, 0.0  ;;  %v2174_v58 = vadd.f32 %v2173_v40, %v2109_v49  ;;  %v2059_v38 = vadd.f32 %v5327_v47, %v1994_v33  ;;  %v5328_v40 = vld [vmem:[#allocation26_spill] sm:$0xff] }
 0x375   : > { %v1997_v16 = vadd.f32 %v5328_v40, %v1932_v46 }
 0x376   : > { %2425 = vst [vmem:[%s3484_s28 + $0x10] sm:$0xff] %v2409_v60  ;;  %v2239_v59 = vadd.f32 %v2238_v55, %v2174_v58  ;;  %v2050_v55 = vadd.f32 %v4895_v51, %v1985_v52  ;;  %v2053_v51 = vadd.f32 %v4919_v12, %v1988_v37  ;;  %v2056_v12 = vadd.f32 %v4936_v13, %v1991_v63  ;;  %v5329_v58 = vld [vmem:[#allocation35_spill] sm:$0xff]  ;;  %v5335_v37 = vld [vmem:[#allocation38_spill] sm:$0xff] }
 0x377   : > { %v2062_v52 = vadd.f32 %v5332_v11, %v1997_v16 }
 0x378   : > { %v2304_v14 = vadd.f32 %v2303_v45, %v2239_v59  ;;  %v2377_v45 = vpop.f32.mrf.mxu1  ;;  %v2250_v22 = vpop.f32.mrf.mxu2  ;;  %v2118_v41 = vadd.f32 %v4927_v1, %v2053_v51  ;;  %v2121_v39 = vadd.f32 %v4938_v7, %v2056_v12  ;;  %v2124_v7 = vadd.f32 %v5329_v58, %v2059_v38  ;;  %v5338_v51 = vld [vmem:[#allocation32_spill] sm:$0xff]  ;;  %v5342_v12 = vld [vmem:[#allocation33_spill] sm:$0xff] }
 0x37a   : > { %v2369_v28 = vadd.f32 %v2368_v20, %v2304_v14  ;;  %v2115_v20 = vadd.f32 %v4908_v0, %v2050_v55  ;;  %v2315_v21 = vpop.f32.mrf.mxu0 }
 0x37b   : > { %v2176_v32 = vpop.f32.mrf.mxu3 }
 0x37c   : > { %v2410_v42 = vmax.f32 %v2369_v28, 0.0  ;;  %v2177_v53 = vadd.f32 %v2176_v32, %v2112_v50 }
 0x37e   : > { %2426 = vst [vmem:[%s3484_s28 + $0x18] sm:$0xff] %v2410_v42  ;;  %v2242_v29 = vadd.f32 %v2241_v10, %v2177_v53  ;;  %v5333_v42 = vld [vmem:[#allocation28_spill] sm:$0xff] }
 0x380   : > { %v2307_v24 = vadd.f32 %v2306_v43, %v2242_v29  ;;  %v2380_v0 = vpop.f32.mrf.mxu1  ;;  %v2253_v18 = vpop.f32.mrf.mxu2  ;;  %v5334_v29 = vld [vmem:[#allocation27_spill] sm:$0xff] }
 0x381   : > { %v2127_v55 = vadd.f32 %v5334_v29, %v2062_v52 }
 0x382   : > { %v2372_v23 = vadd.f32 %v2371_v26, %v2307_v24  ;;  %v2318_v2 = vpop.f32.mrf.mxu0 }
 0x383   : > { %v2179_v35 = vpop.f32.mrf.mxu3 }
 0x384   : > { %v2411_v34 = vmax.f32 %v2372_v23, 0.0  ;;  %v2180_v25 = vadd.f32 %v2179_v35, %v2115_v20  ;;  %v5336_v23 = vld [vmem:[#allocation48_spill] sm:$0xff]  ;;  %v5337_v35 = vld [vmem:[#allocation29_spill] sm:$0xff] }
 0x385   : > { %v1938_v20 = vadd.f32 %v5336_v23, %v5335_v37  ;;  %v5354_v37 = vld [vmem:[#allocation42_spill] sm:$0xff] }
 0x386   : > { %2427 = vst [vmem:[%s3484_s28 + $0x20] sm:$0xff] %v2411_v34  ;;  %v2245_v10 = vadd.f32 %v2244_v36, %v2180_v25 }
 0x388   : > { %v2310_v17 = vadd.f32 %v2309_v19, %v2245_v10  ;;  %v2383_v54 = vpop.f32.mrf.mxu1  ;;  %v2256_v13 = vpop.f32.mrf.mxu2 }
 0x38a   : > { %v2375_v5 = vadd.f32 %v2374_v3, %v2310_v17  ;;  %v5331_v3 = vld [vmem:[#allocation44_spill] sm:$0xff]  ;;  %v2003_v17 = vadd.f32 %v5338_v51, %v1938_v20 }
 0x38b   : > { %v2182_v30 = vpop.f32.mrf.mxu3  ;;  %v1935_v14 = vadd.f32 %v5331_v3, %v5330_v57  ;;  %v5349_v57 = vld [vmem:[#allocation39_spill] sm:$0xff] }
 0x38c   : > { %v2412_v48 = vmax.f32 %v2375_v5, 0.0  ;;  %v2183_v43 = vadd.f32 %v2182_v30, %v2118_v41 }
 0x38d   : > { %v2000_v53 = vadd.f32 %v5333_v42, %v1935_v14 }
 0x38e   : > { %2428 = vst [vmem:[%s3484_s28 + $0x28] sm:$0xff] %v2412_v48  ;;  %v2248_v15 = vadd.f32 %v2247_v8, %v2183_v43  ;;  %v2321_v8 = vpop.f32.mrf.mxu0  ;;  %v5340_v43 = vld [vmem:[#allocation31_spill] sm:$0xff] }
 0x38f   : > { %v2065_v34 = vadd.f32 %v5337_v35, %v2000_v53  ;;  %v5352_v53 = vld [vmem:[#allocation41_spill] sm:$0xff] }
 0x390   : > { %v2313_v56 = vadd.f32 %v2312_v61, %v2248_v15  ;;  %v2386_v28 = vpop.f32.mrf.mxu1  ;;  %v2259_v32 = vpop.f32.mrf.mxu2 }
 0x392   : > { %v2378_v26 = vadd.f32 %v2377_v45, %v2313_v56  ;;  %v2068_v56 = vadd.f32 %v5342_v12, %v2003_v17  ;;  %v5356_v17 = vld [vmem:[#allocation25_spill] sm:$0xff] }
 0x393   : > { %v2185_v1 = vpop.f32.mrf.mxu3 }
 0x394   : > { %v2413_v44 = vmax.f32 %v2378_v26, 0.0  ;;  %v2186_v36 = vadd.f32 %v2185_v1, %v2121_v39  ;;  %v5343_v26 = vld [vmem:[#allocation36_spill] sm:$0xff] }
 0x396   : > { %2429 = vst [vmem:[%s3484_s28 + $0x30] sm:$0xff] %v2413_v44  ;;  %v2251_v27 = vadd.f32 %v2250_v22, %v2186_v36  ;;  %v2324_v25 = vpop.f32.mrf.mxu0  ;;  %v5344_v44 = vld [vmem:[#allocation20_spill] sm:$0xff] }
 0x397   : > { %v2133_v36 = vadd.f32 %v5344_v44, %v2068_v56 }
 0x398   : > { %v2316_v49 = vadd.f32 %v2315_v21, %v2251_v27  ;;  %v2389_v10 = vpop.f32.mrf.mxu1  ;;  %v5339_v21 = vld [vmem:[#allocation30_spill] sm:$0xff]  ;;  %v2262_v41 = vpop.f32.mrf.mxu2 }
 0x399   : > { %v2130_v5 = vadd.f32 %v5339_v21, %v2065_v34 }
 0x39a   : > { %v2381_v60 = vadd.f32 %v2380_v0, %v2316_v49  ;;  %v5346_v49 = vld [vmem:[#allocation52_spill] sm:$0xff] }
 0x39b   : > { %v2188_v31 = vpop.f32.mrf.mxu3 }
 0x39c   : > { %v2414_v19 = vmax.f32 %v2381_v60, 0.0  ;;  %v2189_v59 = vadd.f32 %v2188_v31, %v2124_v7  ;;  %v5347_v60 = vld [vmem:[#allocation23_spill] sm:$0xff]  ;;  %v5348_v31 = vld [vmem:[#allocation40_spill] sm:$0xff] }
 0x39e   : > { %2430 = vst [vmem:[%s3484_s28 + $0x38] sm:$0xff] %v2414_v19  ;;  %v2254_v62 = vadd.f32 %v2253_v18, %v2189_v59  ;;  %v5341_v18 = vld [vmem:[#allocation51_spill] sm:$0xff]  ;;  %v2327_v1 = vpop.f32.mrf.mxu0 }
 0x39f   : > { %v1941_v9 = vadd.f32 %v5341_v18, %v5340_v43  ;;  %v5359_v18 = vld [vmem:[#allocation47_spill] sm:$0xff] }
 0x3a0   : > { %v2319_v50 = vadd.f32 %v2318_v2, %v2254_v62  ;;  %v2265_v38 = vpop.f32.mrf.mxu2 }
 0x3a1   : > { %v2006_v39 = vadd.f32 %v5343_v26, %v1941_v9 }
 0x3a2   : > { %v2384_v6 = vadd.f32 %v2383_v54, %v2319_v50  ;;  %v2392_v54 = vpop.f32.mrf.mxu1  ;;  %v5351_v50 = vld [vmem:[#allocation53_spill] sm:$0xff] }
 0x3a3   : > { %v2191_v61 = vpop.f32.mrf.mxu3  ;;  %v2071_v58 = vadd.f32 %v5347_v60, %v2006_v39  ;;  %v5360_v39 = vld [vmem:[#allocation49_spill] sm:$0xff] }
 0x3a4   : > { %v2415_v24 = vmax.f32 %v2384_v6, 0.0  ;;  %v2192_v45 = vadd.f32 %v2191_v61, %v2127_v55  ;;  %v5353_v61 = vld [vmem:[#allocation43_spill] sm:$0xff] }
 0x3a5   : > { %v2136_v3 = vadd.f32 %v5349_v57, %v2071_v58 }
 0x3a6   : > { %2431 = vst [vmem:[%s3484_s28 + $0x40] sm:$0xff] %v2415_v24  ;;  %v2257_v22 = vadd.f32 %v2256_v13, %v2192_v45  ;;  %v5345_v13 = vld [vmem:[#allocation34_spill] sm:$0xff]  ;;  %v2330_v11 = vpop.f32.mrf.mxu0 }
 0x3a7   : > { %v1944_v40 = vadd.f32 %v5346_v49, %v5345_v13 }
 0x3a8   : > { %v2322_v4 = vadd.f32 %v2321_v8, %v2257_v22  ;;  %v2268_v29 = vpop.f32.mrf.mxu2 }
 0x3a9   : > { %v2009_v19 = vadd.f32 %v5348_v31, %v1944_v40 }
 0x3aa   : > { %v2387_v63 = vadd.f32 %v2386_v28, %v2322_v4  ;;  %v2395_v52 = vpop.f32.mrf.mxu1  ;;  %v5350_v28 = vld [vmem:[#allocation21_spill] sm:$0xff] }
 0x3ab   : > { %v2194_v0 = vpop.f32.mrf.mxu3  ;;  %v2074_v6 = vadd.f32 %v5352_v53, %v2009_v19 }
 0x3ac   : > { %v2416_v30 = vmax.f32 %v2387_v63, 0.0  ;;  %v2195_v48 = vadd.f32 %v2194_v0, %v2130_v5  ;;  %v5357_v63 = vld [vmem:[#allocation54_spill] sm:$0xff] }
 0x3ad   : > { %v2139_v23 = vadd.f32 %v5354_v37, %v2074_v6  ;;  %v1950_v21 = vadd.f32 %v5357_v63, %v5356_v17 }
 0x3ae   : > { %2432 = vst [vmem:[%s3484_s28 + $0x48] sm:$0xff] %v2416_v30  ;;  %v2260_v15 = vadd.f32 %v2259_v32, %v2195_v48  ;;  %v1947_v32 = vadd.f32 %v5351_v50, %v5350_v28  ;;  %v5358_v30 = vld [vmem:[#allocation46_spill] sm:$0xff] }
 0x3af   : > { %v2015_v9 = vadd.f32 %v5359_v18, %v1950_v21 }
 0x3b0   : > { %v2325_v33 = vadd.f32 %v2324_v25, %v2260_v15  ;;  %v2012_v24 = vadd.f32 %v5353_v61, %v1947_v32  ;;  %v5355_v25 = vld [vmem:[#allocation45_spill] sm:$0xff] }
 0x3b2   : > { %v2390_v2 = vadd.f32 %v2389_v10, %v2325_v33  ;;  %v2077_v4 = vadd.f32 %v5355_v25, %v2012_v24  ;;  %v2333_v10 = vpop.f32.mrf.mxu0  ;;  %v2398_v51 = vpop.f32.mrf.mxu1 }
 0x3b3   : > { %v2197_v46 = vpop.f32.mrf.mxu3 }
 0x3b4   : > { %v2417_v27 = vmax.f32 %v2390_v2, 0.0  ;;  %v2198_v47 = vadd.f32 %v2197_v46, %v2133_v36  ;;  %v2142_v48 = vadd.f32 %v5358_v30, %v2077_v4 }
 0x3b6   : > { %2433 = vst [vmem:[%s3484_s28 + $0x50] sm:$0xff] %v2417_v27  ;;  %v2263_v16 = vadd.f32 %v2262_v41, %v2198_v47  ;;  %v2271_v41 = vpop.f32.mrf.mxu2  ;;  %v5361_v27 = vld [vmem:[#allocation50_spill] sm:$0xff] }
 0x3b8   : > { %v2328_v7 = vadd.f32 %v2327_v1, %v2263_v16  ;;  %v2080_v1 = vadd.f32 %v5360_v39, %v2015_v9 }
 0x3ba   : > { %v2393_v59 = vadd.f32 %v2392_v54, %v2328_v7  ;;  %v2336_v33 = vpop.f32.mrf.mxu0  ;;  %v2401_v2 = vpop.f32.mrf.mxu1  ;;  %v2145_v47 = vadd.f32 %v5361_v27, %v2080_v1 }
 0x3bb   : > { %v2200_v14 = vpop.f32.mrf.mxu3 }
 0x3bc   : > { %v2418_v8 = vmax.f32 %v2393_v59, 0.0  ;;  %v2201_v62 = vadd.f32 %v2200_v14, %v2136_v3 }
 0x3be   : > { %2434 = vst [vmem:[%s3484_s28 + $0x58] sm:$0xff] %v2418_v8  ;;  %v2266_v42 = vadd.f32 %v2265_v38, %v2201_v62  ;;  %v2274_v36 = vpop.f32.mrf.mxu2 }
 0x3c0   : > { %v2331_v55 = vadd.f32 %v2330_v11, %v2266_v42 }
 0x3c2   : > { %v2396_v45 = vadd.f32 %v2395_v52, %v2331_v55 }
 0x3c3   : > { %v2203_v20 = vpop.f32.mrf.mxu3 }
 0x3c4   : > { %v2419_v22 = vmax.f32 %v2396_v45, 0.0  ;;  %v2204_v35 = vadd.f32 %v2203_v20, %v2139_v23 }
 0x3c6   : > { %2435 = vst [vmem:[%s3484_s28 + $0x60] sm:$0xff] %v2419_v22  ;;  %v2269_v34 = vadd.f32 %v2268_v29, %v2204_v35  ;;  %v2404_v16 = vpop.f32.mrf.mxu2 }
 0x3c8   : > { %v2334_v5 = vadd.f32 %v2333_v10, %v2269_v34 }
 0x3ca   : > { %v2399_v0 = vadd.f32 %v2398_v51, %v2334_v5 }
 0x3cb   : > { %v2206_v43 = vpop.f32.mrf.mxu3 }
 0x3cc   : > { %v2420_v15 = vmax.f32 %v2399_v0, 0.0  ;;  %v2207_v12 = vadd.f32 %v2206_v43, %v2142_v48 }
 0x3ce   : > { %2436 = vst [vmem:[%s3484_s28 + $0x68] sm:$0xff] %v2420_v15  ;;  %v2272_v56 = vadd.f32 %v2271_v41, %v2207_v12 }
 0x3d0   : > { %v2337_v26 = vadd.f32 %v2336_v33, %v2272_v56 }
 0x3d2   : > { %v2402_v44 = vadd.f32 %v2401_v2, %v2337_v26 }
 0x3d3   : > { %v2209_v54 = vpop.f32.mrf.mxu3 }
 0x3d4   : > { %v2421_v46 = vmax.f32 %v2402_v44, 0.0  ;;  %v2210_v38 = vadd.f32 %v2209_v54, %v2145_v47 }
 0x3d6   : > { %2437 = vst [vmem:[%s3484_s28 + $0x70] sm:$0xff] %v2421_v46  ;;  %v2275_v13 = vadd.f32 %v2274_v36, %v2210_v38 }
 0x3db   : > { %v2339_v49 = vpop.f32.mrf.mxu3 }
 0x3dc   : > { %v2340_v40 = vadd.f32 %v2339_v49, %v2275_v13 }
 0x3de   : > { %v2405_v60 = vadd.f32 %v2404_v16, %v2340_v40 }
 0x3e0   : > { %v2422_v58 = vmax.f32 %v2405_v60, 0.0 }
 0x3e2   : > { %2438 = vst [vmem:[%s3484_s28 + $0x78] sm:$0xff] %v2422_v58 }
 0x3e3   : > { %3197 = shalt.err (!%p3194_p9)
}
 0x3e4   : > { %s3306_s12 = smov 128   ;;  %s3307_s28 = smov 8  }
 0x3e5   : > { %2654 = dma.vmem_to_hbm [thread:$0]  (%p3398_p6), %s2456_s19, 2048, %s2458_s20, %s2440_s11, %s3306_s12, %s3306_s12, %s3307_s28  }
 0x3e6 PF: > { %s5363_s8 = sld [smem:[#allocation14_spill]]  ;;  %p2676_p12 = scmp.ge.s32.totalorder %s3296_s22, 2 }
 0x3e8   : > { %p2668_p13 = pnand %p2676_p12, %p3404_p10 }
 0x3ea   : > { %p2669_p11 = pneg %p2668_p13 }
 0x3ec   : > { %s2472_s23 = sand.u32 1, %s5363_s8  }
 0x3ed   : > { %s2473_s24 = scalar_lea.sflag [#allocation6], %s2472_s23 }
 0x3ee   : > { %3251 = dma.done.wait (%p2669_p11), %s2473_s24, 2048  }
 0x3ef   : > { %3253 = vsyncadd (%p2669_p11), %s2473_s24, 4294965248  ;;  %s20_s22 = sadd.s32 1, %s3296_s22   ;;  %s5365_s6 = smov %s3452_s15 }
 0x3f0   : > { %p17_p0 = scmp.ge.s32.totalorder %s20_s22, 6   ;;  %s5366_s18 = sld [smem:[#allocation15_spill]] }
 0x3f1   : > { %s5367_s20 = sld [smem:[#allocation18_spill]]  ;;  %s5369_s12 = smov %s3260_s13 }
 0x3f2   : > { %s5368_s10 = sld [smem:[#allocation19_spill]]  ;;  %s5370_s13 = smov %s3264_s14 }
 0x3f3   : > { %s5371_s14 = smov %s3455_s1  ;;  %s5372_s15 = smov %s3272_s16 }
 0x3f4   : > { %s5373_s16 = smov %s3276_s17  ;;  %s5374_s17 = smov %s5365_s6 }
 0x3f5   : > { %s5375_s19 = smov %s3292_s21  ;;  %19 = sbr.rel (!%p17_p0) target bundleno = 13 (0xd), region = 91 }
 0x3f8   : > { %s5376_s21 = smov %s5368_s10 }
 0x3fa   :  { %2479 = vsyncpa [#allocation5], 1 }
 0x3fb   :  { %2481 = vsyncpa [#allocation5 + $0x1], 1 }
 0x3fc   :  { %2482 = vsyncpa [#allocation8], 1 }
 0x3fd   :  { %2483 = vsyncpa [#allocation6], 1 }
 0x3fe   :  { %2485 = vsyncpa [#allocation6 + $0x1], 1 }

</bundles_post_ra>
